<compile_context>
chip_gen: v6e
topology: v6e:2x2x1
jax: 0.10.0
libtpu: 0.0.40
codegen_flags: <defaults>
</compile_context>

<pallas_src>
import functools
import math

import numpy as np
import jax
import jax.numpy as jnp
from jax.experimental import pallas as pl
from jax.experimental.pallas import tpu as pltpu

# ----------------------------------------------------------------------------
# Static model config (Segformer-B0 shapes, small decoder for the demo)
# ----------------------------------------------------------------------------
CHANNELS = (32, 64, 160, 256)      # mit_b0 channels
PATCH = (4, 2, 2, 2)               # per-stage downsampling (total strides 4/8/16/32)
EMBED_DIM = 64                     # cfg.MODEL.decoder_embed_dim (small for demo)
NUM_CLASSES = 8                    # cfg.DATASET.num_classes (small for demo)
LN_EPS = 1e-5                      # nn.LayerNorm default
BN_EPS = 1e-5                      # nn.BatchNorm2d default
ROW_TILE = 1024                    # M-tile (rows = pixels), review: 512 -> 1024
LAM_SCALE = 65536.0                # fixed-point scale for prefetched interp weights

_CP_1P = pltpu.CompilerParams(dimension_semantics=("parallel",),
                              vmem_limit_bytes=32 * 1024 * 1024)
_CP_2P = pltpu.CompilerParams(dimension_semantics=("parallel", "parallel"),
                              vmem_limit_bytes=32 * 1024 * 1024)


# ----------------------------------------------------------------------------
# Helpers
# ----------------------------------------------------------------------------
def _row_tile(m):
    return ROW_TILE if m >= ROW_TILE else m + ((-m) % 8)


def _pad_rows(x, mult):
    pad = (-x.shape[0]) % mult
    return jnp.pad(x, ((0, pad), (0, 0))) if pad else x


def _interp_tables(src, dst):
    """PyTorch bilinear (align_corners=False) source rows + fixed-point weights."""
    d = np.arange(dst, dtype=np.float64)
    s = np.maximum((d + 0.5) * (src / dst) - 0.5, 0.0)
    i0 = np.clip(np.floor(s).astype(np.int32), 0, src - 1)
    i1 = np.minimum(i0 + 1, src - 1).astype(np.int32)
    lam = np.clip(s - i0, 0.0, 1.0)
    lamq = np.round(lam * LAM_SCALE).astype(np.int32)   # exact fixed-point in SMEM
    return i0, i1, lamq


def _interp_matrix(src, dst):
    """Dense (dst, src) bilinear interpolation matrix (rows sum to 1)."""
    i0, i1, lamq = _interp_tables(src, dst)
    lam = lamq.astype(np.float64) / LAM_SCALE
    r = np.zeros((dst, src), np.float32)
    r[np.arange(dst), i0] += (1.0 - lam)
    r[np.arange(dst), i1] += lam
    return r


# ----------------------------------------------------------------------------
# Kernel A: patch-embed matmul + bias + fused LayerNorm epilogue (encoder stage)
# ----------------------------------------------------------------------------
def _patch_embed_ln_kernel(x_ref, w_ref, b_ref, g_ref, bt_ref, o_ref, *, eps):
    y = jnp.dot(x_ref[...], w_ref[...], preferred_element_type=jnp.float32)
    y = y + b_ref[...]
    mu = jnp.mean(y, axis=-1, keepdims=True)
    yc = y - mu
    var = jnp.mean(yc * yc, axis=-1, keepdims=True)
    y = yc * jax.lax.rsqrt(var + eps) * g_ref[...] + bt_ref[...]
    o_ref[...] = y.astype(o_ref.dtype)


def patch_embed_ln(x, w, b, gamma, beta, *, eps=LN_EPS, out_dtype=jnp.bfloat16):
    M, K = x.shape
    N = w.shape[1]
    tm = _row_tile(M)
    xp = _pad_rows(x, tm)
    Mp = xp.shape[0]
    out = pl.pallas_call(
        functools.partial(_patch_embed_ln_kernel, eps=eps),
        out_shape=jax.ShapeDtypeStruct((Mp, N), out_dtype),
        grid=(Mp // tm,),
        in_specs=[
            pl.BlockSpec((tm, K), lambda i: (i, 0)),
            pl.BlockSpec((K, N), lambda i: (0, 0)),
            pl.BlockSpec((1, N), lambda i: (0, 0)),
            pl.BlockSpec((1, N), lambda i: (0, 0)),
            pl.BlockSpec((1, N), lambda i: (0, 0)),
        ],
        out_specs=pl.BlockSpec((tm, N), lambda i: (i, 0)),
        compiler_params=_CP_1P,
    )(xp, w, b.reshape(1, N), gamma.reshape(1, N), beta.reshape(1, N))
    return out[:M] if Mp != M else out


# ----------------------------------------------------------------------------
# Kernel B: fused MLP decoder
#   per (b, output-row): H-gather+blend raw features, project (linear_c),
#   W-interp via resident matmul, concat->K=4E fuse matmul, BN+ReLU, classifier.
# ----------------------------------------------------------------------------
def _decoder_kernel(i0_ref, i1_ref, lam_ref,
                    f0_ref, f1a_ref, f1b_ref, f2a_ref, f2b_ref, f3a_ref, f3b_ref,
                    w0_ref, b0_ref, w1_ref, b1_ref, w2_ref, b2_ref, w3_ref, b3_ref,
                    r1_ref, r2_ref, r3_ref,
                    fw_ref, bns_ref, bnh_ref, pw_ref, pb_ref,
                    o_ref, cat_ref, *, embed_dim):
    h = pl.program_id(1)
    e = embed_dim

    def project_hi(fa_ref, fb_ref, w_ref, b_ref, r_ref, s):
        # H-axis bilinear blend of the *raw* feature rows (commutes with the linear
        # projection), then project, then W-axis bilinear as a tiny resident matmul.
        lam = lam_ref[s, h].astype(jnp.float32) * (1.0 / LAM_SCALE)
        a = fa_ref[0, 0].astype(jnp.float32)
        bb = fb_ref[0, 0].astype(jnp.float32)
        blend = (a + lam * (bb - a)).astype(jnp.bfloat16)               # (Ws, Cs)
        p = jnp.dot(blend, w_ref[...],
                    preferred_element_type=jnp.float32) + b_ref[...]    # (Ws, E)
        return jnp.dot(r_ref[...], p.astype(jnp.bfloat16),
                       preferred_element_type=jnp.float32)              # (W1, E)

    # scale 0 (stride 4) is already at the target 1/4 resolution
    x0 = jnp.dot(f0_ref[0, 0], w0_ref[...],
                 preferred_element_type=jnp.float32) + b0_ref[...]
    x1 = project_hi(f1a_ref, f1b_ref, w1_ref, b1_ref, r1_ref, 0)
    x2 = project_hi(f2a_ref, f2b_ref, w2_ref, b2_ref, r2_ref, 1)
    x3 = project_hi(f3a_ref, f3b_ref, w3_ref, b3_ref, r3_ref, 2)

    # concat([c4, c3, c2, c1]) packed into one K=4E matmul (full MXU depth)
    cat_ref[:, 0 * e:1 * e] = x3
    cat_ref[:, 1 * e:2 * e] = x2
    cat_ref[:, 2 * e:3 * e] = x1
    cat_ref[:, 3 * e:4 * e] = x0
    hf = jnp.dot(cat_ref[...].astype(jnp.bfloat16), fw_ref[...],
                 preferred_element_type=jnp.float32)
    hf = jnp.maximum(hf * bns_ref[...] + bnh_ref[...], 0.0)             # BN + ReLU
    y = jnp.dot(hf.astype(jnp.bfloat16), pw_ref[...],
                preferred_element_type=jnp.float32) + pb_ref[...]       # classifier
    o_ref[0, 0] = y.astype(o_ref.dtype)


def decoder_forward(params, feats):
    f0, f1, f2, f3 = feats
    B, H1, W1, C0 = f0.shape
    E, NC = EMBED_DIM, NUM_CLASSES

    # Trace-time (host) interpolation tables: H-axis gather indices + fixed-point
    # weights per reduced scale, and dense W-axis interp matrices (tiny, resident).
    i0s, i1s, lams, rmats = [], [], [], []
    for f in (f1, f2, f3):
        i0, i1, lamq = _interp_tables(f.shape[1], H1)
        i0s.append(i0); i1s.append(i1); lams.append(lamq)
        rmats.append(jnp.asarray(_interp_matrix(f.shape[2], W1), jnp.bfloat16))
    i0 = jnp.asarray(np.stack(i0s))
    i1 = jnp.asarray(np.stack(i1s))
    lamq = jnp.asarray(np.stack(lams))

    lc = params["linear_c"]
    feat_specs = [
        pl.BlockSpec((1, 1, W1, C0), lambda b, h, i0r, i1r, lr: (b, h, 0, 0)),
        pl.BlockSpec((1, 1) + f1.shape[2:], lambda b, h, i0r, i1r, lr: (b, i0r[0, h], 0, 0)),
        pl.BlockSpec((1, 1) + f1.shape[2:], lambda b, h, i0r, i1r, lr: (b, i1r[0, h], 0, 0)),
        pl.BlockSpec((1, 1) + f2.shape[2:], lambda b, h, i0r, i1r, lr: (b, i0r[1, h], 0, 0)),
        pl.BlockSpec((1, 1) + f2.shape[2:], lambda b, h, i0r, i1r, lr: (b, i1r[1, h], 0, 0)),
        pl.BlockSpec((1, 1) + f3.shape[2:], lambda b, h, i0r, i1r, lr: (b, i0r[2, h], 0, 0)),
        pl.BlockSpec((1, 1) + f3.shape[2:], lambda b, h, i0r, i1r, lr: (b, i1r[2, h], 0, 0)),
    ]

    def resident(shape):
        n = len(shape)
        return pl.BlockSpec(shape, lambda *args, _n=n: (0,) * _n)

    weight_specs = [
        resident(lc[0]["w"].shape), resident((1, E)),
        resident(lc[1]["w"].shape), resident((1, E)),
        resident(lc[2]["w"].shape), resident((1, E)),
        resident(lc[3]["w"].shape), resident((1, E)),
        resident(rmats[0].shape), resident(rmats[1].shape), resident(rmats[2].shape),
        resident((4 * E, E)), resident((1, E)), resident((1, E)),
        resident((E, NC)), resident((1, NC)),
    ]

    grid_spec = pltpu.PrefetchScalarGridSpec(
        num_scalar_prefetch=3,
        grid=(B, H1),
        in_specs=feat_specs + weight_specs,
        out_specs=pl.BlockSpec((1, 1, W1, NC),
                               lambda b, h, i0r, i1r, lr: (b, h, 0, 0)),
        scratch_shapes=[pltpu.VMEM((W1, 4 * E), jnp.float32)],
    )
    logits = pl.pallas_call(
        functools.partial(_decoder_kernel, embed_dim=E),
        out_shape=jax.ShapeDtypeStruct((B, H1, W1, NC), jnp.bfloat16),
        grid_spec=grid_spec,
        compiler_params=_CP_2P,
    )(i0, i1, lamq,
      f0, f1, f1, f2, f2, f3, f3,
      lc[0]["w"], lc[0]["b"].reshape(1, E),
      lc[1]["w"], lc[1]["b"].reshape(1, E),
      lc[2]["w"], lc[2]["b"].reshape(1, E),
      lc[3]["w"], lc[3]["b"].reshape(1, E),
      rmats[0], rmats[1], rmats[2],
      params["fuse_w"], params["bn_scale"].reshape(1, E),
      params["bn_shift"].reshape(1, E),
      params["pred_w"], params["pred_b"].reshape(1, NC))
    return logits


# ----------------------------------------------------------------------------
# Kernel C: row-blend bilinear resize along axis 1 (lane-dense flattened blocks)
# ----------------------------------------------------------------------------
def _resize_rows_kernel(i0_ref, i1_ref, lam_ref, x0_ref, x1_ref, o_ref):
    o = pl.program_id(1)
    lam = lam_ref[o].astype(jnp.float32) * (1.0 / LAM_SCALE)
    a = x0_ref[...].astype(jnp.float32)
    b = x1_ref[...].astype(jnp.float32)
    o_ref[...] = (a + lam * (b - a)).astype(o_ref.dtype)


def resize_axis1(x, out_size, out_dtype=None):
    """Bilinear (align_corners=False) resize along axis 1 of a (B, S, D) array."""
    B, S, D = x.shape
    out_dtype = out_dtype or x.dtype
    if S == out_size:
        return x.astype(out_dtype)
    i0, i1, lamq = (jnp.asarray(t) for t in _interp_tables(S, out_size))
    g = math.gcd(D, 128)                 # lane-dense last dim whenever possible
    T = D // g
    x4 = x.reshape(B, S, T, g)
    grid_spec = pltpu.PrefetchScalarGridSpec(
        num_scalar_prefetch=3,
        grid=(B, out_size),
        in_specs=[
            pl.BlockSpec((1, 1, T, g), lambda b, o, i0r, i1r, lr: (b, i0r[o], 0, 0)),
            pl.BlockSpec((1, 1, T, g), lambda b, o, i0r, i1r, lr: (b, i1r[o], 0, 0)),
        ],
        out_specs=pl.BlockSpec((1, 1, T, g), lambda b, o, i0r, i1r, lr: (b, o, 0, 0)),
    )
    # TODO(synk): fold the two source-row streams into one (1,2,T,g) fetch (needs a
    # replicated trailing row + element-offset block) to halve per-step DMA issue.
    out = pl.pallas_call(
        _resize_rows_kernel,
        out_shape=jax.ShapeDtypeStruct((B, out_size, T, g), out_dtype),
        grid_spec=grid_spec,
        compiler_params=_CP_2P,
    )(i0, i1, lamq, x4, x4)
    return out.reshape(B, out_size, D)


def upsample_to_nchw(logits, H, W):
    """(B, H/4, W/4, NC) logits -> (B, NC, H, W) full-res bilinear (no corners)."""
    B, H1, W1, NC = logits.shape
    x = resize_axis1(logits.reshape(B, H1, W1 * NC), H)               # H axis (bf16)
    x = x.reshape(B, H, W1, NC).transpose(0, 2, 1, 3)                 # (B, W1, H, NC)
    x = resize_axis1(x.reshape(B, W1, H * NC), W, out_dtype=jnp.float32)
    x = x.reshape(B, W, H, NC)
    return jnp.transpose(x, (0, 3, 2, 1))                             # (B, NC, H, W)


# ----------------------------------------------------------------------------
# Parameters (deterministic synthetic init; shapes follow mit_b0 + MLPDecoder)
# ----------------------------------------------------------------------------
def init_params(key):
    keys = iter(jax.random.split(key, 16))
    stages = []
    in_c = 3
    for c, p in zip(CHANNELS, PATCH):
        fan_in = p * p * in_c
        stages.append(dict(
            w=(jax.random.normal(next(keys), (fan_in, c), jnp.float32)
               * jnp.sqrt(2.0 / fan_in)).astype(jnp.bfloat16),
            b=jnp.zeros((c,), jnp.float32),
            gamma=jnp.ones((c,), jnp.float32),
            beta=jnp.zeros((c,), jnp.float32),
        ))
        in_c = c
    linear_c = []
    for c in CHANNELS:
        linear_c.append(dict(
            w=(jax.random.normal(next(keys), (c, EMBED_DIM), jnp.float32)
               * jnp.sqrt(2.0 / c)).astype(jnp.bfloat16),
            b=jnp.zeros((EMBED_DIM,), jnp.float32),
        ))
    # linear_fuse: 1x1 conv over concat([c4, c3, c2, c1]) -> single (4E, E) matrix
    fuse_w = (jax.random.normal(next(keys), (4 * EMBED_DIM, EMBED_DIM), jnp.float32)
              * jnp.sqrt(2.0 / (4 * EMBED_DIM))).astype(jnp.bfloat16)
    # BatchNorm2d folded to per-channel scale/shift (inference statistics)
    bn_gamma = jnp.ones((EMBED_DIM,), jnp.float32)
    bn_beta = jnp.zeros((EMBED_DIM,), jnp.float32)
    bn_mean = jnp.zeros((EMBED_DIM,), jnp.float32)
    bn_var = jnp.ones((EMBED_DIM,), jnp.float32)
    bn_scale = bn_gamma / jnp.sqrt(bn_var + BN_EPS)
    bn_shift = bn_beta - bn_mean * bn_scale
    # classifier (bf16 weights: MXU-native on v5e/v6e/v7x)
    pred_w = (jax.random.normal(next(keys), (EMBED_DIM, NUM_CLASSES), jnp.float32)
              * jnp.sqrt(2.0 / EMBED_DIM)).astype(jnp.bfloat16)
    pred_b = jnp.zeros((NUM_CLASSES,), jnp.float32)
    return dict(stages=stages, linear_c=linear_c, fuse_w=fuse_w,
                bn_scale=bn_scale, bn_shift=bn_shift,
                pred_w=pred_w, pred_b=pred_b)


# ----------------------------------------------------------------------------
# Forward pass
# ----------------------------------------------------------------------------
def backbone_forward(params, x_nhwc):
    """Hierarchical encoder: 4 stages of patch-embed (matmul) + fused LayerNorm.
    Returns 4 NHWC bf16 feature maps at strides 4/8/16/32 with channels CHANNELS."""
    # TODO(synk): full MiT (mra_transformer) blocks (efficient self-attention +
    # Mix-FFN) are not reproducible here (encoder source not provided); backbone is
    # reduced to hierarchical patch embedding + LayerNorm with matching
    # shapes/strides/channels.
    feats = []
    x = x_nhwc
    for stage, p in zip(params["stages"], PATCH):
        B, H, W, C = x.shape
        Ho, Wo = H // p, W // p
        # TODO(synk): space-to-depth is still an XLA reshape/transpose (now bf16);
        # it could be folded into the patch-embed BlockSpec to drop one HBM pass.
        xp = (x.reshape(B, Ho, p, Wo, p, C)
               .transpose(0, 1, 3, 2, 4, 5)
               .reshape(B * Ho * Wo, p * p * C))
        y = patch_embed_ln(xp, stage["w"], stage["b"], stage["gamma"], stage["beta"])
        x = y.reshape(B, Ho, Wo, -1)
        feats.append(x)
    return feats


@jax.jit
def encoder_decoder_forward(params, rgb_nchw):
    """Equivalent of EncoderDecoder.forward(rgb, label=None): NCHW logits at
    full input resolution."""
    B, _C, H, W = rgb_nchw.shape
    x = jnp.transpose(rgb_nchw.astype(jnp.bfloat16), (0, 2, 3, 1))   # NCHW -> NHWC
    feats = backbone_forward(params, x)
    logits_q = decoder_forward(params, feats)            # (B, H/4, W/4, classes) bf16
    return upsample_to_nchw(logits_q, H, W)               # (B, classes, H, W) f32


# ----------------------------------------------------------------------------
if __name__ == "__main__":
    key = jax.random.PRNGKey(0)
    pkey, xkey = jax.random.split(key)
    params = init_params(pkey)

    # small demo input: batch=2, RGB, 64x64 (divisible by total stride 32)
    rgb = jax.random.normal(xkey, (2, 3, 64, 64), jnp.float32)

    out = encoder_decoder_forward(params, rgb)
    out = jax.block_until_ready(out)

    assert out.shape == (2, NUM_CLASSES, 64, 64), out.shape
    assert bool(jnp.all(jnp.isfinite(out)))
    print("KERNEL_OK")
</pallas_src>

<mosaic_0001>
module attributes {stable_mosaic.version = 11 : i64} {
  func.func @_patch_embed_ln_kernel(%arg0: i32, %arg1: memref<512x48xbf16, #tpu.memory_space<vmem>>, %arg2: memref<48x32xbf16, #tpu.memory_space<vmem>>, %arg3: memref<1x32xf32, #tpu.memory_space<vmem>>, %arg4: memref<1x32xf32, #tpu.memory_space<vmem>>, %arg5: memref<1x32xf32, #tpu.memory_space<vmem>>, %arg6: memref<512x32xbf16, #tpu.memory_space<vmem>>) attributes {dimension_semantics = [#tpu.dimension_semantics<parallel>], iteration_bounds = array<i64: 1>, scalar_prefetch = 0 : i64, scratch_operands = 0 : i64, tpu.core_type = #tpu.core_type<tc>, window_params = [{transform_indices = @transform_0, window_bounds = array<i64: 512, 48>}, {pipeline_mode = #tpu.pipeline_mode<synchronous>, transform_indices = @transform_1, window_bounds = array<i64: 48, 32>}, {pipeline_mode = #tpu.pipeline_mode<synchronous>, transform_indices = @transform_2, window_bounds = array<i64: 1, 32>}, {pipeline_mode = #tpu.pipeline_mode<synchronous>, transform_indices = @transform_3, window_bounds = array<i64: 1, 32>}, {pipeline_mode = #tpu.pipeline_mode<synchronous>, transform_indices = @transform_4, window_bounds = array<i64: 1, 32>}, {transform_indices = @transform_5, window_bounds = array<i64: 512, 32>}]} {
    %c0 = arith.constant 0 : index
    %c0_0 = arith.constant 0 : index
    %0 = vector.load %arg1[%c0, %c0_0] : memref<512x48xbf16, #tpu.memory_space<vmem>>, vector<512x48xbf16>
    %c0_1 = arith.constant 0 : index
    %c0_2 = arith.constant 0 : index
    %1 = vector.load %arg2[%c0_1, %c0_2] : memref<48x32xbf16, #tpu.memory_space<vmem>>, vector<48x32xbf16>
    %cst = arith.constant dense<0.000000e+00> : vector<512x32xf32>
    %2 = tpu.matmul %0, %1, %cst {dimension_numbers = #tpu.dot_dimension_numbers<[1], [0], [0], [1], [0, 0, 1, 1], [], []>} : vector<512x48xbf16>, vector<48x32xbf16>, vector<512x32xf32> -> vector<512x32xf32>
    %c0_3 = arith.constant 0 : index
    %c0_4 = arith.constant 0 : index
    %3 = vector.load %arg3[%c0_3, %c0_4] : memref<1x32xf32, #tpu.memory_space<vmem>>, vector<1x32xf32>
    %4 = vector.broadcast %3 : vector<1x32xf32> to vector<512x32xf32>
    %5 = arith.addf %2, %4 : vector<512x32xf32>
    %cst_5 = arith.constant dense<0.000000e+00> : vector<512xf32>
    %6 = vector.multi_reduction <add>, %5, %cst_5 [1] : vector<512x32xf32> to vector<512xf32>
    %7 = vector.shape_cast %6 : vector<512xf32> to vector<512x1xf32>
    %cst_6 = arith.constant 3.200000e+01 : f32
    %8 = vector.broadcast %cst_6 : f32 to vector<512x1xf32>
    %9 = arith.divf %7, %8 : vector<512x1xf32>
    %10 = vector.broadcast %9 : vector<512x1xf32> to vector<512x32xf32>
    %11 = arith.subf %5, %10 : vector<512x32xf32>
    %12 = arith.mulf %11, %11 : vector<512x32xf32>
    %cst_7 = arith.constant dense<0.000000e+00> : vector<512xf32>
    %13 = vector.multi_reduction <add>, %12, %cst_7 [1] : vector<512x32xf32> to vector<512xf32>
    %14 = vector.shape_cast %13 : vector<512xf32> to vector<512x1xf32>
    %cst_8 = arith.constant 3.200000e+01 : f32
    %15 = vector.broadcast %cst_8 : f32 to vector<512x1xf32>
    %16 = arith.divf %14, %15 : vector<512x1xf32>
    %cst_9 = arith.constant 9.99999974E-6 : f32
    %17 = vector.broadcast %cst_9 : f32 to vector<512x1xf32>
    %18 = arith.addf %16, %17 : vector<512x1xf32>
    %19 = math.rsqrt %18 : vector<512x1xf32>
    %20 = vector.broadcast %19 : vector<512x1xf32> to vector<512x32xf32>
    %21 = arith.mulf %11, %20 : vector<512x32xf32>
    %c0_10 = arith.constant 0 : index
    %c0_11 = arith.constant 0 : index
    %22 = vector.load %arg4[%c0_10, %c0_11] : memref<1x32xf32, #tpu.memory_space<vmem>>, vector<1x32xf32>
    %23 = vector.broadcast %22 : vector<1x32xf32> to vector<512x32xf32>
    %24 = arith.mulf %21, %23 : vector<512x32xf32>
    %c0_12 = arith.constant 0 : index
    %c0_13 = arith.constant 0 : index
    %25 = vector.load %arg5[%c0_12, %c0_13] : memref<1x32xf32, #tpu.memory_space<vmem>>, vector<1x32xf32>
    %26 = vector.broadcast %25 : vector<1x32xf32> to vector<512x32xf32>
    %27 = arith.addf %24, %26 : vector<512x32xf32>
    %28 = arith.truncf %27 : vector<512x32xf32> to vector<512x32xbf16>
    %c0_14 = arith.constant 0 : index
    %c0_15 = arith.constant 0 : index
    %29 = vector.load %arg6[%c0_14, %c0_15] : memref<512x32xbf16, #tpu.memory_space<vmem>>, vector<512x32xbf16>
    tpu.vector_store %arg6[%c0_14, %c0_15], %28 {strides = array<i32>} : memref<512x32xbf16, #tpu.memory_space<vmem>>, vector<512x32xbf16>,
    return
  }
  func.func @transform_0(%arg0: i32) -> (i32, i32) {
    %c0_i32 = arith.constant 0 : i32
    %c0_i32_0 = arith.constant 0 : i32
    return %arg0, %c0_i32 : i32, i32
  }
  func.func @transform_1(%arg0: i32) -> (i32, i32) {
    %c0_i32 = arith.constant 0 : i32
    %c0_i32_0 = arith.constant 0 : i32
    %c0_i32_1 = arith.constant 0 : i32
    return %c0_i32, %c0_i32_0 : i32, i32
  }
  func.func @transform_2(%arg0: i32) -> (i32, i32) {
    %c0_i32 = arith.constant 0 : i32
    %c0_i32_0 = arith.constant 0 : i32
    %c0_i32_1 = arith.constant 0 : i32
    return %c0_i32, %c0_i32_0 : i32, i32
  }
  func.func @transform_3(%arg0: i32) -> (i32, i32) {
    %c0_i32 = arith.constant 0 : i32
    %c0_i32_0 = arith.constant 0 : i32
    %c0_i32_1 = arith.constant 0 : i32
    return %c0_i32, %c0_i32_0 : i32, i32
  }
  func.func @transform_4(%arg0: i32) -> (i32, i32) {
    %c0_i32 = arith.constant 0 : i32
    %c0_i32_0 = arith.constant 0 : i32
    %c0_i32_1 = arith.constant 0 : i32
    return %c0_i32, %c0_i32_0 : i32, i32
  }
  func.func @transform_5(%arg0: i32) -> (i32, i32) {
    %c0_i32 = arith.constant 0 : i32
    %c0_i32_0 = arith.constant 0 : i32
    return %arg0, %c0_i32 : i32, i32
  }
}

module attributes {stable_mosaic.version = 11 : i64} {
  func.func @_patch_embed_ln_kernel(%arg0: i32, %arg1: memref<128x128xbf16, #tpu.memory_space<vmem>>, %arg2: memref<128x64xbf16, #tpu.memory_space<vmem>>, %arg3: memref<1x64xf32, #tpu.memory_space<vmem>>, %arg4: memref<1x64xf32, #tpu.memory_space<vmem>>, %arg5: memref<1x64xf32, #tpu.memory_space<vmem>>, %arg6: memref<128x64xbf16, #tpu.memory_space<vmem>>) attributes {dimension_semantics = [#tpu.dimension_semantics<parallel>], iteration_bounds = array<i64: 1>, scalar_prefetch = 0 : i64, scratch_operands = 0 : i64, tpu.core_type = #tpu.core_type<tc>, window_params = [{transform_indices = @transform_0, window_bounds = array<i64: 128, 128>}, {pipeline_mode = #tpu.pipeline_mode<synchronous>, transform_indices = @transform_1, window_bounds = array<i64: 128, 64>}, {pipeline_mode = #tpu.pipeline_mode<synchronous>, transform_indices = @transform_2, window_bounds = array<i64: 1, 64>}, {pipeline_mode = #tpu.pipeline_mode<synchronous>, transform_indices = @transform_3, window_bounds = array<i64: 1, 64>}, {pipeline_mode = #tpu.pipeline_mode<synchronous>, transform_indices = @transform_4, window_bounds = array<i64: 1, 64>}, {transform_indices = @transform_5, window_bounds = array<i64: 128, 64>}]} {
    %c0 = arith.constant 0 : index
    %c0_0 = arith.constant 0 : index
    %0 = vector.load %arg1[%c0, %c0_0] : memref<128x128xbf16, #tpu.memory_space<vmem>>, vector<128x128xbf16>
    %c0_1 = arith.constant 0 : index
    %c0_2 = arith.constant 0 : index
    %1 = vector.load %arg2[%c0_1, %c0_2] : memref<128x64xbf16, #tpu.memory_space<vmem>>, vector<128x64xbf16>
    %cst = arith.constant dense<0.000000e+00> : vector<128x64xf32>
    %2 = tpu.matmul %0, %1, %cst {dimension_numbers = #tpu.dot_dimension_numbers<[1], [0], [0], [1], [0, 0, 1, 1], [], []>} : vector<128x128xbf16>, vector<128x64xbf16>, vector<128x64xf32> -> vector<128x64xf32>
    %c0_3 = arith.constant 0 : index
    %c0_4 = arith.constant 0 : index
    %3 = vector.load %arg3[%c0_3, %c0_4] : memref<1x64xf32, #tpu.memory_space<vmem>>, vector<1x64xf32>
    %4 = vector.broadcast %3 : vector<1x64xf32> to vector<128x64xf32>
    %5 = arith.addf %2, %4 : vector<128x64xf32>
    %cst_5 = arith.constant dense<0.000000e+00> : vector<128xf32>
    %6 = vector.multi_reduction <add>, %5, %cst_5 [1] : vector<128x64xf32> to vector<128xf32>
    %7 = vector.shape_cast %6 : vector<128xf32> to vector<128x1xf32>
    %cst_6 = arith.constant 6.400000e+01 : f32
    %8 = vector.broadcast %cst_6 : f32 to vector<128x1xf32>
    %9 = arith.divf %7, %8 : vector<128x1xf32>
    %10 = vector.broadcast %9 : vector<128x1xf32> to vector<128x64xf32>
    %11 = arith.subf %5, %10 : vector<128x64xf32>
    %12 = arith.mulf %11, %11 : vector<128x64xf32>
    %cst_7 = arith.constant dense<0.000000e+00> : vector<128xf32>
    %13 = vector.multi_reduction <add>, %12, %cst_7 [1] : vector<128x64xf32> to vector<128xf32>
    %14 = vector.shape_cast %13 : vector<128xf32> to vector<128x1xf32>
    %cst_8 = arith.constant 6.400000e+01 : f32
    %15 = vector.broadcast %cst_8 : f32 to vector<128x1xf32>
    %16 = arith.divf %14, %15 : vector<128x1xf32>
    %cst_9 = arith.constant 9.99999974E-6 : f32
    %17 = vector.broadcast %cst_9 : f32 to vector<128x1xf32>
    %18 = arith.addf %16, %17 : vector<128x1xf32>
    %19 = math.rsqrt %18 : vector<128x1xf32>
    %20 = vector.broadcast %19 : vector<128x1xf32> to vector<128x64xf32>
    %21 = arith.mulf %11, %20 : vector<128x64xf32>
    %c0_10 = arith.constant 0 : index
    %c0_11 = arith.constant 0 : index
    %22 = vector.load %arg4[%c0_10, %c0_11] : memref<1x64xf32, #tpu.memory_space<vmem>>, vector<1x64xf32>
    %23 = vector.broadcast %22 : vector<1x64xf32> to vector<128x64xf32>
    %24 = arith.mulf %21, %23 : vector<128x64xf32>
    %c0_12 = arith.constant 0 : index
    %c0_13 = arith.constant 0 : index
    %25 = vector.load %arg5[%c0_12, %c0_13] : memref<1x64xf32, #tpu.memory_space<vmem>>, vector<1x64xf32>
    %26 = vector.broadcast %25 : vector<1x64xf32> to vector<128x64xf32>
    %27 = arith.addf %24, %26 : vector<128x64xf32>
    %28 = arith.truncf %27 : vector<128x64xf32> to vector<128x64xbf16>
    %c0_14 = arith.constant 0 : index
    %c0_15 = arith.constant 0 : index
    %29 = vector.load %arg6[%c0_14, %c0_15] : memref<128x64xbf16, #tpu.memory_space<vmem>>, vector<128x64xbf16>
    tpu.vector_store %arg6[%c0_14, %c0_15], %28 {strides = array<i32>} : memref<128x64xbf16, #tpu.memory_space<vmem>>, vector<128x64xbf16>,
    return
  }
  func.func @transform_0(%arg0: i32) -> (i32, i32) {
    %c0_i32 = arith.constant 0 : i32
    %c0_i32_0 = arith.constant 0 : i32
    return %arg0, %c0_i32 : i32, i32
  }
  func.func @transform_1(%arg0: i32) -> (i32, i32) {
    %c0_i32 = arith.constant 0 : i32
    %c0_i32_0 = arith.constant 0 : i32
    %c0_i32_1 = arith.constant 0 : i32
    return %c0_i32, %c0_i32_0 : i32, i32
  }
  func.func @transform_2(%arg0: i32) -> (i32, i32) {
    %c0_i32 = arith.constant 0 : i32
    %c0_i32_0 = arith.constant 0 : i32
    %c0_i32_1 = arith.constant 0 : i32
    return %c0_i32, %c0_i32_0 : i32, i32
  }
  func.func @transform_3(%arg0: i32) -> (i32, i32) {
    %c0_i32 = arith.constant 0 : i32
    %c0_i32_0 = arith.constant 0 : i32
    %c0_i32_1 = arith.constant 0 : i32
    return %c0_i32, %c0_i32_0 : i32, i32
  }
  func.func @transform_4(%arg0: i32) -> (i32, i32) {
    %c0_i32 = arith.constant 0 : i32
    %c0_i32_0 = arith.constant 0 : i32
    %c0_i32_1 = arith.constant 0 : i32
    return %c0_i32, %c0_i32_0 : i32, i32
  }
  func.func @transform_5(%arg0: i32) -> (i32, i32) {
    %c0_i32 = arith.constant 0 : i32
    %c0_i32_0 = arith.constant 0 : i32
    return %arg0, %c0_i32 : i32, i32
  }
}

module attributes {stable_mosaic.version = 11 : i64} {
  func.func @_patch_embed_ln_kernel(%arg0: i32, %arg1: memref<32x256xbf16, #tpu.memory_space<vmem>>, %arg2: memref<256x160xbf16, #tpu.memory_space<vmem>>, %arg3: memref<1x160xf32, #tpu.memory_space<vmem>>, %arg4: memref<1x160xf32, #tpu.memory_space<vmem>>, %arg5: memref<1x160xf32, #tpu.memory_space<vmem>>, %arg6: memref<32x160xbf16, #tpu.memory_space<vmem>>) attributes {dimension_semantics = [#tpu.dimension_semantics<parallel>], iteration_bounds = array<i64: 1>, scalar_prefetch = 0 : i64, scratch_operands = 0 : i64, tpu.core_type = #tpu.core_type<tc>, window_params = [{transform_indices = @transform_0, window_bounds = array<i64: 32, 256>}, {pipeline_mode = #tpu.pipeline_mode<synchronous>, transform_indices = @transform_1, window_bounds = array<i64: 256, 160>}, {pipeline_mode = #tpu.pipeline_mode<synchronous>, transform_indices = @transform_2, window_bounds = array<i64: 1, 160>}, {pipeline_mode = #tpu.pipeline_mode<synchronous>, transform_indices = @transform_3, window_bounds = array<i64: 1, 160>}, {pipeline_mode = #tpu.pipeline_mode<synchronous>, transform_indices = @transform_4, window_bounds = array<i64: 1, 160>}, {transform_indices = @transform_5, window_bounds = array<i64: 32, 160>}]} {
    %c0 = arith.constant 0 : index
    %c0_0 = arith.constant 0 : index
    %0 = vector.load %arg1[%c0, %c0_0] : memref<32x256xbf16, #tpu.memory_space<vmem>>, vector<32x256xbf16>
    %c0_1 = arith.constant 0 : index
    %c0_2 = arith.constant 0 : index
    %1 = vector.load %arg2[%c0_1, %c0_2] : memref<256x160xbf16, #tpu.memory_space<vmem>>, vector<256x160xbf16>
    %cst = arith.constant dense<0.000000e+00> : vector<32x160xf32>
    %2 = tpu.matmul %0, %1, %cst {dimension_numbers = #tpu.dot_dimension_numbers<[1], [0], [0], [1], [0, 0, 1, 1], [], []>} : vector<32x256xbf16>, vector<256x160xbf16>, vector<32x160xf32> -> vector<32x160xf32>
    %c0_3 = arith.constant 0 : index
    %c0_4 = arith.constant 0 : index
    %3 = vector.load %arg3[%c0_3, %c0_4] : memref<1x160xf32, #tpu.memory_space<vmem>>, vector<1x160xf32>
    %4 = vector.broadcast %3 : vector<1x160xf32> to vector<32x160xf32>
    %5 = arith.addf %2, %4 : vector<32x160xf32>
    %cst_5 = arith.constant dense<0.000000e+00> : vector<32xf32>
    %6 = vector.multi_reduction <add>, %5, %cst_5 [1] : vector<32x160xf32> to vector<32xf32>
    %7 = vector.shape_cast %6 : vector<32xf32> to vector<32x1xf32>
    %cst_6 = arith.constant 1.600000e+02 : f32
    %8 = vector.broadcast %cst_6 : f32 to vector<32x1xf32>
    %9 = arith.divf %7, %8 : vector<32x1xf32>
    %10 = vector.broadcast %9 : vector<32x1xf32> to vector<32x160xf32>
    %11 = arith.subf %5, %10 : vector<32x160xf32>
    %12 = arith.mulf %11, %11 : vector<32x160xf32>
    %cst_7 = arith.constant dense<0.000000e+00> : vector<32xf32>
    %13 = vector.multi_reduction <add>, %12, %cst_7 [1] : vector<32x160xf32> to vector<32xf32>
    %14 = vector.shape_cast %13 : vector<32xf32> to vector<32x1xf32>
    %cst_8 = arith.constant 1.600000e+02 : f32
    %15 = vector.broadcast %cst_8 : f32 to vector<32x1xf32>
    %16 = arith.divf %14, %15 : vector<32x1xf32>
    %cst_9 = arith.constant 9.99999974E-6 : f32
    %17 = vector.broadcast %cst_9 : f32 to vector<32x1xf32>
    %18 = arith.addf %16, %17 : vector<32x1xf32>
    %19 = math.rsqrt %18 : vector<32x1xf32>
    %20 = vector.broadcast %19 : vector<32x1xf32> to vector<32x160xf32>
    %21 = arith.mulf %11, %20 : vector<32x160xf32>
    %c0_10 = arith.constant 0 : index
    %c0_11 = arith.constant 0 : index
    %22 = vector.load %arg4[%c0_10, %c0_11] : memref<1x160xf32, #tpu.memory_space<vmem>>, vector<1x160xf32>
    %23 = vector.broadcast %22 : vector<1x160xf32> to vector<32x160xf32>
    %24 = arith.mulf %21, %23 : vector<32x160xf32>
    %c0_12 = arith.constant 0 : index
    %c0_13 = arith.constant 0 : index
    %25 = vector.load %arg5[%c0_12, %c0_13] : memref<1x160xf32, #tpu.memory_space<vmem>>, vector<1x160xf32>
    %26 = vector.broadcast %25 : vector<1x160xf32> to vector<32x160xf32>
    %27 = arith.addf %24, %26 : vector<32x160xf32>
    %28 = arith.truncf %27 : vector<32x160xf32> to vector<32x160xbf16>
    %c0_14 = arith.constant 0 : index
    %c0_15 = arith.constant 0 : index
    %29 = vector.load %arg6[%c0_14, %c0_15] : memref<32x160xbf16, #tpu.memory_space<vmem>>, vector<32x160xbf16>
    tpu.vector_store %arg6[%c0_14, %c0_15], %28 {strides = array<i32>} : memref<32x160xbf16, #tpu.memory_space<vmem>>, vector<32x160xbf16>,
    return
  }
  func.func @transform_0(%arg0: i32) -> (i32, i32) {
    %c0_i32 = arith.constant 0 : i32
    %c0_i32_0 = arith.constant 0 : i32
    return %arg0, %c0_i32 : i32, i32
  }
  func.func @transform_1(%arg0: i32) -> (i32, i32) {
    %c0_i32 = arith.constant 0 : i32
    %c0_i32_0 = arith.constant 0 : i32
    %c0_i32_1 = arith.constant 0 : i32
    return %c0_i32, %c0_i32_0 : i32, i32
  }
  func.func @transform_2(%arg0: i32) -> (i32, i32) {
    %c0_i32 = arith.constant 0 : i32
    %c0_i32_0 = arith.constant 0 : i32
    %c0_i32_1 = arith.constant 0 : i32
    return %c0_i32, %c0_i32_0 : i32, i32
  }
  func.func @transform_3(%arg0: i32) -> (i32, i32) {
    %c0_i32 = arith.constant 0 : i32
    %c0_i32_0 = arith.constant 0 : i32
    %c0_i32_1 = arith.constant 0 : i32
    return %c0_i32, %c0_i32_0 : i32, i32
  }
  func.func @transform_4(%arg0: i32) -> (i32, i32) {
    %c0_i32 = arith.constant 0 : i32
    %c0_i32_0 = arith.constant 0 : i32
    %c0_i32_1 = arith.constant 0 : i32
    return %c0_i32, %c0_i32_0 : i32, i32
  }
  func.func @transform_5(%arg0: i32) -> (i32, i32) {
    %c0_i32 = arith.constant 0 : i32
    %c0_i32_0 = arith.constant 0 : i32
    return %arg0, %c0_i32 : i32, i32
  }
}

module attributes {stable_mosaic.version = 11 : i64} {
  func.func @_patch_embed_ln_kernel(%arg0: i32, %arg1: memref<8x640xbf16, #tpu.memory_space<vmem>>, %arg2: memref<640x256xbf16, #tpu.memory_space<vmem>>, %arg3: memref<1x256xf32, #tpu.memory_space<vmem>>, %arg4: memref<1x256xf32, #tpu.memory_space<vmem>>, %arg5: memref<1x256xf32, #tpu.memory_space<vmem>>, %arg6: memref<8x256xbf16, #tpu.memory_space<vmem>>) attributes {dimension_semantics = [#tpu.dimension_semantics<parallel>], iteration_bounds = array<i64: 1>, scalar_prefetch = 0 : i64, scratch_operands = 0 : i64, tpu.core_type = #tpu.core_type<tc>, window_params = [{transform_indices = @transform_0, window_bounds = array<i64: 8, 640>}, {pipeline_mode = #tpu.pipeline_mode<synchronous>, transform_indices = @transform_1, window_bounds = array<i64: 640, 256>}, {pipeline_mode = #tpu.pipeline_mode<synchronous>, transform_indices = @transform_2, window_bounds = array<i64: 1, 256>}, {pipeline_mode = #tpu.pipeline_mode<synchronous>, transform_indices = @transform_3, window_bounds = array<i64: 1, 256>}, {pipeline_mode = #tpu.pipeline_mode<synchronous>, transform_indices = @transform_4, window_bounds = array<i64: 1, 256>}, {transform_indices = @transform_5, window_bounds = array<i64: 8, 256>}]} {
    %c0 = arith.constant 0 : index
    %c0_0 = arith.constant 0 : index
    %0 = vector.load %arg1[%c0, %c0_0] : memref<8x640xbf16, #tpu.memory_space<vmem>>, vector<8x640xbf16>
    %c0_1 = arith.constant 0 : index
    %c0_2 = arith.constant 0 : index
    %1 = vector.load %arg2[%c0_1, %c0_2] : memref<640x256xbf16, #tpu.memory_space<vmem>>, vector<640x256xbf16>
    %cst = arith.constant dense<0.000000e+00> : vector<8x256xf32>
    %2 = tpu.matmul %0, %1, %cst {dimension_numbers = #tpu.dot_dimension_numbers<[1], [0], [0], [1], [0, 0, 1, 1], [], []>} : vector<8x640xbf16>, vector<640x256xbf16>, vector<8x256xf32> -> vector<8x256xf32>
    %c0_3 = arith.constant 0 : index
    %c0_4 = arith.constant 0 : index
    %3 = vector.load %arg3[%c0_3, %c0_4] : memref<1x256xf32, #tpu.memory_space<vmem>>, vector<1x256xf32>
    %4 = vector.broadcast %3 : vector<1x256xf32> to vector<8x256xf32>
    %5 = arith.addf %2, %4 : vector<8x256xf32>
    %cst_5 = arith.constant dense<0.000000e+00> : vector<8xf32>
    %6 = vector.multi_reduction <add>, %5, %cst_5 [1] : vector<8x256xf32> to vector<8xf32>
    %7 = vector.shape_cast %6 : vector<8xf32> to vector<8x1xf32>
    %cst_6 = arith.constant 2.560000e+02 : f32
    %8 = vector.broadcast %cst_6 : f32 to vector<8x1xf32>
    %9 = arith.divf %7, %8 : vector<8x1xf32>
    %10 = vector.broadcast %9 : vector<8x1xf32> to vector<8x256xf32>
    %11 = arith.subf %5, %10 : vector<8x256xf32>
    %12 = arith.mulf %11, %11 : vector<8x256xf32>
    %cst_7 = arith.constant dense<0.000000e+00> : vector<8xf32>
    %13 = vector.multi_reduction <add>, %12, %cst_7 [1] : vector<8x256xf32> to vector<8xf32>
    %14 = vector.shape_cast %13 : vector<8xf32> to vector<8x1xf32>
    %cst_8 = arith.constant 2.560000e+02 : f32
    %15 = vector.broadcast %cst_8 : f32 to vector<8x1xf32>
    %16 = arith.divf %14, %15 : vector<8x1xf32>
    %cst_9 = arith.constant 9.99999974E-6 : f32
    %17 = vector.broadcast %cst_9 : f32 to vector<8x1xf32>
    %18 = arith.addf %16, %17 : vector<8x1xf32>
    %19 = math.rsqrt %18 : vector<8x1xf32>
    %20 = vector.broadcast %19 : vector<8x1xf32> to vector<8x256xf32>
    %21 = arith.mulf %11, %20 : vector<8x256xf32>
    %c0_10 = arith.constant 0 : index
    %c0_11 = arith.constant 0 : index
    %22 = vector.load %arg4[%c0_10, %c0_11] : memref<1x256xf32, #tpu.memory_space<vmem>>, vector<1x256xf32>
    %23 = vector.broadcast %22 : vector<1x256xf32> to vector<8x256xf32>
    %24 = arith.mulf %21, %23 : vector<8x256xf32>
    %c0_12 = arith.constant 0 : index
    %c0_13 = arith.constant 0 : index
    %25 = vector.load %arg5[%c0_12, %c0_13] : memref<1x256xf32, #tpu.memory_space<vmem>>, vector<1x256xf32>
    %26 = vector.broadcast %25 : vector<1x256xf32> to vector<8x256xf32>
    %27 = arith.addf %24, %26 : vector<8x256xf32>
    %28 = arith.truncf %27 : vector<8x256xf32> to vector<8x256xbf16>
    %c0_14 = arith.constant 0 : index
    %c0_15 = arith.constant 0 : index
    %29 = vector.load %arg6[%c0_14, %c0_15] : memref<8x256xbf16, #tpu.memory_space<vmem>>, vector<8x256xbf16>
    tpu.vector_store %arg6[%c0_14, %c0_15], %28 {strides = array<i32>} : memref<8x256xbf16, #tpu.memory_space<vmem>>, vector<8x256xbf16>,
    return
  }
  func.func @transform_0(%arg0: i32) -> (i32, i32) {
    %c0_i32 = arith.constant 0 : i32
    %c0_i32_0 = arith.constant 0 : i32
    return %arg0, %c0_i32 : i32, i32
  }
  func.func @transform_1(%arg0: i32) -> (i32, i32) {
    %c0_i32 = arith.constant 0 : i32
    %c0_i32_0 = arith.constant 0 : i32
    %c0_i32_1 = arith.constant 0 : i32
    return %c0_i32, %c0_i32_0 : i32, i32
  }
  func.func @transform_2(%arg0: i32) -> (i32, i32) {
    %c0_i32 = arith.constant 0 : i32
    %c0_i32_0 = arith.constant 0 : i32
    %c0_i32_1 = arith.constant 0 : i32
    return %c0_i32, %c0_i32_0 : i32, i32
  }
  func.func @transform_3(%arg0: i32) -> (i32, i32) {
    %c0_i32 = arith.constant 0 : i32
    %c0_i32_0 = arith.constant 0 : i32
    %c0_i32_1 = arith.constant 0 : i32
    return %c0_i32, %c0_i32_0 : i32, i32
  }
  func.func @transform_4(%arg0: i32) -> (i32, i32) {
    %c0_i32 = arith.constant 0 : i32
    %c0_i32_0 = arith.constant 0 : i32
    %c0_i32_1 = arith.constant 0 : i32
    return %c0_i32, %c0_i32_0 : i32, i32
  }
  func.func @transform_5(%arg0: i32) -> (i32, i32) {
    %c0_i32 = arith.constant 0 : i32
    %c0_i32_0 = arith.constant 0 : i32
    return %arg0, %c0_i32 : i32, i32
  }
}

module attributes {stable_mosaic.version = 11 : i64} {
  func.func @_decoder_kernel(%arg0: i32, %arg1: i32, %arg2: memref<3x16xi32, #tpu.memory_space<smem>>, %arg3: memref<3x16xi32, #tpu.memory_space<smem>>, %arg4: memref<3x16xi32, #tpu.memory_space<smem>>, %arg5: memref<1x1x16x32xbf16, #tpu.memory_space<vmem>>, %arg6: memref<1x1x8x64xbf16, #tpu.memory_space<vmem>>, %arg7: memref<1x1x8x64xbf16, #tpu.memory_space<vmem>>, %arg8: memref<1x1x4x160xbf16, #tpu.memory_space<vmem>>, %arg9: memref<1x1x4x160xbf16, #tpu.memory_space<vmem>>, %arg10: memref<1x1x2x256xbf16, #tpu.memory_space<vmem>>, %arg11: memref<1x1x2x256xbf16, #tpu.memory_space<vmem>>, %arg12: memref<32x64xbf16, #tpu.memory_space<vmem>>, %arg13: memref<1x64xf32, #tpu.memory_space<vmem>>, %arg14: memref<64x64xbf16, #tpu.memory_space<vmem>>, %arg15: memref<1x64xf32, #tpu.memory_space<vmem>>, %arg16: memref<160x64xbf16, #tpu.memory_space<vmem>>, %arg17: memref<1x64xf32, #tpu.memory_space<vmem>>, %arg18: memref<256x64xbf16, #tpu.memory_space<vmem>>, %arg19: memref<1x64xf32, #tpu.memory_space<vmem>>, %arg20: memref<16x8xbf16, #tpu.memory_space<vmem>>, %arg21: memref<16x4xbf16, #tpu.memory_space<vmem>>, %arg22: memref<16x2xbf16, #tpu.memory_space<vmem>>, %arg23: memref<256x64xbf16, #tpu.memory_space<vmem>>, %arg24: memref<1x64xf32, #tpu.memory_space<vmem>>, %arg25: memref<1x64xf32, #tpu.memory_space<vmem>>, %arg26: memref<64x8xbf16, #tpu.memory_space<vmem>>, %arg27: memref<1x8xf32, #tpu.memory_space<vmem>>, %arg28: memref<1x1x16x8xbf16, #tpu.memory_space<vmem>>, %arg29: memref<16x256xf32, #tpu.memory_space<vmem>>) attributes {dimension_semantics = [#tpu.dimension_semantics<parallel>, #tpu.dimension_semantics<parallel>], iteration_bounds = array<i64: 2, 16>, scalar_prefetch = 3 : i64, scratch_operands = 1 : i64, tpu.core_type = #tpu.core_type<tc>, window_params = [{transform_indices = @transform_0, window_bounds = array<i64: 1, 1, 16, 32>}, {transform_indices = @transform_1, window_bounds = array<i64: 1, 1, 8, 64>}, {transform_indices = @transform_2, window_bounds = array<i64: 1, 1, 8, 64>}, {transform_indices = @transform_3, window_bounds = array<i64: 1, 1, 4, 160>}, {transform_indices = @transform_4, window_bounds = array<i64: 1, 1, 4, 160>}, {transform_indices = @transform_5, window_bounds = array<i64: 1, 1, 2, 256>}, {transform_indices = @transform_6, window_bounds = array<i64: 1, 1, 2, 256>}, {pipeline_mode = #tpu.pipeline_mode<synchronous>, transform_indices = @transform_7, window_bounds = array<i64: 32, 64>}, {pipeline_mode = #tpu.pipeline_mode<synchronous>, transform_indices = @transform_8, window_bounds = array<i64: 1, 64>}, {pipeline_mode = #tpu.pipeline_mode<synchronous>, transform_indices = @transform_9, window_bounds = array<i64: 64, 64>}, {pipeline_mode = #tpu.pipeline_mode<synchronous>, transform_indices = @transform_10, window_bounds = array<i64: 1, 64>}, {pipeline_mode = #tpu.pipeline_mode<synchronous>, transform_indices = @transform_11, window_bounds = array<i64: 160, 64>}, {pipeline_mode = #tpu.pipeline_mode<synchronous>, transform_indices = @transform_12, window_bounds = array<i64: 1, 64>}, {pipeline_mode = #tpu.pipeline_mode<synchronous>, transform_indices = @transform_13, window_bounds = array<i64: 256, 64>}, {pipeline_mode = #tpu.pipeline_mode<synchronous>, transform_indices = @transform_14, window_bounds = array<i64: 1, 64>}, {pipeline_mode = #tpu.pipeline_mode<synchronous>, transform_indices = @transform_15, window_bounds = array<i64: 16, 8>}, {pipeline_mode = #tpu.pipeline_mode<synchronous>, transform_indices = @transform_16, window_bounds = array<i64: 16, 4>}, {pipeline_mode = #tpu.pipeline_mode<synchronous>, transform_indices = @transform_17, window_bounds = array<i64: 16, 2>}, {pipeline_mode = #tpu.pipeline_mode<synchronous>, transform_indices = @transform_18, window_bounds = array<i64: 256, 64>}, {pipeline_mode = #tpu.pipeline_mode<synchronous>, transform_indices = @transform_19, window_bounds = array<i64: 1, 64>}, {pipeline_mode = #tpu.pipeline_mode<synchronous>, transform_indices = @transform_20, window_bounds = array<i64: 1, 64>}, {pipeline_mode = #tpu.pipeline_mode<synchronous>, transform_indices = @transform_21, window_bounds = array<i64: 64, 8>}, {pipeline_mode = #tpu.pipeline_mode<synchronous>, transform_indices = @transform_22, window_bounds = array<i64: 1, 8>}, {transform_indices = @transform_23, window_bounds = array<i64: 1, 1, 16, 8>}]} {
    %c0 = arith.constant 0 : index
    %c0_0 = arith.constant 0 : index
    %c0_1 = arith.constant 0 : index
    %c0_2 = arith.constant 0 : index
    %0 = vector.load %arg5[%c0, %c0_0, %c0_1, %c0_2] : memref<1x1x16x32xbf16, #tpu.memory_space<vmem>>, vector<1x1x16x32xbf16>
    %1 = vector.shape_cast %0 : vector<1x1x16x32xbf16> to vector<16x32xbf16>
    %c0_3 = arith.constant 0 : index
    %c0_4 = arith.constant 0 : index
    %2 = vector.load %arg12[%c0_3, %c0_4] : memref<32x64xbf16, #tpu.memory_space<vmem>>, vector<32x64xbf16>
    %cst = arith.constant dense<0.000000e+00> : vector<16x64xf32>
    %3 = tpu.matmul %1, %2, %cst {dimension_numbers = #tpu.dot_dimension_numbers<[1], [0], [0], [1], [0, 0, 1, 1], [], []>} : vector<16x32xbf16>, vector<32x64xbf16>, vector<16x64xf32> -> vector<16x64xf32>
    %c0_5 = arith.constant 0 : index
    %c0_6 = arith.constant 0 : index
    %4 = vector.load %arg13[%c0_5, %c0_6] : memref<1x64xf32, #tpu.memory_space<vmem>>, vector<1x64xf32>
    %5 = vector.broadcast %4 : vector<1x64xf32> to vector<16x64xf32>
    %6 = arith.addf %3, %5 : vector<16x64xf32>
    %c0_7 = arith.constant 0 : index
    %7 = arith.index_cast %arg1 : i32 to index
    %8 = memref.load %arg4[%c0_7, %7] : memref<3x16xi32, #tpu.memory_space<smem>>
    %9 = arith.sitofp %8 : i32 to f32
    %cst_8 = arith.constant 1.52587891E-5 : f32
    %10 = arith.mulf %9, %cst_8 : f32
    %c0_9 = arith.constant 0 : index
    %c0_10 = arith.constant 0 : index
    %c0_11 = arith.constant 0 : index
    %c0_12 = arith.constant 0 : index
    %11 = vector.load %arg6[%c0_9, %c0_10, %c0_11, %c0_12] : memref<1x1x8x64xbf16, #tpu.memory_space<vmem>>, vector<1x1x8x64xbf16>
    %12 = vector.shape_cast %11 : vector<1x1x8x64xbf16> to vector<8x64xbf16>
    %13 = arith.extf %12 : vector<8x64xbf16> to vector<8x64xf32>
    %c0_13 = arith.constant 0 : index
    %c0_14 = arith.constant 0 : index
    %c0_15 = arith.constant 0 : index
    %c0_16 = arith.constant 0 : index
    %14 = vector.load %arg7[%c0_13, %c0_14, %c0_15, %c0_16] : memref<1x1x8x64xbf16, #tpu.memory_space<vmem>>, vector<1x1x8x64xbf16>
    %15 = vector.shape_cast %14 : vector<1x1x8x64xbf16> to vector<8x64xbf16>
    %16 = arith.extf %15 : vector<8x64xbf16> to vector<8x64xf32>
    %17 = arith.subf %16, %13 : vector<8x64xf32>
    %18 = vector.broadcast %10 : f32 to vector<8x64xf32>
    %19 = arith.mulf %18, %17 : vector<8x64xf32>
    %20 = arith.addf %13, %19 : vector<8x64xf32>
    %21 = arith.truncf %20 : vector<8x64xf32> to vector<8x64xbf16>
    %c0_17 = arith.constant 0 : index
    %c0_18 = arith.constant 0 : index
    %22 = vector.load %arg14[%c0_17, %c0_18] : memref<64x64xbf16, #tpu.memory_space<vmem>>, vector<64x64xbf16>
    %cst_19 = arith.constant dense<0.000000e+00> : vector<8x64xf32>
    %23 = tpu.matmul %21, %22, %cst_19 {dimension_numbers = #tpu.dot_dimension_numbers<[1], [0], [0], [1], [0, 0, 1, 1], [], []>} : vector<8x64xbf16>, vector<64x64xbf16>, vector<8x64xf32> -> vector<8x64xf32>
    %c0_20 = arith.constant 0 : index
    %c0_21 = arith.constant 0 : index
    %24 = vector.load %arg15[%c0_20, %c0_21] : memref<1x64xf32, #tpu.memory_space<vmem>>, vector<1x64xf32>
    %25 = vector.broadcast %24 : vector<1x64xf32> to vector<8x64xf32>
    %26 = arith.addf %23, %25 : vector<8x64xf32>
    %c0_22 = arith.constant 0 : index
    %c0_23 = arith.constant 0 : index
    %27 = vector.load %arg20[%c0_22, %c0_23] : memref<16x8xbf16, #tpu.memory_space<vmem>>, vector<16x8xbf16>
    %28 = arith.truncf %26 : vector<8x64xf32> to vector<8x64xbf16>
    %cst_24 = arith.constant dense<0.000000e+00> : vector<16x64xf32>
    %29 = tpu.matmul %27, %28, %cst_24 {dimension_numbers = #tpu.dot_dimension_numbers<[1], [0], [0], [1], [0, 0, 1, 1], [], []>} : vector<16x8xbf16>, vector<8x64xbf16>, vector<16x64xf32> -> vector<16x64xf32>
    %c1 = arith.constant 1 : index
    %30 = arith.index_cast %arg1 : i32 to index
    %31 = memref.load %arg4[%c1, %30] : memref<3x16xi32, #tpu.memory_space<smem>>
    %32 = arith.sitofp %31 : i32 to f32
    %cst_25 = arith.constant 1.52587891E-5 : f32
    %33 = arith.mulf %32, %cst_25 : f32
    %c0_26 = arith.constant 0 : index
    %c0_27 = arith.constant 0 : index
    %c0_28 = arith.constant 0 : index
    %c0_29 = arith.constant 0 : index
    %34 = vector.load %arg8[%c0_26, %c0_27, %c0_28, %c0_29] : memref<1x1x4x160xbf16, #tpu.memory_space<vmem>>, vector<1x1x4x160xbf16>
    %35 = vector.shape_cast %34 : vector<1x1x4x160xbf16> to vector<4x160xbf16>
    %36 = arith.extf %35 : vector<4x160xbf16> to vector<4x160xf32>
    %c0_30 = arith.constant 0 : index
    %c0_31 = arith.constant 0 : index
    %c0_32 = arith.constant 0 : index
    %c0_33 = arith.constant 0 : index
    %37 = vector.load %arg9[%c0_30, %c0_31, %c0_32, %c0_33] : memref<1x1x4x160xbf16, #tpu.memory_space<vmem>>, vector<1x1x4x160xbf16>
    %38 = vector.shape_cast %37 : vector<1x1x4x160xbf16> to vector<4x160xbf16>
    %39 = arith.extf %38 : vector<4x160xbf16> to vector<4x160xf32>
    %40 = arith.subf %39, %36 : vector<4x160xf32>
    %41 = vector.broadcast %33 : f32 to vector<4x160xf32>
    %42 = arith.mulf %41, %40 : vector<4x160xf32>
    %43 = arith.addf %36, %42 : vector<4x160xf32>
    %44 = arith.truncf %43 : vector<4x160xf32> to vector<4x160xbf16>
    %c0_34 = arith.constant 0 : index
    %c0_35 = arith.constant 0 : index
    %45 = vector.load %arg16[%c0_34, %c0_35] : memref<160x64xbf16, #tpu.memory_space<vmem>>, vector<160x64xbf16>
    %cst_36 = arith.constant dense<0.000000e+00> : vector<4x64xf32>
    %46 = tpu.matmul %44, %45, %cst_36 {dimension_numbers = #tpu.dot_dimension_numbers<[1], [0], [0], [1], [0, 0, 1, 1], [], []>} : vector<4x160xbf16>, vector<160x64xbf16>, vector<4x64xf32> -> vector<4x64xf32>
    %c0_37 = arith.constant 0 : index
    %c0_38 = arith.constant 0 : index
    %47 = vector.load %arg17[%c0_37, %c0_38] : memref<1x64xf32, #tpu.memory_space<vmem>>, vector<1x64xf32>
    %48 = vector.broadcast %47 : vector<1x64xf32> to vector<4x64xf32>
    %49 = arith.addf %46, %48 : vector<4x64xf32>
    %c0_39 = arith.constant 0 : index
    %c0_40 = arith.constant 0 : index
    %50 = vector.load %arg21[%c0_39, %c0_40] : memref<16x4xbf16, #tpu.memory_space<vmem>>, vector<16x4xbf16>
    %51 = arith.truncf %49 : vector<4x64xf32> to vector<4x64xbf16>
    %cst_41 = arith.constant dense<0.000000e+00> : vector<16x64xf32>
    %52 = tpu.matmul %50, %51, %cst_41 {dimension_numbers = #tpu.dot_dimension_numbers<[1], [0], [0], [1], [0, 0, 1, 1], [], []>} : vector<16x4xbf16>, vector<4x64xbf16>, vector<16x64xf32> -> vector<16x64xf32>
    %c2 = arith.constant 2 : index
    %53 = arith.index_cast %arg1 : i32 to index
    %54 = memref.load %arg4[%c2, %53] : memref<3x16xi32, #tpu.memory_space<smem>>
    %55 = arith.sitofp %54 : i32 to f32
    %cst_42 = arith.constant 1.52587891E-5 : f32
    %56 = arith.mulf %55, %cst_42 : f32
    %c0_43 = arith.constant 0 : index
    %c0_44 = arith.constant 0 : index
    %c0_45 = arith.constant 0 : index
    %c0_46 = arith.constant 0 : index
    %57 = vector.load %arg10[%c0_43, %c0_44, %c0_45, %c0_46] : memref<1x1x2x256xbf16, #tpu.memory_space<vmem>>, vector<1x1x2x256xbf16>
    %58 = vector.shape_cast %57 : vector<1x1x2x256xbf16> to vector<2x256xbf16>
    %59 = arith.extf %58 : vector<2x256xbf16> to vector<2x256xf32>
    %c0_47 = arith.constant 0 : index
    %c0_48 = arith.constant 0 : index
    %c0_49 = arith.constant 0 : index
    %c0_50 = arith.constant 0 : index
    %60 = vector.load %arg11[%c0_47, %c0_48, %c0_49, %c0_50] : memref<1x1x2x256xbf16, #tpu.memory_space<vmem>>, vector<1x1x2x256xbf16>
    %61 = vector.shape_cast %60 : vector<1x1x2x256xbf16> to vector<2x256xbf16>
    %62 = arith.extf %61 : vector<2x256xbf16> to vector<2x256xf32>
    %63 = arith.subf %62, %59 : vector<2x256xf32>
    %64 = vector.broadcast %56 : f32 to vector<2x256xf32>
    %65 = arith.mulf %64, %63 : vector<2x256xf32>
    %66 = arith.addf %59, %65 : vector<2x256xf32>
    %67 = arith.truncf %66 : vector<2x256xf32> to vector<2x256xbf16>
    %c0_51 = arith.constant 0 : index
    %c0_52 = arith.constant 0 : index
    %68 = vector.load %arg18[%c0_51, %c0_52] : memref<256x64xbf16, #tpu.memory_space<vmem>>, vector<256x64xbf16>
    %cst_53 = arith.constant dense<0.000000e+00> : vector<2x64xf32>
    %69 = tpu.matmul %67, %68, %cst_53 {dimension_numbers = #tpu.dot_dimension_numbers<[1], [0], [0], [1], [0, 0, 1, 1], [], []>} : vector<2x256xbf16>, vector<256x64xbf16>, vector<2x64xf32> -> vector<2x64xf32>
    %c0_54 = arith.constant 0 : index
    %c0_55 = arith.constant 0 : index
    %70 = vector.load %arg19[%c0_54, %c0_55] : memref<1x64xf32, #tpu.memory_space<vmem>>, vector<1x64xf32>
    %71 = vector.broadcast %70 : vector<1x64xf32> to vector<2x64xf32>
    %72 = arith.addf %69, %71 : vector<2x64xf32>
    %c0_56 = arith.constant 0 : index
    %c0_57 = arith.constant 0 : index
    %73 = vector.load %arg22[%c0_56, %c0_57] : memref<16x2xbf16, #tpu.memory_space<vmem>>, vector<16x2xbf16>
    %74 = arith.truncf %72 : vector<2x64xf32> to vector<2x64xbf16>
    %cst_58 = arith.constant dense<0.000000e+00> : vector<16x64xf32>
    %75 = tpu.matmul %73, %74, %cst_58 {dimension_numbers = #tpu.dot_dimension_numbers<[1], [0], [0], [1], [0, 0, 1, 1], [], []>} : vector<16x2xbf16>, vector<2x64xbf16>, vector<16x64xf32> -> vector<16x64xf32>
    %c0_59 = arith.constant 0 : index
    %c0_60 = arith.constant 0 : index
    %76 = vector.load %arg29[%c0_59, %c0_60] : memref<16x256xf32, #tpu.memory_space<vmem>>, vector<16x64xf32>
    tpu.vector_store %arg29[%c0_59, %c0_60], %75 {strides = array<i32>} : memref<16x256xf32, #tpu.memory_space<vmem>>, vector<16x64xf32>,
    %c0_61 = arith.constant 0 : index
    %c64 = arith.constant 64 : index
    %77 = vector.load %arg29[%c0_61, %c64] : memref<16x256xf32, #tpu.memory_space<vmem>>, vector<16x64xf32>
    tpu.vector_store %arg29[%c0_61, %c64], %52 {strides = array<i32>} : memref<16x256xf32, #tpu.memory_space<vmem>>, vector<16x64xf32>,
    %c0_62 = arith.constant 0 : index
    %c128 = arith.constant 128 : index
    %78 = vector.load %arg29[%c0_62, %c128] : memref<16x256xf32, #tpu.memory_space<vmem>>, vector<16x64xf32>
    tpu.vector_store %arg29[%c0_62, %c128], %29 {strides = array<i32>} : memref<16x256xf32, #tpu.memory_space<vmem>>, vector<16x64xf32>,
    %c0_63 = arith.constant 0 : index
    %c192 = arith.constant 192 : index
    %79 = vector.load %arg29[%c0_63, %c192] : memref<16x256xf32, #tpu.memory_space<vmem>>, vector<16x64xf32>
    tpu.vector_store %arg29[%c0_63, %c192], %6 {strides = array<i32>} : memref<16x256xf32, #tpu.memory_space<vmem>>, vector<16x64xf32>,
    %c0_64 = arith.constant 0 : index
    %c0_65 = arith.constant 0 : index
    %80 = vector.load %arg29[%c0_64, %c0_65] : memref<16x256xf32, #tpu.memory_space<vmem>>, vector<16x256xf32>
    %81 = arith.truncf %80 : vector<16x256xf32> to vector<16x256xbf16>
    %c0_66 = arith.constant 0 : index
    %c0_67 = arith.constant 0 : index
    %82 = vector.load %arg23[%c0_66, %c0_67] : memref<256x64xbf16, #tpu.memory_space<vmem>>, vector<256x64xbf16>
    %cst_68 = arith.constant dense<0.000000e+00> : vector<16x64xf32>
    %83 = tpu.matmul %81, %82, %cst_68 {dimension_numbers = #tpu.dot_dimension_numbers<[1], [0], [0], [1], [0, 0, 1, 1], [], []>} : vector<16x256xbf16>, vector<256x64xbf16>, vector<16x64xf32> -> vector<16x64xf32>
    %c0_69 = arith.constant 0 : index
    %c0_70 = arith.constant 0 : index
    %84 = vector.load %arg24[%c0_69, %c0_70] : memref<1x64xf32, #tpu.memory_space<vmem>>, vector<1x64xf32>
    %85 = vector.broadcast %84 : vector<1x64xf32> to vector<16x64xf32>
    %86 = arith.mulf %83, %85 : vector<16x64xf32>
    %c0_71 = arith.constant 0 : index
    %c0_72 = arith.constant 0 : index
    %87 = vector.load %arg25[%c0_71, %c0_72] : memref<1x64xf32, #tpu.memory_space<vmem>>, vector<1x64xf32>
    %88 = vector.broadcast %87 : vector<1x64xf32> to vector<16x64xf32>
    %89 = arith.addf %86, %88 : vector<16x64xf32>
    %cst_73 = arith.constant 0.000000e+00 : f32
    %90 = vector.broadcast %cst_73 : f32 to vector<16x64xf32>
    %91 = arith.maximumf %89, %90 : vector<16x64xf32>
    %92 = arith.truncf %91 : vector<16x64xf32> to vector<16x64xbf16>
    %c0_74 = arith.constant 0 : index
    %c0_75 = arith.constant 0 : index
    %93 = vector.load %arg26[%c0_74, %c0_75] : memref<64x8xbf16, #tpu.memory_space<vmem>>, vector<64x8xbf16>
    %cst_76 = arith.constant dense<0.000000e+00> : vector<16x8xf32>
    %94 = tpu.matmul %92, %93, %cst_76 {dimension_numbers = #tpu.dot_dimension_numbers<[1], [0], [0], [1], [0, 0, 1, 1], [], []>} : vector<16x64xbf16>, vector<64x8xbf16>, vector<16x8xf32> -> vector<16x8xf32>
    %c0_77 = arith.constant 0 : index
    %c0_78 = arith.constant 0 : index
    %95 = vector.load %arg27[%c0_77, %c0_78] : memref<1x8xf32, #tpu.memory_space<vmem>>, vector<1x8xf32>
    %96 = vector.broadcast %95 : vector<1x8xf32> to vector<16x8xf32>
    %97 = arith.addf %94, %96 : vector<16x8xf32>
    %98 = arith.truncf %97 : vector<16x8xf32> to vector<16x8xbf16>
    %c0_79 = arith.constant 0 : index
    %c0_80 = arith.constant 0 : index
    %c0_81 = arith.constant 0 : index
    %c0_82 = arith.constant 0 : index
    %99 = vector.load %arg28[%c0_79, %c0_80, %c0_81, %c0_82] : memref<1x1x16x8xbf16, #tpu.memory_space<vmem>>, vector<1x1x16x8xbf16>
    %100 = vector.shape_cast %99 : vector<1x1x16x8xbf16> to vector<16x8xbf16>
    %101 = vector.shape_cast %98 : vector<16x8xbf16> to vector<1x1x16x8xbf16>
    tpu.vector_store %arg28[%c0_79, %c0_80, %c0_81, %c0_82], %101 {strides = array<i32>} : memref<1x1x16x8xbf16, #tpu.memory_space<vmem>>, vector<1x1x16x8xbf16>,
    return
  }
  func.func @transform_0(%arg0: i32, %arg1: i32, %arg2: memref<3x16xi32, #tpu.memory_space<smem>>, %arg3: memref<3x16xi32, #tpu.memory_space<smem>>, %arg4: memref<3x16xi32, #tpu.memory_space<smem>>) -> (i32, i32, i32, i32) {
    %c0_i32 = arith.constant 0 : i32
    %c0_i32_0 = arith.constant 0 : i32
    %c0_i32_1 = arith.constant 0 : i32
    return %arg0, %arg1, %c0_i32, %c0_i32_0 : i32, i32, i32, i32
  }
  func.func @transform_1(%arg0: i32, %arg1: i32, %arg2: memref<3x16xi32, #tpu.memory_space<smem>>, %arg3: memref<3x16xi32, #tpu.memory_space<smem>>, %arg4: memref<3x16xi32, #tpu.memory_space<smem>>) -> (i32, i32, i32, i32) {
    %c0 = arith.constant 0 : index
    %0 = arith.index_cast %arg1 : i32 to index
    %1 = memref.load %arg2[%c0, %0] : memref<3x16xi32, #tpu.memory_space<smem>>
    %c0_i32 = arith.constant 0 : i32
    %c0_i32_0 = arith.constant 0 : i32
    %c0_i32_1 = arith.constant 0 : i32
    return %arg0, %1, %c0_i32, %c0_i32_0 : i32, i32, i32, i32
  }
  func.func @transform_2(%arg0: i32, %arg1: i32, %arg2: memref<3x16xi32, #tpu.memory_space<smem>>, %arg3: memref<3x16xi32, #tpu.memory_space<smem>>, %arg4: memref<3x16xi32, #tpu.memory_space<smem>>) -> (i32, i32, i32, i32) {
    %c0 = arith.constant 0 : index
    %0 = arith.index_cast %arg1 : i32 to index
    %1 = memref.load %arg3[%c0, %0] : memref<3x16xi32, #tpu.memory_space<smem>>
    %c0_i32 = arith.constant 0 : i32
    %c0_i32_0 = arith.constant 0 : i32
    %c0_i32_1 = arith.constant 0 : i32
    return %arg0, %1, %c0_i32, %c0_i32_0 : i32, i32, i32, i32
  }
  func.func @transform_3(%arg0: i32, %arg1: i32, %arg2: memref<3x16xi32, #tpu.memory_space<smem>>, %arg3: memref<3x16xi32, #tpu.memory_space<smem>>, %arg4: memref<3x16xi32, #tpu.memory_space<smem>>) -> (i32, i32, i32, i32) {
    %c1 = arith.constant 1 : index
    %0 = arith.index_cast %arg1 : i32 to index
    %1 = memref.load %arg2[%c1, %0] : memref<3x16xi32, #tpu.memory_space<smem>>
    %c0_i32 = arith.constant 0 : i32
    %c0_i32_0 = arith.constant 0 : i32
    %c0_i32_1 = arith.constant 0 : i32
    return %arg0, %1, %c0_i32, %c0_i32_0 : i32, i32, i32, i32
  }
  func.func @transform_4(%arg0: i32, %arg1: i32, %arg2: memref<3x16xi32, #tpu.memory_space<smem>>, %arg3: memref<3x16xi32, #tpu.memory_space<smem>>, %arg4: memref<3x16xi32, #tpu.memory_space<smem>>) -> (i32, i32, i32, i32) {
    %c1 = arith.constant 1 : index
    %0 = arith.index_cast %arg1 : i32 to index
    %1 = memref.load %arg3[%c1, %0] : memref<3x16xi32, #tpu.memory_space<smem>>
    %c0_i32 = arith.constant 0 : i32
    %c0_i32_0 = arith.constant 0 : i32
    %c0_i32_1 = arith.constant 0 : i32
    return %arg0, %1, %c0_i32, %c0_i32_0 : i32, i32, i32, i32
  }
  func.func @transform_5(%arg0: i32, %arg1: i32, %arg2: memref<3x16xi32, #tpu.memory_space<smem>>, %arg3: memref<3x16xi32, #tpu.memory_space<smem>>, %arg4: memref<3x16xi32, #tpu.memory_space<smem>>) -> (i32, i32, i32, i32) {
    %c2 = arith.constant 2 : index
    %0 = arith.index_cast %arg1 : i32 to index
    %1 = memref.load %arg2[%c2, %0] : memref<3x16xi32, #tpu.memory_space<smem>>
    %c0_i32 = arith.constant 0 : i32
    %c0_i32_0 = arith.constant 0 : i32
    %c0_i32_1 = arith.constant 0 : i32
    return %arg0, %1, %c0_i32, %c0_i32_0 : i32, i32, i32, i32
  }
  func.func @transform_6(%arg0: i32, %arg1: i32, %arg2: memref<3x16xi32, #tpu.memory_space<smem>>, %arg3: memref<3x16xi32, #tpu.memory_space<smem>>, %arg4: memref<3x16xi32, #tpu.memory_space<smem>>) -> (i32, i32, i32, i32) {
    %c2 = arith.constant 2 : index
    %0 = arith.index_cast %arg1 : i32 to index
    %1 = memref.load %arg3[%c2, %0] : memref<3x16xi32, #tpu.memory_space<smem>>
    %c0_i32 = arith.constant 0 : i32
    %c0_i32_0 = arith.constant 0 : i32
    %c0_i32_1 = arith.constant 0 : i32
    return %arg0, %1, %c0_i32, %c0_i32_0 : i32, i32, i32, i32
  }
  func.func @transform_7(%arg0: i32, %arg1: i32, %arg2: memref<3x16xi32, #tpu.memory_space<smem>>, %arg3: memref<3x16xi32, #tpu.memory_space<smem>>, %arg4: memref<3x16xi32, #tpu.memory_space<smem>>) -> (i32, i32) {
    %c0_i32 = arith.constant 0 : i32
    %c0_i32_0 = arith.constant 0 : i32
    %c0_i32_1 = arith.constant 0 : i32
    return %c0_i32, %c0_i32_0 : i32, i32
  }
  func.func @transform_8(%arg0: i32, %arg1: i32, %arg2: memref<3x16xi32, #tpu.memory_space<smem>>, %arg3: memref<3x16xi32, #tpu.memory_space<smem>>, %arg4: memref<3x16xi32, #tpu.memory_space<smem>>) -> (i32, i32) {
    %c0_i32 = arith.constant 0 : i32
    %c0_i32_0 = arith.constant 0 : i32
    %c0_i32_1 = arith.constant 0 : i32
    return %c0_i32, %c0_i32_0 : i32, i32
  }
  func.func @transform_9(%arg0: i32, %arg1: i32, %arg2: memref<3x16xi32, #tpu.memory_space<smem>>, %arg3: memref<3x16xi32, #tpu.memory_space<smem>>, %arg4: memref<3x16xi32, #tpu.memory_space<smem>>) -> (i32, i32) {
    %c0_i32 = arith.constant 0 : i32
    %c0_i32_0 = arith.constant 0 : i32
    %c0_i32_1 = arith.constant 0 : i32
    return %c0_i32, %c0_i32_0 : i32, i32
  }
  func.func @transform_10(%arg0: i32, %arg1: i32, %arg2: memref<3x16xi32, #tpu.memory_space<smem>>, %arg3: memref<3x16xi32, #tpu.memory_space<smem>>, %arg4: memref<3x16xi32, #tpu.memory_space<smem>>) -> (i32, i32) {
    %c0_i32 = arith.constant 0 : i32
    %c0_i32_0 = arith.constant 0 : i32
    %c0_i32_1 = arith.constant 0 : i32
    return %c0_i32, %c0_i32_0 : i32, i32
  }
  func.func @transform_11(%arg0: i32, %arg1: i32, %arg2: memref<3x16xi32, #tpu.memory_space<smem>>, %arg3: memref<3x16xi32, #tpu.memory_space<smem>>, %arg4: memref<3x16xi32, #tpu.memory_space<smem>>) -> (i32, i32) {
    %c0_i32 = arith.constant 0 : i32
    %c0_i32_0 = arith.constant 0 : i32
    %c0_i32_1 = arith.constant 0 : i32
    return %c0_i32, %c0_i32_0 : i32, i32
  }
  func.func @transform_12(%arg0: i32, %arg1: i32, %arg2: memref<3x16xi32, #tpu.memory_space<smem>>, %arg3: memref<3x16xi32, #tpu.memory_space<smem>>, %arg4: memref<3x16xi32, #tpu.memory_space<smem>>) -> (i32, i32) {
    %c0_i32 = arith.constant 0 : i32
    %c0_i32_0 = arith.constant 0 : i32
    %c0_i32_1 = arith.constant 0 : i32
    return %c0_i32, %c0_i32_0 : i32, i32
  }
  func.func @transform_13(%arg0: i32, %arg1: i32, %arg2: memref<3x16xi32, #tpu.memory_space<smem>>, %arg3: memref<3x16xi32, #tpu.memory_space<smem>>, %arg4: memref<3x16xi32, #tpu.memory_space<smem>>) -> (i32, i32) {
    %c0_i32 = arith.constant 0 : i32
    %c0_i32_0 = arith.constant 0 : i32
    %c0_i32_1 = arith.constant 0 : i32
    return %c0_i32, %c0_i32_0 : i32, i32
  }
  func.func @transform_14(%arg0: i32, %arg1: i32, %arg2: memref<3x16xi32, #tpu.memory_space<smem>>, %arg3: memref<3x16xi32, #tpu.memory_space<smem>>, %arg4: memref<3x16xi32, #tpu.memory_space<smem>>) -> (i32, i32) {
    %c0_i32 = arith.constant 0 : i32
    %c0_i32_0 = arith.constant 0 : i32
    %c0_i32_1 = arith.constant 0 : i32
    return %c0_i32, %c0_i32_0 : i32, i32
  }
  func.func @transform_15(%arg0: i32, %arg1: i32, %arg2: memref<3x16xi32, #tpu.memory_space<smem>>, %arg3: memref<3x16xi32, #tpu.memory_space<smem>>, %arg4: memref<3x16xi32, #tpu.memory_space<smem>>) -> (i32, i32) {
    %c0_i32 = arith.constant 0 : i32
    %c0_i32_0 = arith.constant 0 : i32
    %c0_i32_1 = arith.constant 0 : i32
    return %c0_i32, %c0_i32_0 : i32, i32
  }
  func.func @transform_16(%arg0: i32, %arg1: i32, %arg2: memref<3x16xi32, #tpu.memory_space<smem>>, %arg3: memref<3x16xi32, #tpu.memory_space<smem>>, %arg4: memref<3x16xi32, #tpu.memory_space<smem>>) -> (i32, i32) {
    %c0_i32 = arith.constant 0 : i32
    %c0_i32_0 = arith.constant 0 : i32
    %c0_i32_1 = arith.constant 0 : i32
    return %c0_i32, %c0_i32_0 : i32, i32
  }
  func.func @transform_17(%arg0: i32, %arg1: i32, %arg2: memref<3x16xi32, #tpu.memory_space<smem>>, %arg3: memref<3x16xi32, #tpu.memory_space<smem>>, %arg4: memref<3x16xi32, #tpu.memory_space<smem>>) -> (i32, i32) {
    %c0_i32 = arith.constant 0 : i32
    %c0_i32_0 = arith.constant 0 : i32
    %c0_i32_1 = arith.constant 0 : i32
    return %c0_i32, %c0_i32_0 : i32, i32
  }
  func.func @transform_18(%arg0: i32, %arg1: i32, %arg2: memref<3x16xi32, #tpu.memory_space<smem>>, %arg3: memref<3x16xi32, #tpu.memory_space<smem>>, %arg4: memref<3x16xi32, #tpu.memory_space<smem>>) -> (i32, i32) {
    %c0_i32 = arith.constant 0 : i32
    %c0_i32_0 = arith.constant 0 : i32
    %c0_i32_1 = arith.constant 0 : i32
    return %c0_i32, %c0_i32_0 : i32, i32
  }
  func.func @transform_19(%arg0: i32, %arg1: i32, %arg2: memref<3x16xi32, #tpu.memory_space<smem>>, %arg3: memref<3x16xi32, #tpu.memory_space<smem>>, %arg4: memref<3x16xi32, #tpu.memory_space<smem>>) -> (i32, i32) {
    %c0_i32 = arith.constant 0 : i32
    %c0_i32_0 = arith.constant 0 : i32
    %c0_i32_1 = arith.constant 0 : i32
    return %c0_i32, %c0_i32_0 : i32, i32
  }
  func.func @transform_20(%arg0: i32, %arg1: i32, %arg2: memref<3x16xi32, #tpu.memory_space<smem>>, %arg3: memref<3x16xi32, #tpu.memory_space<smem>>, %arg4: memref<3x16xi32, #tpu.memory_space<smem>>) -> (i32, i32) {
    %c0_i32 = arith.constant 0 : i32
    %c0_i32_0 = arith.constant 0 : i32
    %c0_i32_1 = arith.constant 0 : i32
    return %c0_i32, %c0_i32_0 : i32, i32
  }
  func.func @transform_21(%arg0: i32, %arg1: i32, %arg2: memref<3x16xi32, #tpu.memory_space<smem>>, %arg3: memref<3x16xi32, #tpu.memory_space<smem>>, %arg4: memref<3x16xi32, #tpu.memory_space<smem>>) -> (i32, i32) {
    %c0_i32 = arith.constant 0 : i32
    %c0_i32_0 = arith.constant 0 : i32
    %c0_i32_1 = arith.constant 0 : i32
    return %c0_i32, %c0_i32_0 : i32, i32
  }
  func.func @transform_22(%arg0: i32, %arg1: i32, %arg2: memref<3x16xi32, #tpu.memory_space<smem>>, %arg3: memref<3x16xi32, #tpu.memory_space<smem>>, %arg4: memref<3x16xi32, #tpu.memory_space<smem>>) -> (i32, i32) {
    %c0_i32 = arith.constant 0 : i32
    %c0_i32_0 = arith.constant 0 : i32
    %c0_i32_1 = arith.constant 0 : i32
    return %c0_i32, %c0_i32_0 : i32, i32
  }
  func.func @transform_23(%arg0: i32, %arg1: i32, %arg2: memref<3x16xi32, #tpu.memory_space<smem>>, %arg3: memref<3x16xi32, #tpu.memory_space<smem>>, %arg4: memref<3x16xi32, #tpu.memory_space<smem>>) -> (i32, i32, i32, i32) {
    %c0_i32 = arith.constant 0 : i32
    %c0_i32_0 = arith.constant 0 : i32
    %c0_i32_1 = arith.constant 0 : i32
    return %arg0, %arg1, %c0_i32, %c0_i32_0 : i32, i32, i32, i32
  }
}

module attributes {stable_mosaic.version = 11 : i64} {
  func.func @_resize_rows_kernel(%arg0: i32, %arg1: i32, %arg2: memref<64xi32, #tpu.memory_space<smem>>, %arg3: memref<64xi32, #tpu.memory_space<smem>>, %arg4: memref<64xi32, #tpu.memory_space<smem>>, %arg5: memref<1x1x1x128xbf16, #tpu.memory_space<vmem>>, %arg6: memref<1x1x1x128xbf16, #tpu.memory_space<vmem>>, %arg7: memref<1x1x1x128xbf16, #tpu.memory_space<vmem>>) attributes {dimension_semantics = [#tpu.dimension_semantics<parallel>, #tpu.dimension_semantics<parallel>], iteration_bounds = array<i64: 2, 64>, scalar_prefetch = 3 : i64, scratch_operands = 0 : i64, tpu.core_type = #tpu.core_type<tc>, window_params = [{transform_indices = @transform_0, window_bounds = array<i64: 1, 1, 1, 128>}, {transform_indices = @transform_1, window_bounds = array<i64: 1, 1, 1, 128>}, {transform_indices = @transform_2, window_bounds = array<i64: 1, 1, 1, 128>}]} {
    %0 = arith.index_cast %arg1 : i32 to index
    %1 = memref.load %arg4[%0] : memref<64xi32, #tpu.memory_space<smem>>
    %2 = arith.sitofp %1 : i32 to f32
    %cst = arith.constant 1.52587891E-5 : f32
    %3 = arith.mulf %2, %cst : f32
    %c0 = arith.constant 0 : index
    %c0_0 = arith.constant 0 : index
    %c0_1 = arith.constant 0 : index
    %c0_2 = arith.constant 0 : index
    %4 = vector.load %arg5[%c0, %c0_0, %c0_1, %c0_2] : memref<1x1x1x128xbf16, #tpu.memory_space<vmem>>, vector<1x1x1x128xbf16>
    %5 = arith.extf %4 : vector<1x1x1x128xbf16> to vector<1x1x1x128xf32>
    %c0_3 = arith.constant 0 : index
    %c0_4 = arith.constant 0 : index
    %c0_5 = arith.constant 0 : index
    %c0_6 = arith.constant 0 : index
    %6 = vector.load %arg6[%c0_3, %c0_4, %c0_5, %c0_6] : memref<1x1x1x128xbf16, #tpu.memory_space<vmem>>, vector<1x1x1x128xbf16>
    %7 = arith.extf %6 : vector<1x1x1x128xbf16> to vector<1x1x1x128xf32>
    %8 = arith.subf %7, %5 : vector<1x1x1x128xf32>
    %9 = vector.broadcast %3 : f32 to vector<1x1x1x128xf32>
    %10 = arith.mulf %9, %8 : vector<1x1x1x128xf32>
    %11 = arith.addf %5, %10 : vector<1x1x1x128xf32>
    %12 = arith.truncf %11 : vector<1x1x1x128xf32> to vector<1x1x1x128xbf16>
    %c0_7 = arith.constant 0 : index
    %c0_8 = arith.constant 0 : index
    %c0_9 = arith.constant 0 : index
    %c0_10 = arith.constant 0 : index
    %13 = vector.load %arg7[%c0_7, %c0_8, %c0_9, %c0_10] : memref<1x1x1x128xbf16, #tpu.memory_space<vmem>>, vector<1x1x1x128xbf16>
    tpu.vector_store %arg7[%c0_7, %c0_8, %c0_9, %c0_10], %12 {strides = array<i32>} : memref<1x1x1x128xbf16, #tpu.memory_space<vmem>>, vector<1x1x1x128xbf16>,
    return
  }
  func.func @transform_0(%arg0: i32, %arg1: i32, %arg2: memref<64xi32, #tpu.memory_space<smem>>, %arg3: memref<64xi32, #tpu.memory_space<smem>>, %arg4: memref<64xi32, #tpu.memory_space<smem>>) -> (i32, i32, i32, i32) {
    %0 = arith.index_cast %arg1 : i32 to index
    %1 = memref.load %arg2[%0] : memref<64xi32, #tpu.memory_space<smem>>
    %c0_i32 = arith.constant 0 : i32
    %c0_i32_0 = arith.constant 0 : i32
    %c0_i32_1 = arith.constant 0 : i32
    return %arg0, %1, %c0_i32, %c0_i32_0 : i32, i32, i32, i32
  }
  func.func @transform_1(%arg0: i32, %arg1: i32, %arg2: memref<64xi32, #tpu.memory_space<smem>>, %arg3: memref<64xi32, #tpu.memory_space<smem>>, %arg4: memref<64xi32, #tpu.memory_space<smem>>) -> (i32, i32, i32, i32) {
    %0 = arith.index_cast %arg1 : i32 to index
    %1 = memref.load %arg3[%0] : memref<64xi32, #tpu.memory_space<smem>>
    %c0_i32 = arith.constant 0 : i32
    %c0_i32_0 = arith.constant 0 : i32
    %c0_i32_1 = arith.constant 0 : i32
    return %arg0, %1, %c0_i32, %c0_i32_0 : i32, i32, i32, i32
  }
  func.func @transform_2(%arg0: i32, %arg1: i32, %arg2: memref<64xi32, #tpu.memory_space<smem>>, %arg3: memref<64xi32, #tpu.memory_space<smem>>, %arg4: memref<64xi32, #tpu.memory_space<smem>>) -> (i32, i32, i32, i32) {
    %c0_i32 = arith.constant 0 : i32
    %c0_i32_0 = arith.constant 0 : i32
    %c0_i32_1 = arith.constant 0 : i32
    return %arg0, %arg1, %c0_i32, %c0_i32_0 : i32, i32, i32, i32
  }
}

module attributes {stable_mosaic.version = 11 : i64} {
  func.func @_resize_rows_kernel(%arg0: i32, %arg1: i32, %arg2: memref<64xi32, #tpu.memory_space<smem>>, %arg3: memref<64xi32, #tpu.memory_space<smem>>, %arg4: memref<64xi32, #tpu.memory_space<smem>>, %arg5: memref<1x1x4x128xbf16, #tpu.memory_space<vmem>>, %arg6: memref<1x1x4x128xbf16, #tpu.memory_space<vmem>>, %arg7: memref<1x1x4x128xf32, #tpu.memory_space<vmem>>) attributes {dimension_semantics = [#tpu.dimension_semantics<parallel>, #tpu.dimension_semantics<parallel>], iteration_bounds = array<i64: 2, 64>, scalar_prefetch = 3 : i64, scratch_operands = 0 : i64, tpu.core_type = #tpu.core_type<tc>, window_params = [{transform_indices = @transform_0, window_bounds = array<i64: 1, 1, 4, 128>}, {transform_indices = @transform_1, window_bounds = array<i64: 1, 1, 4, 128>}, {transform_indices = @transform_2, window_bounds = array<i64: 1, 1, 4, 128>}]} {
    %0 = arith.index_cast %arg1 : i32 to index
    %1 = memref.load %arg4[%0] : memref<64xi32, #tpu.memory_space<smem>>
    %2 = arith.sitofp %1 : i32 to f32
    %cst = arith.constant 1.52587891E-5 : f32
    %3 = arith.mulf %2, %cst : f32
    %c0 = arith.constant 0 : index
    %c0_0 = arith.constant 0 : index
    %c0_1 = arith.constant 0 : index
    %c0_2 = arith.constant 0 : index
    %4 = vector.load %arg5[%c0, %c0_0, %c0_1, %c0_2] : memref<1x1x4x128xbf16, #tpu.memory_space<vmem>>, vector<1x1x4x128xbf16>
    %5 = arith.extf %4 : vector<1x1x4x128xbf16> to vector<1x1x4x128xf32>
    %c0_3 = arith.constant 0 : index
    %c0_4 = arith.constant 0 : index
    %c0_5 = arith.constant 0 : index
    %c0_6 = arith.constant 0 : index
    %6 = vector.load %arg6[%c0_3, %c0_4, %c0_5, %c0_6] : memref<1x1x4x128xbf16, #tpu.memory_space<vmem>>, vector<1x1x4x128xbf16>
    %7 = arith.extf %6 : vector<1x1x4x128xbf16> to vector<1x1x4x128xf32>
    %8 = arith.subf %7, %5 : vector<1x1x4x128xf32>
    %9 = vector.broadcast %3 : f32 to vector<1x1x4x128xf32>
    %10 = arith.mulf %9, %8 : vector<1x1x4x128xf32>
    %11 = arith.addf %5, %10 : vector<1x1x4x128xf32>
    %c0_7 = arith.constant 0 : index
    %c0_8 = arith.constant 0 : index
    %c0_9 = arith.constant 0 : index
    %c0_10 = arith.constant 0 : index
    %12 = vector.load %arg7[%c0_7, %c0_8, %c0_9, %c0_10] : memref<1x1x4x128xf32, #tpu.memory_space<vmem>>, vector<1x1x4x128xf32>
    tpu.vector_store %arg7[%c0_7, %c0_8, %c0_9, %c0_10], %11 {strides = array<i32>} : memref<1x1x4x128xf32, #tpu.memory_space<vmem>>, vector<1x1x4x128xf32>,
    return
  }
  func.func @transform_0(%arg0: i32, %arg1: i32, %arg2: memref<64xi32, #tpu.memory_space<smem>>, %arg3: memref<64xi32, #tpu.memory_space<smem>>, %arg4: memref<64xi32, #tpu.memory_space<smem>>) -> (i32, i32, i32, i32) {
    %0 = arith.index_cast %arg1 : i32 to index
    %1 = memref.load %arg2[%0] : memref<64xi32, #tpu.memory_space<smem>>
    %c0_i32 = arith.constant 0 : i32
    %c0_i32_0 = arith.constant 0 : i32
    %c0_i32_1 = arith.constant 0 : i32
    return %arg0, %1, %c0_i32, %c0_i32_0 : i32, i32, i32, i32
  }
  func.func @transform_1(%arg0: i32, %arg1: i32, %arg2: memref<64xi32, #tpu.memory_space<smem>>, %arg3: memref<64xi32, #tpu.memory_space<smem>>, %arg4: memref<64xi32, #tpu.memory_space<smem>>) -> (i32, i32, i32, i32) {
    %0 = arith.index_cast %arg1 : i32 to index
    %1 = memref.load %arg3[%0] : memref<64xi32, #tpu.memory_space<smem>>
    %c0_i32 = arith.constant 0 : i32
    %c0_i32_0 = arith.constant 0 : i32
    %c0_i32_1 = arith.constant 0 : i32
    return %arg0, %1, %c0_i32, %c0_i32_0 : i32, i32, i32, i32
  }
  func.func @transform_2(%arg0: i32, %arg1: i32, %arg2: memref<64xi32, #tpu.memory_space<smem>>, %arg3: memref<64xi32, #tpu.memory_space<smem>>, %arg4: memref<64xi32, #tpu.memory_space<smem>>) -> (i32, i32, i32, i32) {
    %c0_i32 = arith.constant 0 : i32
    %c0_i32_0 = arith.constant 0 : i32
    %c0_i32_1 = arith.constant 0 : i32
    return %arg0, %arg1, %c0_i32, %c0_i32_0 : i32, i32, i32, i32
  }
}

</mosaic_0001>

<bundles_post_ra>
// kernel: encoder_decoder_forward.7
= control target key start
LH: loop header
LB: loop body
LE: loop exit
PB: predicated region body
PF: predicated region fallthrough
CT: control target
= control target key end

     0   :  { %vm276_vm0 = vcmask 392192   ;;  %vm662_vm1 = vcmask 261120   ;;  %vm1894_vm2 = vcmask 257024   ;;  %s3781_s1 = inlined_call_operand.vmem [shape: bf16[48,32], index: 1, kind: input, shape index: {}]   ;;  %s3782_s0 = inlined_call_operand.vmem [shape: bf16[512,48], index: 0, kind: input, shape index: {}]   ;;  %s3783_s2 = inlined_call_operand.vmem [shape: f32[1,32], index: 2, kind: input, shape index: {}]   ;;  %s3784_s3 = inlined_call_operand.vmem [shape: f32[1,32], index: 3, kind: input, shape index: {}]   ;;  %s3785_s4 = inlined_call_operand.vmem [shape: f32[1,32], index: 4, kind: input, shape index: {}]   ;;  %s3786_s5 = inlined_call_operand.vmem [shape: bf16[512,32], index: 5, kind: output, shape index: {}]  }
   0x1   :  { %v2272_v0 = vld [vmem:[%s3781_s1 + $0x10] sm:$0xff]   ;;  %v2273_v1 = vld [vmem:[%s3781_s1 + $0x8] sm:$0xff]   ;;  %v2274_v2 = vld [vmem:[%s3781_s1] sm:$0xff]  }
   0x2   :  { %2196 = vmatprep.subr.bf16.mxu0 %v2272_v0  ;;  %2266 = vmatprep.subr.bf16.mxu1 %v2272_v0  ;;  %v2275_v3 = vld [vmem:[%s3782_s0] sm:$0xff]   ;;  %v2277_v5 = vld [vmem:[%s3782_s0 + $0x8] sm:$0xff]   ;;  %v2279_v7 = vld [vmem:[%s3782_s0 + $0x10] sm:$0xff]  }
   0x3   :  { %2197 = vmatpush3.bf16.msra.mxu0 %v2272_v0  ;;  %2269 = vmatpush3.bf16.msra.mxu1 %v2272_v0  ;;  %v2276_v4 = vld [vmem:[%s3782_s0 + $0x80] sm:$0xff]   ;;  %v2278_v6 = vld [vmem:[%s3782_s0 + $0x88] sm:$0xff]   ;;  %v2281_v8 = vld [vmem:[%s3782_s0 + $0x90] sm:$0xff]  }
   0x4   :  { %2198 = vmatprep.subr.bf16.mxu0 %v2273_v1  ;;  %2267 = vmatprep.subr.bf16.mxu1 %v2273_v1  ;;  %v2280_v9 = vld [vmem:[%s3782_s0 + $0x18] sm:$0xff]   ;;  %v2283_v11 = vld [vmem:[%s3782_s0 + $0x20] sm:$0xff]   ;;  %v2284_v13 = vld [vmem:[%s3782_s0 + $0x28] sm:$0xff]  }
   0x5   :  { %2202 = vmatprep.mubr.msk.bf16.mxu0 %vm276_vm0, %v2275_v3  ;;  %2234 = vmatprep.mubr.msk.bf16.mxu1 %vm276_vm0, %v2276_v4  ;;  %v2282_v10 = vld [vmem:[%s3782_s0 + $0x98] sm:$0xff]   ;;  %v2285_v12 = vld [vmem:[%s3782_s0 + $0xa0] sm:$0xff]   ;;  %v2286_v14 = vld [vmem:[%s3782_s0 + $0xa8] sm:$0xff]  }
   0x6   :  { %v2287_v15 = vld [vmem:[%s3782_s0 + $0x30] sm:$0xff]   ;;  %v2288_v17 = vld [vmem:[%s3782_s0 + $0x38] sm:$0xff]   ;;  %v2291_v19 = vld [vmem:[%s3782_s0 + $0x40] sm:$0xff]  }
   0x7   :  { %2199 = vmatpush3.bf16.msra.mxu0 %v2273_v1  ;;  %2270 = vmatpush3.bf16.msra.mxu1 %v2273_v1  ;;  %v2289_v16 = vld [vmem:[%s3782_s0 + $0xb0] sm:$0xff]   ;;  %v2290_v18 = vld [vmem:[%s3782_s0 + $0xb8] sm:$0xff]   ;;  %v2293_v20 = vld [vmem:[%s3782_s0 + $0xc0] sm:$0xff]  }
   0x8   :  { %2200 = vmatprep.subr.bf16.mxu0 %v2274_v2  ;;  %2268 = vmatprep.subr.bf16.mxu1 %v2274_v2  ;;  %v2292_v21 = vld [vmem:[%s3782_s0 + $0x48] sm:$0xff]   ;;  %v2295_v23 = vld [vmem:[%s3782_s0 + $0x50] sm:$0xff]   ;;  %v2296_v25 = vld [vmem:[%s3782_s0 + $0x58] sm:$0xff]  }
   0x9   :  { %v2294_v22 = vld [vmem:[%s3782_s0 + $0xc8] sm:$0xff]   ;;  %v2297_v24 = vld [vmem:[%s3782_s0 + $0xd0] sm:$0xff]   ;;  %v2298_v26 = vld [vmem:[%s3782_s0 + $0xd8] sm:$0xff]  }
   0xa   :  { %v2299_v27 = vld [vmem:[%s3782_s0 + $0x60] sm:$0xff]   ;;  %v2300_v29 = vld [vmem:[%s3782_s0 + $0x68] sm:$0xff]   ;;  %v2303_v31 = vld [vmem:[%s3782_s0 + $0x70] sm:$0xff]  }
   0xb   :  { %2201 = vmatpush3.bf16.msra.mxu0 %v2274_v2  ;;  %2271 = vmatpush3.bf16.msra.mxu1 %v2274_v2  ;;  %v2301_v28 = vld [vmem:[%s3782_s0 + $0xe0] sm:$0xff]   ;;  %v2302_v30 = vld [vmem:[%s3782_s0 + $0xe8] sm:$0xff]   ;;  %v2305_v32 = vld [vmem:[%s3782_s0 + $0xf0] sm:$0xff]  }
   0xc   :  { %v2304_v33 = vld [vmem:[%s3782_s0 + $0x78] sm:$0xff]   ;;  %v2607_v35 = vld [vmem:[%s3783_s2] ss:$0 sm:$0xff] }
   0xd   :  { %v2306_v34 = vld [vmem:[%s3782_s0 + $0xf8] sm:$0xff]  }
   0xe   :  { %2203 = vmatmul.mubr.msk.bf16.vlgmr.msra.gmra.mxu0 %vm276_vm0, %v2277_v5  ;;  %2235 = vmatmul.mubr.msk.bf16.vlgmr.msra.gmra.mxu1 %vm276_vm0, %v2278_v6 }
   0xf   :  { %2206 = vmatprep.mubr.msk.bf16.mxu0 %vm276_vm0, %v2279_v7  ;;  %2238 = vmatprep.mubr.msk.bf16.mxu1 %vm276_vm0, %v2281_v8 }
  0x16   :  { %2207 = vmatmul.mubr.msk.bf16.gmra.mxu0 %vm276_vm0, %v2280_v9  ;;  %2239 = vmatmul.mubr.msk.bf16.gmra.mxu1 %vm276_vm0, %v2282_v10 }
  0x17   :  { %2210 = vmatprep.mubr.msk.bf16.mxu0 %vm276_vm0, %v2283_v11  ;;  %2242 = vmatprep.mubr.msk.bf16.mxu1 %vm276_vm0, %v2285_v12 }
  0x1e   :  { %2211 = vmatmul.mubr.msk.bf16.gmra.mxu0 %vm276_vm0, %v2284_v13  ;;  %2243 = vmatmul.mubr.msk.bf16.gmra.mxu1 %vm276_vm0, %v2286_v14 }
  0x1f   :  { %2214 = vmatprep.mubr.msk.bf16.mxu0 %vm276_vm0, %v2287_v15  ;;  %2246 = vmatprep.mubr.msk.bf16.mxu1 %vm276_vm0, %v2289_v16 }
  0x26   :  { %2215 = vmatmul.mubr.msk.bf16.gmra.mxu0 %vm276_vm0, %v2288_v17  ;;  %2247 = vmatmul.mubr.msk.bf16.gmra.mxu1 %vm276_vm0, %v2290_v18 }
  0x27   :  { %2218 = vmatprep.mubr.msk.bf16.mxu0 %vm276_vm0, %v2291_v19  ;;  %2250 = vmatprep.mubr.msk.bf16.mxu1 %vm276_vm0, %v2293_v20 }
  0x2e   :  { %2219 = vmatmul.mubr.msk.bf16.gmra.mxu0 %vm276_vm0, %v2292_v21  ;;  %2251 = vmatmul.mubr.msk.bf16.gmra.mxu1 %vm276_vm0, %v2294_v22 }
  0x2f   :  { %2222 = vmatprep.mubr.msk.bf16.mxu0 %vm276_vm0, %v2295_v23  ;;  %2254 = vmatprep.mubr.msk.bf16.mxu1 %vm276_vm0, %v2297_v24 }
  0x36   :  { %2223 = vmatmul.mubr.msk.bf16.gmra.mxu0 %vm276_vm0, %v2296_v25  ;;  %2255 = vmatmul.mubr.msk.bf16.gmra.mxu1 %vm276_vm0, %v2298_v26 }
  0x37   :  { %2226 = vmatprep.mubr.msk.bf16.mxu0 %vm276_vm0, %v2299_v27  ;;  %2258 = vmatprep.mubr.msk.bf16.mxu1 %vm276_vm0, %v2301_v28 }
  0x3e   :  { %2227 = vmatmul.mubr.msk.bf16.gmra.mxu0 %vm276_vm0, %v2300_v29  ;;  %2259 = vmatmul.mubr.msk.bf16.gmra.mxu1 %vm276_vm0, %v2302_v30 }
  0x3f   :  { %2230 = vmatprep.mubr.msk.bf16.mxu0 %vm276_vm0, %v2303_v31  ;;  %2262 = vmatprep.mubr.msk.bf16.mxu1 %vm276_vm0, %v2305_v32 }
  0x46   :  { %2231 = vmatmul.mubr.msk.bf16.gmra.mxu0 %vm276_vm0, %v2304_v33  ;;  %2263 = vmatmul.mubr.msk.bf16.gmra.mxu1 %vm276_vm0, %v2306_v34 }
  0xce   :  { %v2204_v36 = vpop.f32.mrf.mxu0  ;;  %v2236_v37 = vpop.f32.mrf.mxu1 }
  0xcf   :  { %v2610_v38 = vadd.f32 %v2204_v36, %v2607_v35  ;;  %v2613_v39 = vadd.f32 %v2236_v37, %v2607_v35 }
  0xd0   :  { %v407_v40 = vpop.f32.mrf.mxu0  ;;  %v535_v41 = vpop.f32.mrf.mxu1 }
  0xd1   :  { %v2616_v42 = vadd.f32 %v2607_v35, %v407_v40  ;;  %v765_v43 = vsel %vm662_vm1, %v2613_v39, 0.0  ;;  %v669_v44 = vsel %vm662_vm1, %v2610_v38, 0.0  ;;  %v2626_v49 = vadd.f32 %v2607_v35, %v535_v41 }
  0xd2   :  { %766 = vadd.xlane.f32.xlu0 %v765_v43  ;;  %v2237_v45 = vpop.f32.mrf.mxu1  ;;  %670 = vadd.xlane.f32.xlu1 %v669_v44  ;;  %v2205_v46 = vpop.f32.mrf.mxu0 }
  0xd3   :  { %v2623_v47 = vadd.f32 %v2205_v46, %v2607_v35  ;;  %v2629_v50 = vadd.f32 %v2237_v45, %v2607_v35  ;;  %v663_v52 = vsel %vm662_vm1, %v2616_v42, 0.0  ;;  %v759_v60 = vsel %vm662_vm1, %v2626_v49, 0.0 }
  0xd4   :  { %v410_v48 = vpop.f32.mrf.mxu0  ;;  %v538_v53 = vpop.f32.mrf.mxu1 }
  0xd5   :  { %v672_v51 = vsel %vm662_vm1, %v2623_v47, 0.0  ;;  %v2636_v57 = vadd.f32 %v2607_v35, %v410_v48  ;;  %v2639_v58 = vadd.f32 %v2607_v35, %v538_v53  ;;  %v768_v59 = vsel %vm662_vm1, %v2629_v50, 0.0 }
  0xd6   :  { %673 = vadd.xlane.f32.xlu1 %v672_v51  ;;  %v2208_v54 = vpop.f32.mrf.mxu0  ;;  %664 = vadd.xlane.f32.xlu0 %v663_v52  ;;  %v2240_v56 = vpop.f32.mrf.mxu1 }
  0xd7   :  { %v2646_v63 = vadd.f32 %v2208_v54, %v2607_v35  ;;  %v762_v1 = vsel %vm662_vm1, %v2639_v58, 0.0  ;;  %v666_v2 = vsel %vm662_vm1, %v2636_v57, 0.0  ;;  %v2656_v4 = vadd.f32 %v2240_v56, %v2607_v35 }
  0xd8   :  { %v423_v55 = vpop.f32.mrf.mxu0  ;;  %v551_v62 = vpop.f32.mrf.mxu1 }
  0xd9   :  { %v681_v7 = vsel %vm662_vm1, %v2646_v63, 0.0  ;;  %v2666_v10 = vadd.f32 %v2607_v35, %v423_v55  ;;  %v777_v13 = vsel %vm662_vm1, %v2656_v4, 0.0  ;;  %v2676_v17 = vadd.f32 %v2607_v35, %v551_v62 }
  0xda   :  { %769 = vadd.xlane.f32.xlu1 %v768_v59  ;;  %v2209_v61 = vpop.f32.mrf.mxu0  ;;  %760 = vadd.xlane.f32.xlu0 %v759_v60  ;;  %v2241_v3 = vpop.f32.mrf.mxu1 }
  0xdb   :  { %v2649_v0 = vadd.f32 %v2209_v61, %v2607_v35  ;;  %v2659_v5 = vadd.f32 %v2241_v3, %v2607_v35  ;;  %v675_v20 = vsel %vm662_vm1, %v2666_v10, 0.0  ;;  %v771_v26 = vsel %vm662_vm1, %v2676_v17, 0.0 }
  0xdc   :  { %v426_v8 = vpop.f32.mrf.mxu0  ;;  %v554_v14 = vpop.f32.mrf.mxu1 }
  0xdd   :  { %v684_v6 = vsel %vm662_vm1, %v2649_v0, 0.0  ;;  %v2669_v11 = vadd.f32 %v2607_v35, %v426_v8  ;;  %v780_v12 = vsel %vm662_vm1, %v2659_v5, 0.0  ;;  %v2679_v18 = vadd.f32 %v2607_v35, %v554_v14 }
  0xde   :  { %763 = vadd.xlane.f32.xlu1 %v762_v1  ;;  %667 = vadd.xlane.f32.xlu0 %v666_v2  ;;  %v2212_v9 = vpop.f32.mrf.mxu0  ;;  %v2244_v16 = vpop.f32.mrf.mxu1 }
  0xdf   :  { %v678_v19 = vsel %vm662_vm1, %v2669_v11, 0.0  ;;  %v2686_v23 = vadd.f32 %v2212_v9, %v2607_v35  ;;  %v774_v25 = vsel %vm662_vm1, %v2679_v18, 0.0  ;;  %v2696_v28 = vadd.f32 %v2244_v16, %v2607_v35 }
  0xe0   :  { %v439_v15 = vpop.f32.mrf.mxu0  ;;  %v567_v22 = vpop.f32.mrf.mxu1 }
  0xe1   :  { %v693_v31 = vsel %vm662_vm1, %v2686_v23, 0.0  ;;  %v2706_v34 = vadd.f32 %v2607_v35, %v439_v15  ;;  %v789_v40 = vsel %vm662_vm1, %v2696_v28, 0.0  ;;  %v2716_v45 = vadd.f32 %v2607_v35, %v567_v22 }
  0xe2   :  { %685 = vadd.xlane.f32.xlu1 %v684_v6  ;;  %682 = vadd.xlane.f32.xlu0 %v681_v7  ;;  %v2213_v21 = vpop.f32.mrf.mxu0  ;;  %v2245_v27 = vpop.f32.mrf.mxu1 }
  0xe3   :  { %v2689_v24 = vadd.f32 %v2213_v21, %v2607_v35  ;;  %v2699_v29 = vadd.f32 %v2245_v27, %v2607_v35  ;;  %v687_v51 = vsel %vm662_vm1, %v2706_v34, 0.0  ;;  %v783_v59 = vsel %vm662_vm1, %v2716_v45, 0.0 }
  0xe4   :  { %v442_v32 = vpop.f32.mrf.mxu0  ;;  %v570_v41 = vpop.f32.mrf.mxu1 }
  0xe5   :  { %v696_v30 = vsel %vm662_vm1, %v2689_v24, 0.0  ;;  %v2709_v36 = vadd.f32 %v2607_v35, %v442_v32  ;;  %v792_v37 = vsel %vm662_vm1, %v2699_v29, 0.0  ;;  %v2719_v46 = vadd.f32 %v2607_v35, %v570_v41 }
  0xe6   :  { %781 = vadd.xlane.f32.xlu1 %v780_v12  ;;  %778 = vadd.xlane.f32.xlu0 %v777_v13  ;;  %v2216_v33 = vpop.f32.mrf.mxu0  ;;  %v2248_v44 = vpop.f32.mrf.mxu1 }
  0xe7   :  { %v690_v48 = vsel %vm662_vm1, %v2709_v36, 0.0  ;;  %v2726_v54 = vadd.f32 %v2216_v33, %v2607_v35  ;;  %v786_v56 = vsel %vm662_vm1, %v2719_v46, 0.0  ;;  %v2736_v61 = vadd.f32 %v2248_v44, %v2607_v35 }
  0xe8   :  { %v455_v43 = vpop.f32.mrf.mxu0  ;;  %v583_v53 = vpop.f32.mrf.mxu1 }
  0xe9   :  { %v705_v2 = vsel %vm662_vm1, %v2726_v54, 0.0  ;;  %v2746_v7 = vadd.f32 %v2607_v35, %v455_v43  ;;  %v801_v12 = vsel %vm662_vm1, %v2736_v61, 0.0  ;;  %v2756_v16 = vadd.f32 %v2607_v35, %v583_v53 }
  0xea   :  { %679 = vadd.xlane.f32.xlu1 %v678_v19  ;;  %676 = vadd.xlane.f32.xlu0 %v675_v20  ;;  %v2217_v52 = vpop.f32.mrf.mxu0  ;;  %v2249_v60 = vpop.f32.mrf.mxu1 }
  0xeb   :  { %v2729_v55 = vadd.f32 %v2217_v52, %v2607_v35  ;;  %v2739_v62 = vadd.f32 %v2249_v60, %v2607_v35  ;;  %v699_v21 = vsel %vm662_vm1, %v2746_v7, 0.0 }
  0xec   :  { %v458_v3 = vpop.f32.mrf.mxu0  ;;  %v586_v13 = vpop.f32.mrf.mxu1 }
  0xed   :  { %v708_v1 = vsel %vm662_vm1, %v2729_v55, 0.0  ;;  %v2749_v8 = vadd.f32 %v2607_v35, %v458_v3  ;;  %v804_v9 = vsel %vm662_vm1, %v2739_v62, 0.0  ;;  %v2759_v19 = vadd.f32 %v2607_v35, %v586_v13 }
  0xee   :  { %775 = vadd.xlane.f32.xlu1 %v774_v25  ;;  %772 = vadd.xlane.f32.xlu0 %v771_v26  ;;  %v2220_v6 = vpop.f32.mrf.mxu0  ;;  %v2252_v15 = vpop.f32.mrf.mxu1 }
  0xef   :  { %v702_v20 = vsel %vm662_vm1, %v2749_v8, 0.0  ;;  %v2766_v26 = vadd.f32 %v2220_v6, %v2607_v35  ;;  %v2776_v33 = vadd.f32 %v2252_v15, %v2607_v35 }
  0xf0   :  { %v471_v14 = vpop.f32.mrf.mxu0  ;;  %v599_v25 = vpop.f32.mrf.mxu1 }
  0xf1   :  { %v717_v41 = vsel %vm662_vm1, %v2766_v26, 0.0  ;;  %v813_v53 = vsel %vm662_vm1, %v2776_v33, 0.0 }
  0xf2   :  { %697 = vadd.xlane.f32.xlu1 %v696_v30  ;;  %694 = vadd.xlane.f32.xlu0 %v693_v31  ;;  %v2221_v22 = vpop.f32.mrf.mxu0  ;;  %v798_v30 = vsel %vm662_vm1, %v2759_v19, 0.0  ;;  %v795_v31 = vsel %vm662_vm1, %v2756_v16, 0.0  ;;  %v2253_v32 = vpop.f32.mrf.mxu1 }
  0xf3   :  { %v2769_v27 = vadd.f32 %v2221_v22, %v2607_v35 }
  0xf4   :  { %v474_v43 = vpop.f32.mrf.mxu0 }
  0xf6   :  { %793 = vadd.xlane.f32.xlu1 %v792_v37  ;;  %790 = vadd.xlane.f32.xlu0 %v789_v40  ;;  %v2779_v37 = vadd.f32 %v2253_v32, %v2607_v35  ;;  %v720_v40 = vsel %vm662_vm1, %v2769_v27, 0.0  ;;  %v2224_v44 = vpop.f32.mrf.mxu0 }
  0xf7   :  { %v2806_v13 = vadd.f32 %v2224_v44, %v2607_v35 }
  0xf8   :  { %v816_v52 = vsel %vm662_vm1, %v2779_v37, 0.0 }
  0xfa   :  { %691 = vadd.xlane.f32.xlu1 %v690_v48  ;;  %688 = vadd.xlane.f32.xlu0 %v687_v51  ;;  %v2786_v48 = vadd.f32 %v2607_v35, %v471_v14  ;;  %v2789_v51 = vadd.f32 %v2607_v35, %v474_v43 }
  0xfc   :  { %v714_v3 = vsel %vm662_vm1, %v2789_v51, 0.0  ;;  %v711_v6 = vsel %vm662_vm1, %v2786_v48, 0.0 }
  0xfe   :  { %787 = vadd.xlane.f32.xlu1 %v786_v56  ;;  %784 = vadd.xlane.f32.xlu0 %v783_v59  ;;  %v602_v56 = vpop.f32.mrf.mxu1  ;;  %v487_v59 = vpop.f32.mrf.mxu0 }
 0x100   :  { %v2256_v60 = vpop.f32.mrf.mxu1 }
 0x101   :  { %v2816_v22 = vadd.f32 %v2256_v60, %v2607_v35 }
 0x102   :  { %709 = vadd.xlane.f32.xlu1 %v708_v1  ;;  %706 = vadd.xlane.f32.xlu0 %v705_v2  ;;  %v2796_v1 = vadd.f32 %v2607_v35, %v599_v25  ;;  %v2799_v2 = vadd.f32 %v2607_v35, %v602_v56 }
 0x104   :  { %v810_v15 = vsel %vm662_vm1, %v2799_v2, 0.0 }
 0x106   :  { %805 = vadd.xlane.f32.xlu1 %v804_v9  ;;  %802 = vadd.xlane.f32.xlu0 %v801_v12  ;;  %v2225_v9 = vpop.f32.mrf.mxu0  ;;  %v615_v12 = vpop.f32.mrf.mxu1 }
 0x107   :  { %v2809_v14 = vadd.f32 %v2225_v9, %v2607_v35 }
 0x108   :  { %v490_v32 = vpop.f32.mrf.mxu0 }
 0x109   :  { %v2829_v43 = vadd.f32 %v2607_v35, %v490_v32 }
 0x10a   :  { %703 = vadd.xlane.f32.xlu1 %v702_v20  ;;  %700 = vadd.xlane.f32.xlu0 %v699_v21  ;;  %v807_v20 = vsel %vm662_vm1, %v2796_v1, 0.0  ;;  %v2257_v21 = vpop.f32.mrf.mxu1 }
 0x10b   :  { %v2819_v25 = vadd.f32 %v2257_v21, %v2607_v35 }
 0x10d   :  { %v828_v44 = vsel %vm662_vm1, %v2819_v25, 0.0 }
 0x10e   :  { %799 = vadd.xlane.f32.xlu1 %v798_v30  ;;  %796 = vadd.xlane.f32.xlu0 %v795_v31  ;;  %v732_v30 = vsel %vm662_vm1, %v2809_v14, 0.0  ;;  %v729_v31 = vsel %vm662_vm1, %v2806_v13, 0.0 }
 0x112   :  { %721 = vadd.xlane.f32.xlu1 %v720_v40  ;;  %718 = vadd.xlane.f32.xlu0 %v717_v41  ;;  %v2228_v40 = vpop.f32.mrf.mxu0  ;;  %v2826_v41 = vadd.f32 %v2607_v35, %v487_v59 }
 0x113   :  { %v2846_v21 = vadd.f32 %v2228_v40, %v2607_v35 }
 0x114   :  { %v503_v56 = vpop.f32.mrf.mxu0  ;;  %v723_v9 = vsel %vm662_vm1, %v2826_v41, 0.0 }
 0x115   :  { %3820 = vst [vmem:[#allocation2_spill] sm:$0xff] %v2846_v21 }
 0x116   :  { %817 = vadd.xlane.f32.xlu1 %v816_v52  ;;  %814 = vadd.xlane.f32.xlu0 %v813_v53  ;;  %v825_v52 = vsel %vm662_vm1, %v2816_v22, 0.0  ;;  %v618_v53 = vpop.f32.mrf.mxu1 }
 0x117   :  { %v2839_v59 = vadd.f32 %v2607_v35, %v618_v53  ;;  %v741_v53 = vsel %vm662_vm1, %v2846_v21, 0.0 }
 0x118   :  { %v2260_v60 = vpop.f32.mrf.mxu1 }
 0x11a   :  { %715 = vadd.xlane.f32.xlu1 %v714_v3  ;;  %712 = vadd.xlane.f32.xlu0 %v711_v6  ;;  %v2836_v3 = vadd.f32 %v2607_v35, %v615_v12  ;;  %v726_v6 = vsel %vm662_vm1, %v2829_v43, 0.0  ;;  %v822_v12 = vsel %vm662_vm1, %v2839_v59, 0.0 }
 0x11e   :  { %811 = vadd.xlane.f32.xlu1 %v810_v15  ;;  %808 = vadd.xlane.f32.xlu0 %v807_v20  ;;  %v2229_v15 = vpop.f32.mrf.mxu0  ;;  %v631_v20 = vpop.f32.mrf.mxu1 }
 0x120   :  { %v2261_v32 = vpop.f32.mrf.mxu1 }
 0x122   :  { %733 = vadd.xlane.f32.xlu1 %v732_v30  ;;  %730 = vadd.xlane.f32.xlu0 %v729_v31  ;;  %v2849_v30 = vadd.f32 %v2229_v15, %v2607_v35  ;;  %v819_v31 = vsel %vm662_vm1, %v2836_v3, 0.0  ;;  %v2866_v15 = vadd.f32 %v2607_v35, %v503_v56 }
 0x124   :  { %3821 = vst [vmem:[#allocation3_spill] sm:$0xff] %v2849_v30  ;;  %v744_v40 = vsel %vm662_vm1, %v2849_v30, 0.0  ;;  %3824 = vst [vmem:[#allocation6_spill] sm:$0xff] %v2866_v15 }
 0x126   :  { %829 = vadd.xlane.f32.xlu1 %v828_v44  ;;  %826 = vadd.xlane.f32.xlu0 %v825_v52  ;;  %v2856_v44 = vadd.f32 %v2260_v60, %v2607_v35  ;;  %v2859_v52 = vadd.f32 %v2261_v32, %v2607_v35  ;;  %v634_v32 = vpop.f32.mrf.mxu1 }
 0x127   :  { %v2879_v56 = vadd.f32 %v2607_v35, %v634_v32 }
 0x128   :  { %3822 = vst [vmem:[#allocation4_spill] sm:$0xff] %v2856_v44  ;;  %3823 = vst [vmem:[#allocation5_spill] sm:$0xff] %v2859_v52  ;;  %v840_v60 = vsel %vm662_vm1, %v2859_v52, 0.0  ;;  %v2264_v30 = vpop.f32.mrf.mxu1 }
 0x12a   :  { %727 = vadd.xlane.f32.xlu1 %v726_v6  ;;  %724 = vadd.xlane.f32.xlu0 %v723_v9  ;;  %v506_v6 = vpop.f32.mrf.mxu0  ;;  %v647_v52 = vpop.f32.mrf.mxu1 }
 0x12c   :  { %v2232_v9 = vpop.f32.mrf.mxu0 }
 0x12e   :  { %823 = vadd.xlane.f32.xlu1 %v822_v12  ;;  %820 = vadd.xlane.f32.xlu0 %v819_v31  ;;  %v2869_v12 = vadd.f32 %v2607_v35, %v506_v6  ;;  %v837_v31 = vsel %vm662_vm1, %v2856_v44, 0.0  ;;  %v519_v21 = vpop.f32.mrf.mxu0  ;;  %v735_v6 = vsel %vm662_vm1, %v2866_v15, 0.0 }
 0x130   :  { %3825 = vst [vmem:[#allocation7_spill] sm:$0xff] %v2869_v12  ;;  %v2233_v44 = vpop.f32.mrf.mxu0 }
 0x132   :  { %745 = vadd.xlane.f32.xlu1 %v744_v40  ;;  %742 = vadd.xlane.f32.xlu0 %v741_v53  ;;  %v2876_v40 = vadd.f32 %v2607_v35, %v631_v20  ;;  %v738_v53 = vsel %vm662_vm1, %v2869_v12, 0.0  ;;  %v834_v20 = vsel %vm662_vm1, %v2879_v56, 0.0  ;;  %v2265_v12 = vpop.f32.mrf.mxu1  ;;  %v522_v15 = vpop.f32.mrf.mxu0 }
 0x134   :  { %3826 = vst [vmem:[#allocation8_spill] sm:$0xff] %v2876_v40  ;;  %v831_v32 = vsel %vm662_vm1, %v2876_v40, 0.0  ;;  %v2906_v40 = vadd.f32 %v2607_v35, %v519_v21 }
 0x136   :  { %841 = vadd.xlane.f32.xlu1 %v840_v60  ;;  %838 = vadd.xlane.f32.xlu0 %v837_v31  ;;  %v2886_v60 = vadd.f32 %v2232_v9, %v2607_v35  ;;  %v2889_v31 = vadd.f32 %v2233_v44, %v2607_v35  ;;  %3830 = vst [vmem:[#allocation12_spill] sm:$0xff] %v2906_v40 }
 0x138   :  { %3827 = vst [vmem:[#allocation9_spill] sm:$0xff] %v2886_v60  ;;  %v756_v9 = vsel %vm662_vm1, %v2889_v31, 0.0  ;;  %v753_v44 = vsel %vm662_vm1, %v2886_v60, 0.0  ;;  %v2916_v60 = vadd.f32 %v2607_v35, %v647_v52 }
 0x13a   :  { %739 = vadd.xlane.f32.xlu1 %v738_v53  ;;  %736 = vadd.xlane.f32.xlu0 %v735_v6  ;;  %v2896_v53 = vadd.f32 %v2264_v30, %v2607_v35  ;;  %v2899_v6 = vadd.f32 %v2265_v12, %v2607_v35 }
 0x13c   :  { %3828 = vst [vmem:[#allocation10_spill] sm:$0xff] %v2896_v53  ;;  %3829 = vst [vmem:[#allocation11_spill] sm:$0xff] %v2899_v6  ;;  %v852_v30 = vsel %vm662_vm1, %v2899_v6, 0.0  ;;  %v849_v12 = vsel %vm662_vm1, %v2896_v53, 0.0 }
 0x13e   :  { %835 = vadd.xlane.f32.xlu1 %v834_v20  ;;  %832 = vadd.xlane.f32.xlu0 %v831_v32  ;;  %v2909_v20 = vadd.f32 %v2607_v35, %v522_v15  ;;  %v650_v32 = vpop.f32.mrf.mxu1  ;;  %v747_v15 = vsel %vm662_vm1, %v2906_v40, 0.0 }
 0x140   :  { %3831 = vst [vmem:[#allocation13_spill] sm:$0xff] %v2909_v20  ;;  %v750_v21 = vsel %vm662_vm1, %v2909_v20, 0.0 }
 0x142   :  { %757 = vadd.xlane.f32.xlu1 %v756_v9  ;;  %754 = vadd.xlane.f32.xlu0 %v753_v44  ;;  %v2919_v9 = vadd.f32 %v2607_v35, %v650_v32 }
 0x144   :  { %3832 = vst [vmem:[#allocation14_spill] sm:$0xff] %v2919_v9  ;;  %v846_v44 = vsel %vm662_vm1, %v2919_v9, 0.0 }
 0x146   :  { %853 = vadd.xlane.f32.xlu1 %v852_v30  ;;  %850 = vadd.xlane.f32.xlu0 %v849_v12  ;;  %v843_v30 = vsel %vm662_vm1, %v2916_v60, 0.0 }
 0x14a   :  { %751 = vadd.xlane.f32.xlu1 %v750_v21  ;;  %748 = vadd.xlane.f32.xlu0 %v747_v15 }
 0x14e   :  { %847 = vadd.xlane.f32.xlu1 %v846_v44  ;;  %844 = vadd.xlane.f32.xlu0 %v843_v30 }
 0x15b   :  { %v767_v52 = vpop.xlane.xlu0 %766  ;;  %v671_v12 = vpop.xlane.xlu1 %670 }
 0x15c   :  { %v890_v35 = vmul.f32 0.03125, %v767_v52  ;;  %v858_v32 = vmul.f32 0.03125, %v671_v12 }
 0x15e   :  { %v2930_v53 = vsub.f32 %v2613_v39, %v890_v35  ;;  %v2933_v6 = vsub.f32 %v2610_v38, %v858_v32 }
 0x15f   :  { %v674_v21 = vpop.xlane.xlu1 %673  ;;  %v665_v15 = vpop.xlane.xlu0 %664 }
 0x160   :  { %3833 = vst [vmem:[#allocation15_spill] sm:$0xff] %v2930_v53  ;;  %v859_v40 = vmul.f32 0.03125, %v674_v21  ;;  %v856_v20 = vmul.f32 0.03125, %v665_v15  ;;  %v986_v9 = vmul.f32 %v2933_v6, %v2933_v6  ;;  %v1018_v44 = vmul.f32 %v2930_v53, %v2930_v53 }
 0x162   :  { %v2940_v30 = vsub.f32 %v2623_v47, %v859_v40  ;;  %v2943_v52 = vsub.f32 %v2616_v42, %v856_v20  ;;  %v1054_v39 = vsel %vm662_vm1, %v986_v9, 0.0  ;;  %v1150_v15 = vsel %vm662_vm1, %v1018_v44, 0.0 }
 0x163   :  { %v770_v38 = vpop.xlane.xlu1 %769  ;;  %1055 = vadd.xlane.f32.xlu0 %v1054_v39  ;;  %v761_v12 = vpop.xlane.xlu0 %760 }
 0x164   :  { %v891_v35 = vmul.f32 0.03125, %v770_v38  ;;  %v888_v32 = vmul.f32 0.03125, %v761_v12  ;;  %v987_v21 = vmul.f32 %v2940_v30, %v2940_v30  ;;  %v984_v40 = vmul.f32 %v2943_v52, %v2943_v52 }
 0x166   :  { %v2950_v53 = vsub.f32 %v2629_v50, %v891_v35  ;;  %v2953_v47 = vsub.f32 %v2626_v49, %v888_v32  ;;  %v1057_v42 = vsel %vm662_vm1, %v987_v21, 0.0  ;;  %v1048_v32 = vsel %vm662_vm1, %v984_v40, 0.0 }
 0x167   :  { %v764_v20 = vpop.xlane.xlu1 %763  ;;  %1058 = vadd.xlane.f32.xlu1 %v1057_v42  ;;  %1151 = vadd.xlane.f32.xlu0 %v1150_v15  ;;  %v668_v9 = vpop.xlane.xlu0 %667 }
 0x168   :  { %3834 = vst [vmem:[#allocation16_spill] sm:$0xff] %v2953_v47  ;;  %v889_v39 = vmul.f32 0.03125, %v764_v20  ;;  %v857_v38 = vmul.f32 0.03125, %v668_v9  ;;  %v1019_v44 = vmul.f32 %v2950_v53, %v2950_v53  ;;  %v1016_v50 = vmul.f32 %v2953_v47, %v2953_v47 }
 0x16a   :  { %v2963_v49 = vsub.f32 %v2639_v58, %v889_v39  ;;  %v2966_v12 = vsub.f32 %v2636_v57, %v857_v38  ;;  %v1153_v35 = vsel %vm662_vm1, %v1019_v44, 0.0  ;;  %v1144_v47 = vsel %vm662_vm1, %v1016_v50, 0.0 }
 0x16b   :  { %v686_v21 = vpop.xlane.xlu1 %685  ;;  %1154 = vadd.xlane.f32.xlu1 %v1153_v35  ;;  %1049 = vadd.xlane.f32.xlu0 %v1048_v32  ;;  %v683_v15 = vpop.xlane.xlu0 %682 }
 0x16c   :  { %v863_v42 = vmul.f32 0.03125, %v686_v21  ;;  %v862_v20 = vmul.f32 0.03125, %v683_v15  ;;  %v985_v9 = vmul.f32 %v2966_v12, %v2966_v12  ;;  %v1017_v40 = vmul.f32 %v2963_v49, %v2963_v49 }
 0x16e   :  { %v2974_v58 = vsub.f32 %v2649_v0, %v863_v42  ;;  %v2977_v57 = vsub.f32 %v2646_v63, %v862_v20  ;;  %v1051_v39 = vsel %vm662_vm1, %v985_v9, 0.0  ;;  %v1147_v15 = vsel %vm662_vm1, %v1017_v40, 0.0 }
 0x16f   :  { %v782_v38 = vpop.xlane.xlu1 %781  ;;  %1145 = vadd.xlane.f32.xlu0 %v1144_v47  ;;  %1052 = vadd.xlane.f32.xlu1 %v1051_v39  ;;  %v779_v44 = vpop.xlane.xlu0 %778 }
 0x170   :  { %v895_v35 = vmul.f32 0.03125, %v782_v38  ;;  %v894_v32 = vmul.f32 0.03125, %v779_v44  ;;  %v990_v50 = vmul.f32 %v2977_v57, %v2977_v57  ;;  %v991_v0 = vmul.f32 %v2974_v58, %v2974_v58 }
 0x172   :  { %v2987_v63 = vsub.f32 %v2659_v5, %v895_v35  ;;  %v2990_v21 = vsub.f32 %v2656_v4, %v894_v32  ;;  %v1066_v47 = vsel %vm662_vm1, %v990_v50, 0.0  ;;  %v1069_v44 = vsel %vm662_vm1, %v991_v0, 0.0 }
 0x173   :  { %v680_v42 = vpop.xlane.xlu1 %679  ;;  %1148 = vadd.xlane.f32.xlu1 %v1147_v15  ;;  %1067 = vadd.xlane.f32.xlu0 %v1066_v47  ;;  %v677_v20 = vpop.xlane.xlu0 %676 }
 0x174   :  { %v861_v9 = vmul.f32 0.03125, %v680_v42  ;;  %v860_v39 = vmul.f32 0.03125, %v677_v20  ;;  %v1022_v38 = vmul.f32 %v2990_v21, %v2990_v21  ;;  %v1023_v35 = vmul.f32 %v2987_v63, %v2987_v63 }
 0x176   :  { %v2998_v5 = vsub.f32 %v2669_v11, %v861_v9  ;;  %v3001_v4 = vsub.f32 %v2666_v10, %v860_v39  ;;  %v1162_v40 = vsel %vm662_vm1, %v1022_v38, 0.0  ;;  %v1165_v20 = vsel %vm662_vm1, %v1023_v35, 0.0 }
 0x177   :  { %v776_v32 = vpop.xlane.xlu1 %775  ;;  %1070 = vadd.xlane.f32.xlu1 %v1069_v44  ;;  %1163 = vadd.xlane.f32.xlu0 %v1162_v40  ;;  %v773_v50 = vpop.xlane.xlu0 %772 }
 0x178   :  { %v893_v15 = vmul.f32 0.03125, %v776_v32  ;;  %v892_v47 = vmul.f32 0.03125, %v773_v50  ;;  %v988_v0 = vmul.f32 %v3001_v4, %v3001_v4  ;;  %v989_v11 = vmul.f32 %v2998_v5, %v2998_v5 }
 0x17a   :  { %v3011_v10 = vsub.f32 %v2679_v18, %v893_v15  ;;  %v3014_v42 = vsub.f32 %v2676_v17, %v892_v47  ;;  %v1060_v9 = vsel %vm662_vm1, %v988_v0, 0.0  ;;  %v1063_v50 = vsel %vm662_vm1, %v989_v11, 0.0 }
 0x17b   :  { %v698_v39 = vpop.xlane.xlu1 %697  ;;  %1166 = vadd.xlane.f32.xlu1 %v1165_v20  ;;  %1061 = vadd.xlane.f32.xlu0 %v1060_v9  ;;  %v695_v38 = vpop.xlane.xlu0 %694 }
 0x17c   :  { %v867_v44 = vmul.f32 0.03125, %v698_v39  ;;  %v866_v40 = vmul.f32 0.03125, %v695_v38  ;;  %v1020_v32 = vmul.f32 %v3014_v42, %v3014_v42  ;;  %v1021_v15 = vmul.f32 %v3011_v10, %v3011_v10 }
 0x17e   :  { %v3022_v18 = vsub.f32 %v2689_v24, %v867_v44  ;;  %v3025_v17 = vsub.f32 %v2686_v23, %v866_v40  ;;  %v1156_v35 = vsel %vm662_vm1, %v1020_v32, 0.0  ;;  %v1159_v38 = vsel %vm662_vm1, %v1021_v15, 0.0 }
 0x17f   :  { %v794_v47 = vpop.xlane.xlu1 %793  ;;  %1064 = vadd.xlane.f32.xlu1 %v1063_v50  ;;  %1157 = vadd.xlane.f32.xlu0 %v1156_v35  ;;  %v791_v0 = vpop.xlane.xlu0 %790 }
 0x180   :  { %v899_v20 = vmul.f32 0.03125, %v794_v47  ;;  %v898_v9 = vmul.f32 0.03125, %v791_v0  ;;  %v994_v11 = vmul.f32 %v3025_v17, %v3025_v17  ;;  %v995_v24 = vmul.f32 %v3022_v18, %v3022_v18 }
 0x182   :  { %v3035_v23 = vsub.f32 %v2699_v29, %v899_v20  ;;  %v3038_v39 = vsub.f32 %v2696_v28, %v898_v9  ;;  %v1078_v44 = vsel %vm662_vm1, %v994_v11, 0.0  ;;  %v1081_v0 = vsel %vm662_vm1, %v995_v24, 0.0 }
 0x183   :  { %v692_v40 = vpop.xlane.xlu1 %691  ;;  %1160 = vadd.xlane.f32.xlu1 %v1159_v38  ;;  %1079 = vadd.xlane.f32.xlu0 %v1078_v44  ;;  %v689_v32 = vpop.xlane.xlu0 %688 }
 0x184   :  { %v865_v50 = vmul.f32 0.03125, %v692_v40  ;;  %v864_v35 = vmul.f32 0.03125, %v689_v32  ;;  %v1026_v47 = vmul.f32 %v3038_v39, %v3038_v39  ;;  %v1027_v20 = vmul.f32 %v3035_v23, %v3035_v23 }
 0x186   :  { %v3046_v29 = vsub.f32 %v2709_v36, %v865_v50  ;;  %v3049_v28 = vsub.f32 %v2706_v34, %v864_v35  ;;  %v1174_v15 = vsel %vm662_vm1, %v1026_v47, 0.0  ;;  %v1177_v32 = vsel %vm662_vm1, %v1027_v20, 0.0 }
 0x187   :  { %v788_v9 = vpop.xlane.xlu1 %787  ;;  %1082 = vadd.xlane.f32.xlu1 %v1081_v0  ;;  %1175 = vadd.xlane.f32.xlu0 %v1174_v15  ;;  %v785_v11 = vpop.xlane.xlu0 %784 }
 0x188   :  { %v897_v38 = vmul.f32 0.03125, %v788_v9  ;;  %v896_v44 = vmul.f32 0.03125, %v785_v11  ;;  %v992_v24 = vmul.f32 %v3049_v28, %v3049_v28  ;;  %v993_v36 = vmul.f32 %v3046_v29, %v3046_v29 }
 0x18a   :  { %v3059_v34 = vsub.f32 %v2719_v46, %v897_v38  ;;  %v3062_v40 = vsub.f32 %v2716_v45, %v896_v44  ;;  %v1072_v50 = vsel %vm662_vm1, %v992_v24, 0.0  ;;  %v1075_v11 = vsel %vm662_vm1, %v993_v36, 0.0 }
 0x18b   :  { %v710_v35 = vpop.xlane.xlu1 %709  ;;  %1178 = vadd.xlane.f32.xlu1 %v1177_v32  ;;  %1073 = vadd.xlane.f32.xlu0 %v1072_v50  ;;  %v707_v47 = vpop.xlane.xlu0 %706 }
 0x18c   :  { %v871_v0 = vmul.f32 0.03125, %v710_v35  ;;  %v870_v15 = vmul.f32 0.03125, %v707_v47  ;;  %v1024_v9 = vmul.f32 %v3062_v40, %v3062_v40  ;;  %v1025_v38 = vmul.f32 %v3059_v34, %v3059_v34 }
 0x18e   :  { %v3070_v46 = vsub.f32 %v2729_v55, %v871_v0  ;;  %v3073_v45 = vsub.f32 %v2726_v54, %v870_v15  ;;  %v1168_v20 = vsel %vm662_vm1, %v1024_v9, 0.0  ;;  %v1171_v47 = vsel %vm662_vm1, %v1025_v38, 0.0 }
 0x18f   :  { %v806_v44 = vpop.xlane.xlu1 %805  ;;  %1076 = vadd.xlane.f32.xlu1 %v1075_v11  ;;  %1169 = vadd.xlane.f32.xlu0 %v1168_v20  ;;  %v803_v24 = vpop.xlane.xlu0 %802 }
 0x190   :  { %v903_v32 = vmul.f32 0.03125, %v806_v44  ;;  %v902_v50 = vmul.f32 0.03125, %v803_v24  ;;  %v998_v36 = vmul.f32 %v3073_v45, %v3073_v45  ;;  %v999_v55 = vmul.f32 %v3070_v46, %v3070_v46 }
 0x192   :  { %v3083_v54 = vsub.f32 %v2739_v62, %v903_v32  ;;  %v3086_v35 = vsub.f32 %v2736_v61, %v902_v50  ;;  %v1090_v0 = vsel %vm662_vm1, %v998_v36, 0.0  ;;  %v1093_v24 = vsel %vm662_vm1, %v999_v55, 0.0 }
 0x193   :  { %v704_v15 = vpop.xlane.xlu1 %703  ;;  %1172 = vadd.xlane.f32.xlu1 %v1171_v47  ;;  %1091 = vadd.xlane.f32.xlu0 %v1090_v0  ;;  %v701_v9 = vpop.xlane.xlu0 %700 }
 0x194   :  { %v869_v11 = vmul.f32 0.03125, %v704_v15  ;;  %v868_v20 = vmul.f32 0.03125, %v701_v9  ;;  %v1030_v44 = vmul.f32 %v3086_v35, %v3086_v35  ;;  %v1031_v32 = vmul.f32 %v3083_v54, %v3083_v54 }
 0x196   :  { %v3094_v62 = vsub.f32 %v2749_v8, %v869_v11  ;;  %v3097_v61 = vsub.f32 %v2746_v7, %v868_v20  ;;  %v1186_v38 = vsel %vm662_vm1, %v1030_v44, 0.0  ;;  %v1189_v9 = vsel %vm662_vm1, %v1031_v32, 0.0 }
 0x197   :  { %v800_v50 = vpop.xlane.xlu1 %799  ;;  %1094 = vadd.xlane.f32.xlu1 %v1093_v24  ;;  %1187 = vadd.xlane.f32.xlu0 %v1186_v38  ;;  %v797_v36 = vpop.xlane.xlu0 %796 }
 0x198   :  { %v901_v47 = vmul.f32 0.03125, %v800_v50  ;;  %v900_v0 = vmul.f32 0.03125, %v797_v36  ;;  %v996_v55 = vmul.f32 %v3097_v61, %v3097_v61  ;;  %v997_v8 = vmul.f32 %v3094_v62, %v3094_v62 }
 0x19a   :  { %v3107_v7 = vsub.f32 %v2759_v19, %v901_v47  ;;  %v3110_v15 = vsub.f32 %v2756_v16, %v900_v0  ;;  %v1084_v11 = vsel %vm662_vm1, %v996_v55, 0.0  ;;  %v1087_v36 = vsel %vm662_vm1, %v997_v8, 0.0 }
 0x19b   :  { %v722_v20 = vpop.xlane.xlu1 %721  ;;  %1190 = vadd.xlane.f32.xlu1 %v1189_v9  ;;  %1085 = vadd.xlane.f32.xlu0 %v1084_v11  ;;  %v719_v44 = vpop.xlane.xlu0 %718 }
 0x19c   :  { %v875_v24 = vmul.f32 0.03125, %v722_v20  ;;  %v874_v38 = vmul.f32 0.03125, %v719_v44  ;;  %v1028_v50 = vmul.f32 %v3110_v15, %v3110_v15  ;;  %v1029_v47 = vmul.f32 %v3107_v7, %v3107_v7 }
 0x19e   :  { %v3118_v19 = vsub.f32 %v2769_v27, %v875_v24  ;;  %v3121_v16 = vsub.f32 %v2766_v26, %v874_v38  ;;  %v1180_v32 = vsel %vm662_vm1, %v1028_v50, 0.0  ;;  %v1183_v44 = vsel %vm662_vm1, %v1029_v47, 0.0 }
 0x19f   :  { %v818_v0 = vpop.xlane.xlu1 %817  ;;  %1088 = vadd.xlane.f32.xlu1 %v1087_v36  ;;  %1181 = vadd.xlane.f32.xlu0 %v1180_v32  ;;  %v815_v55 = vpop.xlane.xlu0 %814 }
 0x1a0   :  { %v907_v9 = vmul.f32 0.03125, %v818_v0  ;;  %v906_v11 = vmul.f32 0.03125, %v815_v55  ;;  %v1002_v8 = vmul.f32 %v3121_v16, %v3121_v16  ;;  %v1003_v27 = vmul.f32 %v3118_v19, %v3118_v19 }
 0x1a2   :  { %v3131_v26 = vsub.f32 %v2779_v37, %v907_v9  ;;  %v3134_v20 = vsub.f32 %v2776_v33, %v906_v11  ;;  %v1102_v24 = vsel %vm662_vm1, %v1002_v8, 0.0  ;;  %v1105_v55 = vsel %vm662_vm1, %v1003_v27, 0.0 }
 0x1a3   :  { %v716_v38 = vpop.xlane.xlu1 %715  ;;  %1184 = vadd.xlane.f32.xlu1 %v1183_v44  ;;  %1103 = vadd.xlane.f32.xlu0 %v1102_v24  ;;  %v713_v50 = vpop.xlane.xlu0 %712 }
 0x1a4   :  { %v873_v36 = vmul.f32 0.03125, %v716_v38  ;;  %v872_v32 = vmul.f32 0.03125, %v713_v50  ;;  %v1034_v0 = vmul.f32 %v3134_v20, %v3134_v20  ;;  %v1035_v9 = vmul.f32 %v3131_v26, %v3131_v26 }
 0x1a6   :  { %v3142_v37 = vsub.f32 %v2789_v51, %v873_v36  ;;  %v3145_v33 = vsub.f32 %v2786_v48, %v872_v32  ;;  %v1198_v47 = vsel %vm662_vm1, %v1034_v0, 0.0  ;;  %v1201_v50 = vsel %vm662_vm1, %v1035_v9, 0.0 }
 0x1a7   :  { %v812_v11 = vpop.xlane.xlu1 %811  ;;  %1106 = vadd.xlane.f32.xlu1 %v1105_v55  ;;  %1199 = vadd.xlane.f32.xlu0 %v1198_v47  ;;  %v809_v8 = vpop.xlane.xlu0 %808 }
 0x1a8   :  { %v905_v44 = vmul.f32 0.03125, %v812_v11  ;;  %v904_v24 = vmul.f32 0.03125, %v809_v8  ;;  %v1000_v27 = vmul.f32 %v3145_v33, %v3145_v33  ;;  %v1001_v51 = vmul.f32 %v3142_v37, %v3142_v37 }
 0x1aa   :  { %v3155_v48 = vsub.f32 %v2799_v2, %v905_v44  ;;  %v3158_v38 = vsub.f32 %v2796_v1, %v904_v24  ;;  %v1096_v36 = vsel %vm662_vm1, %v1000_v27, 0.0  ;;  %v1099_v8 = vsel %vm662_vm1, %v1001_v51, 0.0 }
 0x1ab   :  { %v734_v32 = vpop.xlane.xlu1 %733  ;;  %1202 = vadd.xlane.f32.xlu1 %v1201_v50  ;;  %1097 = vadd.xlane.f32.xlu0 %v1096_v36  ;;  %v731_v0 = vpop.xlane.xlu0 %730 }
 0x1ac   :  { %v879_v55 = vmul.f32 0.03125, %v734_v32  ;;  %v878_v47 = vmul.f32 0.03125, %v731_v0  ;;  %v1032_v11 = vmul.f32 %v3158_v38, %v3158_v38  ;;  %v1033_v44 = vmul.f32 %v3155_v48, %v3155_v48 }
 0x1ae   :  { %v3166_v2 = vsub.f32 %v2809_v14, %v879_v55  ;;  %v3169_v1 = vsub.f32 %v2806_v13, %v878_v47  ;;  %v1192_v9 = vsel %vm662_vm1, %v1032_v11, 0.0  ;;  %v1195_v0 = vsel %vm662_vm1, %v1033_v44, 0.0 }
 0x1af   :  { %v830_v24 = vpop.xlane.xlu1 %829  ;;  %1100 = vadd.xlane.f32.xlu1 %v1099_v8  ;;  %1193 = vadd.xlane.f32.xlu0 %v1192_v9  ;;  %v827_v27 = vpop.xlane.xlu0 %826 }
 0x1b0   :  { %v911_v50 = vmul.f32 0.03125, %v830_v24  ;;  %v910_v36 = vmul.f32 0.03125, %v827_v27  ;;  %v1006_v51 = vmul.f32 %v3169_v1, %v3169_v1  ;;  %v1007_v14 = vmul.f32 %v3166_v2, %v3166_v2 }
 0x1b2   :  { %v3179_v13 = vsub.f32 %v2819_v25, %v911_v50  ;;  %v3182_v32 = vsub.f32 %v2816_v22, %v910_v36  ;;  %v1114_v55 = vsel %vm662_vm1, %v1006_v51, 0.0  ;;  %v1117_v27 = vsel %vm662_vm1, %v1007_v14, 0.0 }
 0x1b3   :  { %v728_v47 = vpop.xlane.xlu1 %727  ;;  %1196 = vadd.xlane.f32.xlu1 %v1195_v0  ;;  %1115 = vadd.xlane.f32.xlu0 %v1114_v55  ;;  %v725_v11 = vpop.xlane.xlu0 %724 }
 0x1b4   :  { %v877_v8 = vmul.f32 0.03125, %v728_v47  ;;  %v876_v9 = vmul.f32 0.03125, %v725_v11  ;;  %v1038_v24 = vmul.f32 %v3182_v32, %v3182_v32  ;;  %v1039_v50 = vmul.f32 %v3179_v13, %v3179_v13 }
 0x1b6   :  { %v3190_v25 = vsub.f32 %v2829_v43, %v877_v8  ;;  %v3193_v22 = vsub.f32 %v2826_v41, %v876_v9  ;;  %v1210_v44 = vsel %vm662_vm1, %v1038_v24, 0.0  ;;  %v1213_v11 = vsel %vm662_vm1, %v1039_v50, 0.0 }
 0x1b7   :  { %v824_v36 = vpop.xlane.xlu1 %823  ;;  %1118 = vadd.xlane.f32.xlu1 %v1117_v27  ;;  %1211 = vadd.xlane.f32.xlu0 %v1210_v44  ;;  %v821_v51 = vpop.xlane.xlu0 %820 }
 0x1b8   :  { %3835 = vst [vmem:[#allocation17_spill] sm:$0xff] %v3190_v25  ;;  %v909_v0 = vmul.f32 0.03125, %v824_v36  ;;  %v908_v55 = vmul.f32 0.03125, %v821_v51  ;;  %v1004_v14 = vmul.f32 %v3193_v22, %v3193_v22  ;;  %v1005_v43 = vmul.f32 %v3190_v25, %v3190_v25 }
 0x1ba   :  { %v3203_v41 = vsub.f32 %v2839_v59, %v909_v0  ;;  %v3206_v47 = vsub.f32 %v2836_v3, %v908_v55  ;;  %v1108_v8 = vsel %vm662_vm1, %v1004_v14, 0.0  ;;  %v1111_v51 = vsel %vm662_vm1, %v1005_v43, 0.0  ;;  %v3838_v59 = vld [vmem:[#allocation3_spill] sm:$0xff]  ;;  %v3840_v3 = vld [vmem:[#allocation2_spill] sm:$0xff] }
 0x1bb   :  { %v746_v9 = vpop.xlane.xlu1 %745  ;;  %1214 = vadd.xlane.f32.xlu1 %v1213_v11  ;;  %1109 = vadd.xlane.f32.xlu0 %v1108_v8  ;;  %v743_v24 = vpop.xlane.xlu0 %742 }
 0x1bc   :  { %3836 = vst [vmem:[#allocation18_spill] sm:$0xff] %v3203_v41  ;;  %3837 = vst [vmem:[#allocation19_spill] sm:$0xff] %v3206_v47  ;;  %v883_v27 = vmul.f32 0.03125, %v746_v9  ;;  %v882_v44 = vmul.f32 0.03125, %v743_v24  ;;  %v1036_v36 = vmul.f32 %v3206_v47, %v3206_v47  ;;  %v1037_v14 = vmul.f32 %v3203_v41, %v3203_v41 }
 0x1be   :  { %v3214_v0 = vsub.f32 %v3838_v59, %v883_v27  ;;  %v3217_v55 = vsub.f32 %v3840_v3, %v882_v44  ;;  %v1204_v50 = vsel %vm662_vm1, %v1036_v36, 0.0  ;;  %v3842_v59 = vld [vmem:[#allocation5_spill] sm:$0xff]  ;;  %v3844_v3 = vld [vmem:[#allocation4_spill] sm:$0xff]  ;;  %v1207_v41 = vsel %vm662_vm1, %v1037_v14, 0.0 }
 0x1bf   :  { %v842_v11 = vpop.xlane.xlu1 %841  ;;  %1112 = vadd.xlane.f32.xlu1 %v1111_v51  ;;  %1205 = vadd.xlane.f32.xlu0 %v1204_v50  ;;  %v839_v8 = vpop.xlane.xlu0 %838 }
 0x1c0   :  { %3839 = vst [vmem:[#allocation3_spill] sm:$0xff] %v3214_v0  ;;  %3841 = vst [vmem:[#allocation2_spill] sm:$0xff] %v3217_v55  ;;  %v915_v9 = vmul.f32 0.03125, %v842_v11  ;;  %v914_v24 = vmul.f32 0.03125, %v839_v8  ;;  %v1010_v43 = vmul.f32 %v3217_v55, %v3217_v55  ;;  %v1011_v27 = vmul.f32 %v3214_v0, %v3214_v0 }
 0x1c2   :  { %v3227_v44 = vsub.f32 %v3842_v59, %v915_v9  ;;  %v3230_v36 = vsub.f32 %v3844_v3, %v914_v24  ;;  %v1126_v51 = vsel %vm662_vm1, %v1010_v43, 0.0  ;;  %v1129_v0 = vsel %vm662_vm1, %v1011_v27, 0.0  ;;  %v3846_v9 = vld [vmem:[#allocation7_spill] sm:$0xff]  ;;  %v3848_v24 = vld [vmem:[#allocation6_spill] sm:$0xff] }
 0x1c3   :  { %v740_v50 = vpop.xlane.xlu1 %739  ;;  %1208 = vadd.xlane.f32.xlu1 %v1207_v41  ;;  %1127 = vadd.xlane.f32.xlu0 %v1126_v51  ;;  %v737_v11 = vpop.xlane.xlu0 %736 }
 0x1c4   :  { %3843 = vst [vmem:[#allocation5_spill] sm:$0xff] %v3227_v44  ;;  %3845 = vst [vmem:[#allocation4_spill] sm:$0xff] %v3230_v36  ;;  %v881_v8 = vmul.f32 0.03125, %v740_v50  ;;  %v880_v47 = vmul.f32 0.03125, %v737_v11  ;;  %v1042_v55 = vmul.f32 %v3230_v36, %v3230_v36  ;;  %v1043_v41 = vmul.f32 %v3227_v44, %v3227_v44 }
 0x1c6   :  { %v3238_v59 = vsub.f32 %v3846_v9, %v881_v8  ;;  %v3241_v3 = vsub.f32 %v3848_v24, %v880_v47  ;;  %v1222_v14 = vsel %vm662_vm1, %v1042_v55, 0.0  ;;  %v3851_v9 = vld [vmem:[#allocation8_spill] sm:$0xff]  ;;  %v1225_v24 = vsel %vm662_vm1, %v1043_v41, 0.0 }
 0x1c7   :  { %v836_v43 = vpop.xlane.xlu1 %835  ;;  %1130 = vadd.xlane.f32.xlu1 %v1129_v0  ;;  %1223 = vadd.xlane.f32.xlu0 %v1222_v14  ;;  %v833_v51 = vpop.xlane.xlu0 %832 }
 0x1c8   :  { %3847 = vst [vmem:[#allocation7_spill] sm:$0xff] %v3238_v59  ;;  %3849 = vst [vmem:[#allocation6_spill] sm:$0xff] %v3241_v3  ;;  %v913_v50 = vmul.f32 0.03125, %v836_v43  ;;  %v912_v11 = vmul.f32 0.03125, %v833_v51  ;;  %v1008_v27 = vmul.f32 %v3241_v3, %v3241_v3  ;;  %v1009_v8 = vmul.f32 %v3238_v59, %v3238_v59 }
 0x1ca   :  { %v3251_v47 = vsub.f32 %v2879_v56, %v913_v50  ;;  %v3254_v55 = vsub.f32 %v3851_v9, %v912_v11  ;;  %v1120_v0 = vsel %vm662_vm1, %v1008_v27, 0.0  ;;  %v1123_v59 = vsel %vm662_vm1, %v1009_v8, 0.0  ;;  %v3854_v50 = vld [vmem:[#allocation9_spill] sm:$0xff] }
 0x1cb   :  { %v758_v14 = vpop.xlane.xlu1 %757  ;;  %1226 = vadd.xlane.f32.xlu1 %v1225_v24  ;;  %1121 = vadd.xlane.f32.xlu0 %v1120_v0  ;;  %v755_v43 = vpop.xlane.xlu0 %754 }
 0x1cc   :  { %3850 = vst [vmem:[#allocation20_spill] sm:$0xff] %v3251_v47  ;;  %3852 = vst [vmem:[#allocation8_spill] sm:$0xff] %v3254_v55  ;;  %v887_v51 = vmul.f32 0.03125, %v758_v14  ;;  %v886_v44 = vmul.f32 0.03125, %v755_v43  ;;  %v1040_v3 = vmul.f32 %v3254_v55, %v3254_v55  ;;  %v1041_v27 = vmul.f32 %v3251_v47, %v3251_v47  ;;  %v3857_v55 = vld [vmem:[#allocation12_spill] sm:$0xff] }
 0x1ce   :  { %v3262_v56 = vsub.f32 %v2889_v31, %v887_v51  ;;  %v3265_v11 = vsub.f32 %v3854_v50, %v886_v44  ;;  %v1216_v41 = vsel %vm662_vm1, %v1040_v3, 0.0  ;;  %v1219_v8 = vsel %vm662_vm1, %v1041_v27, 0.0 }
 0x1cf   :  { %v854_v9 = vpop.xlane.xlu1 %853  ;;  %1124 = vadd.xlane.f32.xlu1 %v1123_v59  ;;  %1217 = vadd.xlane.f32.xlu0 %v1216_v41  ;;  %v851_v24 = vpop.xlane.xlu0 %850  ;;  %v3856_v41 = vld [vmem:[#allocation13_spill] sm:$0xff] }
 0x1d0   :  { %3853 = vst [vmem:[#allocation21_spill] sm:$0xff] %v3262_v56  ;;  %3855 = vst [vmem:[#allocation9_spill] sm:$0xff] %v3265_v11  ;;  %v1014_v0 = vmul.f32 %v3265_v11, %v3265_v11  ;;  %v1015_v44 = vmul.f32 %v3262_v56, %v3262_v56  ;;  %v919_v50 = vmul.f32 0.03125, %v854_v9  ;;  %v918_v59 = vmul.f32 0.03125, %v851_v24  ;;  %v3859_v24 = vld [vmem:[#allocation11_spill] sm:$0xff] }
 0x1d2   :  { %v1138_v31 = vsel %vm662_vm1, %v1014_v0, 0.0  ;;  %v1141_v27 = vsel %vm662_vm1, %v1015_v44, 0.0 }
 0x1d3   :  { %v752_v14 = vpop.xlane.xlu1 %751  ;;  %1220 = vadd.xlane.f32.xlu1 %v1219_v8  ;;  %1139 = vadd.xlane.f32.xlu0 %v1138_v31  ;;  %v749_v3 = vpop.xlane.xlu0 %748  ;;  %v3288_v31 = vsub.f32 %v3859_v24, %v919_v50 }
 0x1d4   :  { %v885_v43 = vmul.f32 0.03125, %v752_v14  ;;  %v884_v51 = vmul.f32 0.03125, %v749_v3  ;;  %v3861_v14 = vld [vmem:[#allocation10_spill] sm:$0xff] }
 0x1d5   :  { %3860 = vst [vmem:[#allocation12_spill] sm:$0xff] %v3288_v31  ;;  %v3291_v3 = vsub.f32 %v3861_v14, %v918_v59 }
 0x1d6   :  { %v3277_v47 = vsub.f32 %v3856_v41, %v885_v43  ;;  %v3280_v11 = vsub.f32 %v3857_v55, %v884_v51  ;;  %v3863_v55 = vld [vmem:[#allocation14_spill] sm:$0xff] }
 0x1d7   :  { %v848_v0 = vpop.xlane.xlu1 %847  ;;  %1142 = vadd.xlane.f32.xlu1 %v1141_v27  ;;  %v845_v36 = vpop.xlane.xlu0 %844  ;;  %3862 = vst [vmem:[#allocation11_spill] sm:$0xff] %v3291_v3 }
 0x1d8   :  { %3858 = vst [vmem:[#allocation13_spill] sm:$0xff] %v3280_v11  ;;  %v917_v56 = vmul.f32 0.03125, %v848_v0  ;;  %v916_v25 = vmul.f32 0.03125, %v845_v36  ;;  %v1013_v8 = vmul.f32 %v3277_v47, %v3277_v47  ;;  %v1012_v9 = vmul.f32 %v3280_v11, %v3280_v11 }
 0x1da   :  { %v3294_v43 = vsub.f32 %v3863_v55, %v917_v56  ;;  %v3297_v44 = vsub.f32 %v2916_v60, %v916_v25  ;;  %v1135_v36 = vsel %vm662_vm1, %v1013_v8, 0.0  ;;  %v1132_v51 = vsel %vm662_vm1, %v1012_v9, 0.0 }
 0x1db   :  { %1136 = vadd.xlane.f32.xlu1 %v1135_v36  ;;  %1133 = vadd.xlane.f32.xlu0 %v1132_v51  ;;  %v1047_v60 = vmul.f32 %v3288_v31, %v3288_v31  ;;  %v1046_v25 = vmul.f32 %v3291_v3, %v3291_v3 }
 0x1dc   :  { %3864 = vst [vmem:[#allocation10_spill] sm:$0xff] %v3294_v43  ;;  %3865 = vst [vmem:[#allocation14_spill] sm:$0xff] %v3297_v44  ;;  %v1045_v41 = vmul.f32 %v3294_v43, %v3294_v43  ;;  %v1044_v50 = vmul.f32 %v3297_v44, %v3297_v44 }
 0x1dd   :  { %v1237_v27 = vsel %vm662_vm1, %v1047_v60, 0.0  ;;  %v1234_v0 = vsel %vm662_vm1, %v1046_v25, 0.0 }
 0x1de   :  { %v1231_v59 = vsel %vm662_vm1, %v1045_v41, 0.0  ;;  %v1228_v56 = vsel %vm662_vm1, %v1044_v50, 0.0 }
 0x1df   :  { %1232 = vadd.xlane.f32.xlu1 %v1231_v59  ;;  %1229 = vadd.xlane.f32.xlu0 %v1228_v56 }
 0x1e3   :  { %1238 = vadd.xlane.f32.xlu1 %v1237_v27  ;;  %1235 = vadd.xlane.f32.xlu0 %v1234_v0 }
 0x1ec   :  { %v1056_v8 = vpop.xlane.xlu0 %1055 }
 0x1ed   :  { %v1242_v9 = vmul.f32 0.03125, %v1056_v8 }
 0x1ef   :  { %v1306_v24 = vadd.f32 1e-05, %v1242_v9 }
 0x1f0   :  { %v1059_v14 = vpop.xlane.xlu1 %1058  ;;  %v1152_v55 = vpop.xlane.xlu0 %1151 }
 0x1f1   :  { %2307 = vrsqrt.f32 %v1306_v24  ;;  %v1243_v36 = vmul.f32 0.03125, %v1059_v14  ;;  %v1274_v51 = vmul.f32 0.03125, %v1152_v55 }
 0x1f3   :  { %v1307_v41 = vadd.f32 1e-05, %v1243_v36  ;;  %v1338_v50 = vadd.f32 1e-05, %v1274_v51 }
 0x1f4   :  { %v1155_v31 = vpop.xlane.xlu1 %1154  ;;  %v1050_v3 = vpop.xlane.xlu0 %1049 }
 0x1f5   :  { %2309 = vrsqrt.f32 %v1307_v41  ;;  %v1275_v59 = vmul.f32 0.03125, %v1155_v31  ;;  %v1240_v56 = vmul.f32 0.03125, %v1050_v3  ;;  %v3316_v31 = vld [vmem:[%s3784_s3] ss:$0 sm:$0xff] }
 0x1f6   :  { %2311 = vrsqrt.f32 %v1338_v50 }
 0x1f7   :  { %v1339_v60 = vadd.f32 1e-05, %v1275_v59  ;;  %v1304_v25 = vadd.f32 1e-05, %v1240_v56  ;;  %v3322_v59 = vld [vmem:[%s3785_s4] ss:$0 sm:$0xff] }
 0x1f8   :  { %v1053_v27 = vpop.xlane.xlu1 %1052  ;;  %v1146_v0 = vpop.xlane.xlu0 %1145 }
 0x1f9   :  { %2313 = vrsqrt.f32 %v1339_v60  ;;  %v1241_v8 = vmul.f32 0.03125, %v1053_v27  ;;  %v1272_v9 = vmul.f32 0.03125, %v1146_v0 }
 0x1fa   :  { %2315 = vrsqrt.f32 %v1304_v25 }
 0x1fb   :  { %v1305_v44 = vadd.f32 1e-05, %v1241_v8  ;;  %v1336_v24 = vadd.f32 1e-05, %v1272_v9 }
 0x1fc   :  { %v1149_v14 = vpop.xlane.xlu1 %1148  ;;  %v1068_v55 = vpop.xlane.xlu0 %1067 }
 0x1fd   :  { %2317 = vrsqrt.f32 %v1305_v44  ;;  %v1273_v36 = vmul.f32 0.03125, %v1149_v14  ;;  %v1246_v51 = vmul.f32 0.03125, %v1068_v55  ;;  %v3866_v14 = vld [vmem:[#allocation15_spill] sm:$0xff] }
 0x1fe   :  { %v2308_v43 = vpop.eup %2307  ;;  %2319 = vrsqrt.f32 %v1336_v24 }
 0x1ff   :  { %v1434_v3 = vmul.f32 %v2308_v43, %v2933_v6  ;;  %v1337_v41 = vadd.f32 1e-05, %v1273_v36  ;;  %v1310_v50 = vadd.f32 1e-05, %v1246_v51 }
 0x200   :  { %v1071_v56 = vpop.xlane.xlu1 %1070  ;;  %v1164_v44 = vpop.xlane.xlu0 %1163 }
 0x201   :  { %v1505_v60 = vmul.f32 %v3316_v31, %v1434_v3  ;;  %2321 = vrsqrt.f32 %v1337_v41  ;;  %v1247_v25 = vmul.f32 0.03125, %v1071_v56  ;;  %v1278_v27 = vmul.f32 0.03125, %v1164_v44 }
 0x202   :  { %v2310_v0 = vpop.eup %2309  ;;  %2323 = vrsqrt.f32 %v1310_v50 }
 0x203   :  { %v2312_v8 = vpop.eup %2311  ;;  %v1576_v9 = vadd.f32 %v3322_v59, %v1505_v60  ;;  %v1435_v6 = vmul.f32 %v2310_v0, %v2940_v30  ;;  %v1311_v43 = vadd.f32 1e-05, %v1247_v25  ;;  %v1342_v24 = vadd.f32 1e-05, %v1278_v27 }
 0x204   :  { %v1466_v55 = vmul.f32 %v2312_v8, %v3866_v14  ;;  %v1167_v36 = vpop.xlane.xlu1 %1166  ;;  %v1062_v51 = vpop.xlane.xlu0 %1061 }
 0x205   :  { %v2099_v11 = vpack.c.bf16 %v1576_v9, %v1576_v9  ;;  %v1506_v3 = vmul.f32 %v3316_v31, %v1435_v6  ;;  %2325 = vrsqrt.f32 %v1311_v43  ;;  %v1279_v41 = vmul.f32 0.03125, %v1167_v36 }
 0x206   :  { %v2314_v56 = vpop.eup %2313  ;;  %v1537_v50 = vmul.f32 %v3316_v31, %v1466_v55  ;;  %2327 = vrsqrt.f32 %v1342_v24  ;;  %v1244_v44 = vmul.f32 0.03125, %v1062_v51 }
 0x207   :  { %v2316_v60 = vpop.eup %2315  ;;  %1897 = vst.msk [vmem:[%s3786_s5 + $0x8] sm:$0xf] %vm1894_vm2, %v2099_v11  ;;  %v1577_v30 = vadd.f32 %v3322_v59, %v1506_v3  ;;  %v1467_v25 = vmul.f32 %v2314_v56, %v2950_v53  ;;  %v1343_v27 = vadd.f32 1e-05, %v1279_v41 }
 0x208   :  { %v1608_v0 = vadd.f32 %v3322_v59, %v1537_v50  ;;  %v1432_v8 = vmul.f32 %v2316_v60, %v2943_v52  ;;  %v1308_v9 = vadd.f32 1e-05, %v1244_v44  ;;  %v1065_v6 = vpop.xlane.xlu1 %1064  ;;  %v1158_v43 = vpop.xlane.xlu0 %1157  ;;  %v3867_v44 = vld [vmem:[#allocation16_spill] sm:$0xff] }
 0x209   :  { %v2100_v24 = vpack.c.bf16 %v1577_v30, %v1577_v30  ;;  %v1538_v14 = vmul.f32 %v3316_v31, %v1467_v25  ;;  %2329 = vrsqrt.f32 %v1343_v27  ;;  %v1245_v55 = vmul.f32 0.03125, %v1065_v6 }
 0x20a   :  { %v2318_v36 = vpop.eup %2317  ;;  %v2131_v51 = vpack.c.bf16 %v1608_v0, %v1608_v0  ;;  %v1503_v11 = vmul.f32 %v3316_v31, %v1432_v8  ;;  %2331 = vrsqrt.f32 %v1308_v9  ;;  %v1276_v3 = vmul.f32 0.03125, %v1158_v43 }
 0x20b   :  { %v2320_v53 = vpop.eup %2319  ;;  %1898 = vst.msk [vmem:[%s3786_s5 + $0xc] sm:$0xf] %vm1894_vm2, %v2100_v24  ;;  %v1609_v52 = vadd.f32 %v3322_v59, %v1538_v14  ;;  %v1433_v41 = vmul.f32 %v2318_v36, %v2966_v12  ;;  %v1309_v56 = vadd.f32 1e-05, %v1245_v55 }
 0x20c   :  { %1929 = vst.msk [vmem:[%s3786_s5 + $0x88] sm:$0xf] %vm1894_vm2, %v2131_v51  ;;  %v1574_v50 = vadd.f32 %v3322_v59, %v1503_v11  ;;  %v1464_v60 = vmul.f32 %v2320_v53, %v3867_v44  ;;  %v1340_v30 = vadd.f32 1e-05, %v1276_v3  ;;  %v1161_v25 = vpop.xlane.xlu1 %1160  ;;  %v1080_v27 = vpop.xlane.xlu0 %1079 }
 0x20d   :  { %v2132_v0 = vpack.c.bf16 %v1609_v52, %v1609_v52  ;;  %v1504_v8 = vmul.f32 %v3316_v31, %v1433_v41  ;;  %2333 = vrsqrt.f32 %v1309_v56  ;;  %v1277_v9 = vmul.f32 0.03125, %v1161_v25 }
 0x20e   :  { %v2322_v6 = vpop.eup %2321  ;;  %v2097_v12 = vpack.c.bf16 %v1574_v50, %v1574_v50  ;;  %v1535_v43 = vmul.f32 %v3316_v31, %v1464_v60  ;;  %2335 = vrsqrt.f32 %v1340_v30  ;;  %v1250_v24 = vmul.f32 0.03125, %v1080_v27 }
 0x20f   :  { %v2324_v14 = vpop.eup %2323  ;;  %1930 = vst.msk [vmem:[%s3786_s5 + $0x8c] sm:$0xf] %vm1894_vm2, %v2132_v0  ;;  %v1575_v55 = vadd.f32 %v3322_v59, %v1504_v8  ;;  %v1465_v36 = vmul.f32 %v2322_v6, %v2963_v49  ;;  %v1341_v51 = vadd.f32 1e-05, %v1277_v9 }
 0x210   :  { %1895 = vst.msk [vmem:[%s3786_s5] sm:$0xf] %vm1894_vm2, %v2097_v12  ;;  %v1606_v11 = vadd.f32 %v3322_v59, %v1535_v43  ;;  %v1438_v3 = vmul.f32 %v2324_v14, %v2977_v57  ;;  %v1314_v53 = vadd.f32 1e-05, %v1250_v24  ;;  %v1083_v52 = vpop.xlane.xlu1 %1082  ;;  %v1176_v41 = vpop.xlane.xlu0 %1175 }
 0x211   :  { %v2098_v56 = vpack.c.bf16 %v1575_v55, %v1575_v55  ;;  %v1536_v50 = vmul.f32 %v3316_v31, %v1465_v36  ;;  %2337 = vrsqrt.f32 %v1341_v51  ;;  %v1251_v44 = vmul.f32 0.03125, %v1083_v52 }
 0x212   :  { %v2326_v60 = vpop.eup %2325  ;;  %v2129_v49 = vpack.c.bf16 %v1606_v11, %v1606_v11  ;;  %v1509_v30 = vmul.f32 %v3316_v31, %v1438_v3  ;;  %2339 = vrsqrt.f32 %v1314_v53  ;;  %v1282_v25 = vmul.f32 0.03125, %v1176_v41 }
 0x213   :  { %v2328_v27 = vpop.eup %2327  ;;  %1896 = vst.msk [vmem:[%s3786_s5 + $0x4] sm:$0xf] %vm1894_vm2, %v2098_v56  ;;  %v1607_v57 = vadd.f32 %v3322_v59, %v1536_v50  ;;  %v1439_v0 = vmul.f32 %v2326_v60, %v2974_v58  ;;  %v1315_v8 = vadd.f32 1e-05, %v1251_v44 }
 0x214   :  { %1927 = vst.msk [vmem:[%s3786_s5 + $0x80] sm:$0xf] %vm1894_vm2, %v2129_v49  ;;  %v1580_v9 = vadd.f32 %v3322_v59, %v1509_v30  ;;  %v1470_v6 = vmul.f32 %v2328_v27, %v2990_v21  ;;  %v1346_v12 = vadd.f32 1e-05, %v1282_v25  ;;  %v1179_v43 = vpop.xlane.xlu1 %1178  ;;  %v1074_v24 = vpop.xlane.xlu0 %1073 }
 0x215   :  { %v2130_v14 = vpack.c.bf16 %v1607_v57, %v1607_v57  ;;  %v1510_v55 = vmul.f32 %v3316_v31, %v1439_v0  ;;  %2341 = vrsqrt.f32 %v1315_v8  ;;  %v1283_v36 = vmul.f32 0.03125, %v1179_v43 }
 0x216   :  { %v2330_v51 = vpop.eup %2329  ;;  %v2103_v58 = vpack.c.bf16 %v1580_v9, %v1580_v9  ;;  %v1541_v11 = vmul.f32 %v3316_v31, %v1470_v6  ;;  %2343 = vrsqrt.f32 %v1346_v12  ;;  %v1248_v3 = vmul.f32 0.03125, %v1074_v24 }
 0x217   :  { %v2332_v53 = vpop.eup %2331  ;;  %1928 = vst.msk [vmem:[%s3786_s5 + $0x84] sm:$0xf] %vm1894_vm2, %v2130_v14  ;;  %v1581_v21 = vadd.f32 %v3322_v59, %v1510_v55  ;;  %v1471_v52 = vmul.f32 %v2330_v51, %v2987_v63  ;;  %v1347_v41 = vadd.f32 1e-05, %v1283_v36 }
 0x218   :  { %1901 = vst.msk [vmem:[%s3786_s5 + $0x18] sm:$0xf] %vm1894_vm2, %v2103_v58  ;;  %v1612_v56 = vadd.f32 %v3322_v59, %v1541_v11  ;;  %v1436_v50 = vmul.f32 %v2332_v53, %v3001_v4  ;;  %v1312_v44 = vadd.f32 1e-05, %v1248_v3  ;;  %v1077_v60 = vpop.xlane.xlu1 %1076  ;;  %v1170_v49 = vpop.xlane.xlu0 %1169 }
 0x219   :  { %v2104_v30 = vpack.c.bf16 %v1581_v21, %v1581_v21  ;;  %v1542_v25 = vmul.f32 %v3316_v31, %v1471_v52  ;;  %2345 = vrsqrt.f32 %v1347_v41  ;;  %v1249_v27 = vmul.f32 0.03125, %v1077_v60 }
 0x21a   :  { %v2334_v57 = vpop.eup %2333  ;;  %v2135_v63 = vpack.c.bf16 %v1612_v56, %v1612_v56  ;;  %v1507_v0 = vmul.f32 %v3316_v31, %v1436_v50  ;;  %2347 = vrsqrt.f32 %v1312_v44  ;;  %v1280_v8 = vmul.f32 0.03125, %v1170_v49 }
 0x21b   :  { %v2336_v9 = vpop.eup %2335  ;;  %1902 = vst.msk [vmem:[%s3786_s5 + $0x1c] sm:$0xf] %vm1894_vm2, %v2104_v30  ;;  %v1613_v4 = vadd.f32 %v3322_v59, %v1542_v25  ;;  %v1437_v6 = vmul.f32 %v2334_v57, %v2998_v5  ;;  %v1313_v12 = vadd.f32 1e-05, %v1249_v27 }
 0x21c   :  { %1933 = vst.msk [vmem:[%s3786_s5 + $0x98] sm:$0xf] %vm1894_vm2, %v2135_v63  ;;  %v1578_v43 = vadd.f32 %v3322_v59, %v1507_v0  ;;  %v1468_v24 = vmul.f32 %v2336_v9, %v3014_v42  ;;  %v1344_v14 = vadd.f32 1e-05, %v1280_v8  ;;  %v1173_v55 = vpop.xlane.xlu1 %1172  ;;  %v1092_v36 = vpop.xlane.xlu0 %1091 }
 0x21d   :  { %v2136_v51 = vpack.c.bf16 %v1613_v4, %v1613_v4  ;;  %v1508_v58 = vmul.f32 %v3316_v31, %v1437_v6  ;;  %2349 = vrsqrt.f32 %v1313_v12  ;;  %v1281_v11 = vmul.f32 0.03125, %v1173_v55 }
 0x21e   :  { %v2338_v3 = vpop.eup %2337  ;;  %v2101_v5 = vpack.c.bf16 %v1578_v43, %v1578_v43  ;;  %v1539_v53 = vmul.f32 %v3316_v31, %v1468_v24  ;;  %2351 = vrsqrt.f32 %v1344_v14  ;;  %v1254_v21 = vmul.f32 0.03125, %v1092_v36 }
 0x21f   :  { %v2340_v52 = vpop.eup %2339  ;;  %1934 = vst.msk [vmem:[%s3786_s5 + $0x9c] sm:$0xf] %vm1894_vm2, %v2136_v51  ;;  %v1579_v42 = vadd.f32 %v3322_v59, %v1508_v58  ;;  %v1469_v41 = vmul.f32 %v2338_v3, %v3011_v10  ;;  %v1345_v56 = vadd.f32 1e-05, %v1281_v11 }
 0x220   :  { %1899 = vst.msk [vmem:[%s3786_s5 + $0x10] sm:$0xf] %vm1894_vm2, %v2101_v5  ;;  %v1610_v50 = vadd.f32 %v3322_v59, %v1539_v53  ;;  %v1442_v44 = vmul.f32 %v2340_v52, %v3025_v17  ;;  %v1318_v60 = vadd.f32 1e-05, %v1254_v21  ;;  %v1095_v49 = vpop.xlane.xlu1 %1094  ;;  %v1188_v30 = vpop.xlane.xlu0 %1187 }
 0x221   :  { %v2102_v25 = vpack.c.bf16 %v1579_v42, %v1579_v42  ;;  %v1540_v27 = vmul.f32 %v3316_v31, %v1469_v41  ;;  %2353 = vrsqrt.f32 %v1345_v56  ;;  %v1255_v57 = vmul.f32 0.03125, %v1095_v49 }
 0x222   :  { %v2342_v63 = vpop.eup %2341  ;;  %v2133_v10 = vpack.c.bf16 %v1610_v50, %v1610_v50  ;;  %v1513_v0 = vmul.f32 %v3316_v31, %v1442_v44  ;;  %2355 = vrsqrt.f32 %v1318_v60  ;;  %v1286_v8 = vmul.f32 0.03125, %v1188_v30 }
 0x223   :  { %v2344_v9 = vpop.eup %2343  ;;  %1900 = vst.msk [vmem:[%s3786_s5 + $0x14] sm:$0xf] %vm1894_vm2, %v2102_v25  ;;  %v1611_v17 = vadd.f32 %v3322_v59, %v1540_v27  ;;  %v1443_v4 = vmul.f32 %v2342_v63, %v3022_v18  ;;  %v1319_v6 = vadd.f32 1e-05, %v1255_v57 }
 0x224   :  { %1931 = vst.msk [vmem:[%s3786_s5 + $0x90] sm:$0xf] %vm1894_vm2, %v2133_v10  ;;  %v1584_v12 = vadd.f32 %v3322_v59, %v1513_v0  ;;  %v1474_v43 = vmul.f32 %v2344_v9, %v3038_v39  ;;  %v1350_v24 = vadd.f32 1e-05, %v1286_v8  ;;  %v1191_v14 = vpop.xlane.xlu1 %1190  ;;  %v1086_v55 = vpop.xlane.xlu0 %1085 }
 0x225   :  { %v2134_v36 = vpack.c.bf16 %v1611_v17, %v1611_v17  ;;  %v1514_v51 = vmul.f32 %v3316_v31, %v1443_v4  ;;  %2357 = vrsqrt.f32 %v1319_v6  ;;  %v1287_v58 = vmul.f32 0.03125, %v1191_v14 }
 0x226   :  { %v2346_v11 = vpop.eup %2345  ;;  %v2107_v18 = vpack.c.bf16 %v1584_v12, %v1584_v12  ;;  %v1545_v3 = vmul.f32 %v3316_v31, %v1474_v43  ;;  %2359 = vrsqrt.f32 %v1350_v24  ;;  %v1252_v5 = vmul.f32 0.03125, %v1086_v55 }
 0x227   :  { %v2348_v53 = vpop.eup %2347  ;;  %1932 = vst.msk [vmem:[%s3786_s5 + $0x94] sm:$0xf] %vm1894_vm2, %v2134_v36  ;;  %v1585_v39 = vadd.f32 %v3322_v59, %v1514_v51  ;;  %v1475_v21 = vmul.f32 %v2346_v11, %v3035_v23  ;;  %v1351_v52 = vadd.f32 1e-05, %v1287_v58 }
 0x228   :  { %1905 = vst.msk [vmem:[%s3786_s5 + $0x28] sm:$0xf] %vm1894_vm2, %v2107_v18  ;;  %v1616_v42 = vadd.f32 %v3322_v59, %v1545_v3  ;;  %v1440_v41 = vmul.f32 %v2348_v53, %v3049_v28  ;;  %v1316_v56 = vadd.f32 1e-05, %v1252_v5  ;;  %v1089_v50 = vpop.xlane.xlu1 %1088  ;;  %v1182_v44 = vpop.xlane.xlu0 %1181 }
 0x229   :  { %v2108_v60 = vpack.c.bf16 %v1585_v39, %v1585_v39  ;;  %v1546_v49 = vmul.f32 %v3316_v31, %v1475_v21  ;;  %2361 = vrsqrt.f32 %v1351_v52  ;;  %v1253_v30 = vmul.f32 0.03125, %v1089_v50 }
 0x22a   :  { %v2350_v25 = vpop.eup %2349  ;;  %v2139_v23 = vpack.c.bf16 %v1616_v42, %v1616_v42  ;;  %v1511_v27 = vmul.f32 %v3316_v31, %v1440_v41  ;;  %2363 = vrsqrt.f32 %v1316_v56  ;;  %v1284_v57 = vmul.f32 0.03125, %v1182_v44 }
 0x22b   :  { %v2352_v63 = vpop.eup %2351  ;;  %1906 = vst.msk [vmem:[%s3786_s5 + $0x2c] sm:$0xf] %vm1894_vm2, %v2108_v60  ;;  %v1617_v28 = vadd.f32 %v3322_v59, %v1546_v49  ;;  %v1441_v10 = vmul.f32 %v2350_v25, %v3046_v29  ;;  %v1317_v0 = vadd.f32 1e-05, %v1253_v30 }
 0x22c   :  { %1937 = vst.msk [vmem:[%s3786_s5 + $0xa8] sm:$0xf] %vm1894_vm2, %v2139_v23  ;;  %v1582_v8 = vadd.f32 %v3322_v59, %v1511_v27  ;;  %v1472_v9 = vmul.f32 %v2352_v63, %v3062_v40  ;;  %v1348_v17 = vadd.f32 1e-05, %v1284_v57  ;;  %v1185_v4 = vpop.xlane.xlu1 %1184  ;;  %v1104_v6 = vpop.xlane.xlu0 %1103 }
 0x22d   :  { %v2140_v12 = vpack.c.bf16 %v1617_v28, %v1617_v28  ;;  %v1512_v43 = vmul.f32 %v3316_v31, %v1441_v10  ;;  %2365 = vrsqrt.f32 %v1317_v0  ;;  %v1285_v24 = vmul.f32 0.03125, %v1185_v4 }
 0x22e   :  { %v2354_v14 = vpop.eup %2353  ;;  %v2105_v29 = vpack.c.bf16 %v1582_v8, %v1582_v8  ;;  %v1543_v55 = vmul.f32 %v3316_v31, %v1472_v9  ;;  %2367 = vrsqrt.f32 %v1348_v17  ;;  %v1258_v36 = vmul.f32 0.03125, %v1104_v6 }
 0x22f   :  { %v2356_v51 = vpop.eup %2355  ;;  %1938 = vst.msk [vmem:[%s3786_s5 + $0xac] sm:$0xf] %vm1894_vm2, %v2140_v12  ;;  %v1583_v40 = vadd.f32 %v3322_v59, %v1512_v43  ;;  %v1473_v58 = vmul.f32 %v2354_v14, %v3059_v34  ;;  %v1349_v11 = vadd.f32 1e-05, %v1285_v24 }
 0x230   :  { %1903 = vst.msk [vmem:[%s3786_s5 + $0x20] sm:$0xf] %vm1894_vm2, %v2105_v29  ;;  %v1614_v18 = vadd.f32 %v3322_v59, %v1543_v55  ;;  %v1446_v3 = vmul.f32 %v2356_v51, %v3073_v45  ;;  %v1322_v5 = vadd.f32 1e-05, %v1258_v36  ;;  %v1107_v53 = vpop.xlane.xlu1 %1106  ;;  %v1200_v39 = vpop.xlane.xlu0 %1199 }
 0x231   :  { %v2106_v21 = vpack.c.bf16 %v1583_v40, %v1583_v40  ;;  %v1544_v52 = vmul.f32 %v3316_v31, %v1473_v58  ;;  %2369 = vrsqrt.f32 %v1349_v11  ;;  %v1259_v42 = vmul.f32 0.03125, %v1107_v53 }
 0x232   :  { %v2358_v41 = vpop.eup %2357  ;;  %v2137_v34 = vpack.c.bf16 %v1614_v18, %v1614_v18  ;;  %v1517_v56 = vmul.f32 %v3316_v31, %v1446_v3  ;;  %2371 = vrsqrt.f32 %v1322_v5  ;;  %v1290_v50 = vmul.f32 0.03125, %v1200_v39 }
 0x233   :  { %v2360_v44 = vpop.eup %2359  ;;  %1904 = vst.msk [vmem:[%s3786_s5 + $0x24] sm:$0xf] %vm1894_vm2, %v2106_v21  ;;  %v1615_v45 = vadd.f32 %v3322_v59, %v1544_v52  ;;  %v1447_v60 = vmul.f32 %v2358_v41, %v3070_v46  ;;  %v1323_v49 = vadd.f32 1e-05, %v1259_v42 }
 0x234   :  { %1935 = vst.msk [vmem:[%s3786_s5 + $0xa0] sm:$0xf] %vm1894_vm2, %v2137_v34  ;;  %v1588_v30 = vadd.f32 %v3322_v59, %v1517_v56  ;;  %v1478_v25 = vmul.f32 %v2360_v44, %v3086_v35  ;;  %v1354_v23 = vadd.f32 1e-05, %v1290_v50  ;;  %v1203_v27 = vpop.xlane.xlu1 %1202  ;;  %v1098_v57 = vpop.xlane.xlu0 %1097 }
 0x235   :  { %v2138_v63 = vpack.c.bf16 %v1615_v45, %v1615_v45  ;;  %v1518_v28 = vmul.f32 %v3316_v31, %v1447_v60  ;;  %2373 = vrsqrt.f32 %v1323_v49  ;;  %v1291_v10 = vmul.f32 0.03125, %v1203_v27 }
 0x236   :  { %v2362_v0 = vpop.eup %2361  ;;  %v2111_v46 = vpack.c.bf16 %v1588_v30, %v1588_v30  ;;  %v1549_v8 = vmul.f32 %v3316_v31, %v1478_v25  ;;  %2375 = vrsqrt.f32 %v1354_v23  ;;  %v1256_v9 = vmul.f32 0.03125, %v1098_v57 }
 0x237   :  { %v2364_v17 = vpop.eup %2363  ;;  %1936 = vst.msk [vmem:[%s3786_s5 + $0xa4] sm:$0xf] %vm1894_vm2, %v2138_v63  ;;  %v1589_v35 = vadd.f32 %v3322_v59, %v1518_v28  ;;  %v1479_v4 = vmul.f32 %v2362_v0, %v3083_v54  ;;  %v1355_v6 = vadd.f32 1e-05, %v1291_v10 }
 0x238   :  { %1909 = vst.msk [vmem:[%s3786_s5 + $0x38] sm:$0xf] %vm1894_vm2, %v2111_v46  ;;  %v1620_v12 = vadd.f32 %v3322_v59, %v1549_v8  ;;  %v1444_v43 = vmul.f32 %v2364_v17, %v3097_v61  ;;  %v1320_v24 = vadd.f32 1e-05, %v1256_v9  ;;  %v1101_v14 = vpop.xlane.xlu1 %1100  ;;  %v1194_v29 = vpop.xlane.xlu0 %1193 }
 0x239   :  { %v2112_v55 = vpack.c.bf16 %v1589_v35, %v1589_v35  ;;  %v1550_v36 = vmul.f32 %v3316_v31, %v1479_v4  ;;  %2377 = vrsqrt.f32 %v1355_v6  ;;  %v1257_v51 = vmul.f32 0.03125, %v1101_v14 }
 0x23a   :  { %v2366_v40 = vpop.eup %2365  ;;  %v2143_v54 = vpack.c.bf16 %v1620_v12, %v1620_v12  ;;  %v1515_v58 = vmul.f32 %v3316_v31, %v1444_v43  ;;  %2379 = vrsqrt.f32 %v1320_v24  ;;  %v1288_v11 = vmul.f32 0.03125, %v1194_v29 }
 0x23b   :  { %v2368_v18 = vpop.eup %2367  ;;  %1910 = vst.msk [vmem:[%s3786_s5 + $0x3c] sm:$0xf] %vm1894_vm2, %v2112_v55  ;;  %v1621_v61 = vadd.f32 %v3322_v59, %v1550_v36  ;;  %v1445_v3 = vmul.f32 %v2366_v40, %v3094_v62  ;;  %v1321_v5 = vadd.f32 1e-05, %v1257_v51 }
 0x23c   :  { %1941 = vst.msk [vmem:[%s3786_s5 + $0xb8] sm:$0xf] %vm1894_vm2, %v2143_v54  ;;  %v1586_v53 = vadd.f32 %v3322_v59, %v1515_v58  ;;  %v1476_v39 = vmul.f32 %v2368_v18, %v3110_v15  ;;  %v1352_v21 = vadd.f32 1e-05, %v1288_v11  ;;  %v1197_v52 = vpop.xlane.xlu1 %1196  ;;  %v1116_v42 = vpop.xlane.xlu0 %1115 }
 0x23d   :  { %v2144_v41 = vpack.c.bf16 %v1621_v61, %v1621_v61  ;;  %v1516_v34 = vmul.f32 %v3316_v31, %v1445_v3  ;;  %2381 = vrsqrt.f32 %v1321_v5  ;;  %v1289_v56 = vmul.f32 0.03125, %v1197_v52 }
 0x23e   :  { %v2370_v50 = vpop.eup %2369  ;;  %v2109_v62 = vpack.c.bf16 %v1586_v53, %v1586_v53  ;;  %v1547_v44 = vmul.f32 %v3316_v31, %v1476_v39  ;;  %2383 = vrsqrt.f32 %v1352_v21  ;;  %v1262_v45 = vmul.f32 0.03125, %v1116_v42 }
 0x23f   :  { %v2372_v60 = vpop.eup %2371  ;;  %1942 = vst.msk [vmem:[%s3786_s5 + $0xbc] sm:$0xf] %vm1894_vm2, %v2144_v41  ;;  %v1587_v15 = vadd.f32 %v3322_v59, %v1516_v34  ;;  %v1477_v49 = vmul.f32 %v2370_v50, %v3107_v7  ;;  %v1353_v30 = vadd.f32 1e-05, %v1289_v56 }
 0x240   :  { %1907 = vst.msk [vmem:[%s3786_s5 + $0x30] sm:$0xf] %vm1894_vm2, %v2109_v62  ;;  %v1618_v25 = vadd.f32 %v3322_v59, %v1547_v44  ;;  %v1450_v23 = vmul.f32 %v2372_v60, %v3121_v16  ;;  %v1326_v27 = vadd.f32 1e-05, %v1262_v45  ;;  %v1119_v57 = vpop.xlane.xlu1 %1118  ;;  %v1212_v63 = vpop.xlane.xlu0 %1211 }
 0x241   :  { %v2110_v28 = vpack.c.bf16 %v1587_v15, %v1587_v15  ;;  %v1548_v10 = vmul.f32 %v3316_v31, %v1477_v49  ;;  %2385 = vrsqrt.f32 %v1353_v30  ;;  %v1263_v0 = vmul.f32 0.03125, %v1119_v57 }
 0x242   :  { %v2374_v46 = vpop.eup %2373  ;;  %v2141_v7 = vpack.c.bf16 %v1618_v25, %v1618_v25  ;;  %v1521_v8 = vmul.f32 %v3316_v31, %v1450_v23  ;;  %2387 = vrsqrt.f32 %v1326_v27  ;;  %v1294_v9 = vmul.f32 0.03125, %v1212_v63 }
 0x243   :  { %v2376_v17 = vpop.eup %2375  ;;  %1908 = vst.msk [vmem:[%s3786_s5 + $0x34] sm:$0xf] %vm1894_vm2, %v2110_v28  ;;  %v1619_v16 = vadd.f32 %v3322_v59, %v1548_v10  ;;  %v1451_v35 = vmul.f32 %v2374_v46, %v3118_v19  ;;  %v1327_v4 = vadd.f32 1e-05, %v1263_v0 }
 0x244   :  { %1939 = vst.msk [vmem:[%s3786_s5 + $0xb0] sm:$0xf] %vm1894_vm2, %v2141_v7  ;;  %v1592_v6 = vadd.f32 %v3322_v59, %v1521_v8  ;;  %v1482_v12 = vmul.f32 %v2376_v17, %v3134_v20  ;;  %v1358_v43 = vadd.f32 1e-05, %v1294_v9  ;;  %v1215_v24 = vpop.xlane.xlu1 %1214  ;;  %v1110_v14 = vpop.xlane.xlu0 %1109 }
 0x245   :  { %v2142_v29 = vpack.c.bf16 %v1619_v16, %v1619_v16  ;;  %v1522_v55 = vmul.f32 %v3316_v31, %v1451_v35  ;;  %2389 = vrsqrt.f32 %v1327_v4  ;;  %v1295_v36 = vmul.f32 0.03125, %v1215_v24 }
 0x246   :  { %v2378_v51 = vpop.eup %2377  ;;  %v2115_v19 = vpack.c.bf16 %v1592_v6, %v1592_v6  ;;  %v1553_v40 = vmul.f32 %v3316_v31, %v1482_v12  ;;  %2391 = vrsqrt.f32 %v1358_v43  ;;  %v1260_v54 = vmul.f32 0.03125, %v1110_v14 }
 0x247   :  { %v2380_v58 = vpop.eup %2379  ;;  %1940 = vst.msk [vmem:[%s3786_s5 + $0xb4] sm:$0xf] %vm1894_vm2, %v2142_v29  ;;  %v1593_v20 = vadd.f32 %v3322_v59, %v1522_v55  ;;  %v1483_v11 = vmul.f32 %v2378_v51, %v3131_v26  ;;  %v1359_v18 = vadd.f32 1e-05, %v1295_v36 }
 0x248   :  { %1913 = vst.msk [vmem:[%s3786_s5 + $0x48] sm:$0xf] %vm1894_vm2, %v2115_v19  ;;  %v1624_v61 = vadd.f32 %v3322_v59, %v1553_v40  ;;  %v1448_v3 = vmul.f32 %v2380_v58, %v3145_v33  ;;  %v1324_v5 = vadd.f32 1e-05, %v1260_v54  ;;  %v1113_v53 = vpop.xlane.xlu1 %1112  ;;  %v1206_v39 = vpop.xlane.xlu0 %1205 }
 0x249   :  { %v2116_v21 = vpack.c.bf16 %v1593_v20, %v1593_v20  ;;  %v1554_v52 = vmul.f32 %v3316_v31, %v1483_v11  ;;  %2393 = vrsqrt.f32 %v1359_v18  ;;  %v1261_v42 = vmul.f32 0.03125, %v1113_v53 }
 0x24a   :  { %v2382_v41 = vpop.eup %2381  ;;  %v2147_v26 = vpack.c.bf16 %v1624_v61, %v1624_v61  ;;  %v1519_v34 = vmul.f32 %v3316_v31, %v1448_v3  ;;  %2395 = vrsqrt.f32 %v1324_v5  ;;  %v1292_v56 = vmul.f32 0.03125, %v1206_v39 }
 0x24b   :  { %v2384_v50 = vpop.eup %2383  ;;  %1914 = vst.msk [vmem:[%s3786_s5 + $0x4c] sm:$0xf] %vm1894_vm2, %v2116_v21  ;;  %v1625_v33 = vadd.f32 %v3322_v59, %v1554_v52  ;;  %v1449_v62 = vmul.f32 %v2382_v41, %v3142_v37  ;;  %v1325_v44 = vadd.f32 1e-05, %v1261_v42 }
 0x24c   :  { %1945 = vst.msk [vmem:[%s3786_s5 + $0xc8] sm:$0xf] %vm1894_vm2, %v2147_v26  ;;  %v1590_v45 = vadd.f32 %v3322_v59, %v1519_v34  ;;  %v1480_v60 = vmul.f32 %v2384_v50, %v3158_v38  ;;  %v1356_v15 = vadd.f32 1e-05, %v1292_v56  ;;  %v1209_v49 = vpop.xlane.xlu1 %1208  ;;  %v1128_v30 = vpop.xlane.xlu0 %1127 }
 0x24d   :  { %v2148_v25 = vpack.c.bf16 %v1625_v33, %v1625_v33  ;;  %v1520_v23 = vmul.f32 %v3316_v31, %v1449_v62  ;;  %2397 = vrsqrt.f32 %v1325_v44  ;;  %v1293_v27 = vmul.f32 0.03125, %v1209_v49 }
 0x24e   :  { %v2386_v57 = vpop.eup %2385  ;;  %v2113_v37 = vpack.c.bf16 %v1590_v45, %v1590_v45  ;;  %v1551_v63 = vmul.f32 %v3316_v31, %v1480_v60  ;;  %2399 = vrsqrt.f32 %v1356_v15  ;;  %v1266_v28 = vmul.f32 0.03125, %v1128_v30  ;;  %v3868_v60 = vld [vmem:[#allocation17_spill] sm:$0xff] }
 0x24f   :  { %v2388_v10 = vpop.eup %2387  ;;  %1946 = vst.msk [vmem:[%s3786_s5 + $0xcc] sm:$0xf] %vm1894_vm2, %v2148_v25  ;;  %v1591_v38 = vadd.f32 %v3322_v59, %v1520_v23  ;;  %v1481_v0 = vmul.f32 %v2386_v57, %v3155_v48  ;;  %v1357_v46 = vadd.f32 1e-05, %v1293_v27  ;;  %v3869_v25 = vld [vmem:[#allocation19_spill] sm:$0xff] }
 0x250   :  { %1911 = vst.msk [vmem:[%s3786_s5 + $0x40] sm:$0xf] %vm1894_vm2, %v2113_v37  ;;  %v1622_v7 = vadd.f32 %v3322_v59, %v1551_v63  ;;  %v1454_v8 = vmul.f32 %v2388_v10, %v3169_v1  ;;  %v1330_v9 = vadd.f32 1e-05, %v1266_v28  ;;  %v1131_v17 = vpop.xlane.xlu1 %1130  ;;  %v1224_v16 = vpop.xlane.xlu0 %1223 }
 0x251   :  { %v2114_v35 = vpack.c.bf16 %v1591_v38, %v1591_v38  ;;  %v1552_v4 = vmul.f32 %v3316_v31, %v1481_v0  ;;  %2401 = vrsqrt.f32 %v1357_v46  ;;  %v1267_v6 = vmul.f32 0.03125, %v1131_v17  ;;  %v3870_v17 = vld [vmem:[#allocation18_spill] sm:$0xff] }
 0x252   :  { %v2390_v12 = vpop.eup %2389  ;;  %v2145_v48 = vpack.c.bf16 %v1622_v7, %v1622_v7  ;;  %v1525_v43 = vmul.f32 %v3316_v31, %v1454_v8  ;;  %2403 = vrsqrt.f32 %v1330_v9  ;;  %v1298_v24 = vmul.f32 0.03125, %v1224_v16 }
 0x253   :  { %v2392_v14 = vpop.eup %2391  ;;  %1912 = vst.msk [vmem:[%s3786_s5 + $0x44] sm:$0xf] %vm1894_vm2, %v2114_v35  ;;  %v1623_v1 = vadd.f32 %v3322_v59, %v1552_v4  ;;  %v1455_v29 = vmul.f32 %v2390_v12, %v3166_v2  ;;  %v1331_v55 = vadd.f32 1e-05, %v1267_v6  ;;  %v3871_v6 = vld [vmem:[#allocation2_spill] sm:$0xff] }
 0x254   :  { %1943 = vst.msk [vmem:[%s3786_s5 + $0xc0] sm:$0xf] %vm1894_vm2, %v2145_v48  ;;  %v1596_v36 = vadd.f32 %v3322_v59, %v1525_v43  ;;  %v1486_v51 = vmul.f32 %v2392_v14, %v3182_v32  ;;  %v1362_v19 = vadd.f32 1e-05, %v1298_v24  ;;  %v1227_v40 = vpop.xlane.xlu1 %1226  ;;  %v1122_v54 = vpop.xlane.xlu0 %1121 }
 0x255   :  { %v2146_v58 = vpack.c.bf16 %v1623_v1, %v1623_v1  ;;  %v1526_v20 = vmul.f32 %v3316_v31, %v1455_v29  ;;  %2405 = vrsqrt.f32 %v1331_v55  ;;  %v1299_v11 = vmul.f32 0.03125, %v1227_v40  ;;  %v3872_v40 = vld [vmem:[#allocation3_spill] sm:$0xff] }
 0x256   :  { %v2394_v18 = vpop.eup %2393  ;;  %v2119_v2 = vpack.c.bf16 %v1596_v36, %v1596_v36  ;;  %v1557_v61 = vmul.f32 %v3316_v31, %v1486_v51  ;;  %2407 = vrsqrt.f32 %v1362_v19  ;;  %v1264_v3 = vmul.f32 0.03125, %v1122_v54 }
 0x257   :  { %v2396_v5 = vpop.eup %2395  ;;  %1944 = vst.msk [vmem:[%s3786_s5 + $0xc4] sm:$0xf] %vm1894_vm2, %v2146_v58  ;;  %v1597_v32 = vadd.f32 %v3322_v59, %v1526_v20  ;;  %v1487_v53 = vmul.f32 %v2394_v18, %v3179_v13  ;;  %v1363_v39 = vadd.f32 1e-05, %v1299_v11  ;;  %v3873_v11 = vld [vmem:[#allocation4_spill] sm:$0xff] }
 0x258   :  { %1917 = vst.msk [vmem:[%s3786_s5 + $0x58] sm:$0xf] %vm1894_vm2, %v2119_v2  ;;  %v1628_v21 = vadd.f32 %v3322_v59, %v1557_v61  ;;  %v1452_v52 = vmul.f32 %v2396_v5, %v3193_v22  ;;  %v1328_v42 = vadd.f32 1e-05, %v1264_v3  ;;  %v1125_v41 = vpop.xlane.xlu1 %1124  ;;  %v1218_v26 = vpop.xlane.xlu0 %1217 }
 0x259   :  { %v2120_v34 = vpack.c.bf16 %v1597_v32, %v1597_v32  ;;  %v1558_v56 = vmul.f32 %v3316_v31, %v1487_v53  ;;  %2409 = vrsqrt.f32 %v1363_v39  ;;  %v1265_v50 = vmul.f32 0.03125, %v1125_v41 }
 0x25a   :  { %v2398_v33 = vpop.eup %2397  ;;  %v2151_v13 = vpack.c.bf16 %v1628_v21, %v1628_v21  ;;  %v1523_v62 = vmul.f32 %v3316_v31, %v1452_v52  ;;  %2411 = vrsqrt.f32 %v1328_v42  ;;  %v1296_v44 = vmul.f32 0.03125, %v1218_v26  ;;  %v3874_v26 = vld [vmem:[#allocation5_spill] sm:$0xff] }
 0x25b   :  { %v2400_v45 = vpop.eup %2399  ;;  %1918 = vst.msk [vmem:[%s3786_s5 + $0x5c] sm:$0xf] %vm1894_vm2, %v2120_v34  ;;  %v1629_v22 = vadd.f32 %v3322_v59, %v1558_v56  ;;  %v1453_v15 = vmul.f32 %v2398_v33, %v3868_v60  ;;  %v1329_v49 = vadd.f32 1e-05, %v1265_v50 }
 0x25c   :  { %1949 = vst.msk [vmem:[%s3786_s5 + $0xd8] sm:$0xf] %vm1894_vm2, %v2151_v13  ;;  %v1594_v30 = vadd.f32 %v3322_v59, %v1523_v62  ;;  %v1484_v23 = vmul.f32 %v2400_v45, %v3869_v25  ;;  %v1360_v27 = vadd.f32 1e-05, %v1296_v44  ;;  %v1221_v57 = vpop.xlane.xlu1 %1220  ;;  %v1140_v37 = vpop.xlane.xlu0 %1139 }
 0x25d   :  { %v2152_v63 = vpack.c.bf16 %v1629_v22, %v1629_v22  ;;  %v1524_v28 = vmul.f32 %v3316_v31, %v1453_v15  ;;  %2413 = vrsqrt.f32 %v1329_v49  ;;  %v1297_v10 = vmul.f32 0.03125, %v1221_v57  ;;  %v3677_v22 = vld [vmem:[%s3784_s3] ss:$0 sm:$0xff] }
 0x25e   :  { %v2402_v38 = vpop.eup %2401  ;;  %v2117_v0 = vpack.c.bf16 %v1594_v30, %v1594_v30  ;;  %v1555_v46 = vmul.f32 %v3316_v31, %v1484_v23  ;;  %2415 = vrsqrt.f32 %v1360_v27  ;;  %v1270_v7 = vmul.f32 0.03125, %v1140_v37  ;;  %v3688_v27 = vld [vmem:[%s3785_s4] ss:$0 sm:$0xff]  ;;  %v3876_v37 = vld [vmem:[#allocation7_spill] sm:$0xff] }
 0x25f   :  { %v2404_v8 = vpop.eup %2403  ;;  %1950 = vst.msk [vmem:[%s3786_s5 + $0xdc] sm:$0xf] %vm1894_vm2, %v2152_v63  ;;  %v1595_v9 = vadd.f32 %v3322_v59, %v1524_v28  ;;  %v1485_v16 = vmul.f32 %v2402_v38, %v3870_v17  ;;  %v1361_v35 = vadd.f32 1e-05, %v1297_v10  ;;  %v3877_v38 = vld [vmem:[#allocation8_spill] sm:$0xff] }
 0x260   :  { %1915 = vst.msk [vmem:[%s3786_s5 + $0x50] sm:$0xf] %vm1894_vm2, %v2117_v0  ;;  %v1626_v4 = vadd.f32 %v3322_v59, %v1555_v46  ;;  %v1458_v12 = vmul.f32 %v2404_v8, %v3871_v6  ;;  %v1334_v48 = vadd.f32 1e-05, %v1270_v7  ;;  %v1143_v43 = vpop.xlane.xlu1 %1142 }
 0x261   :  { %v2118_v24 = vpack.c.bf16 %v1595_v9, %v1595_v9  ;;  %v1556_v14 = vmul.f32 %v3316_v31, %v1485_v16  ;;  %2417 = vrsqrt.f32 %v1361_v35  ;;  %v1271_v1 = vmul.f32 0.03125, %v1143_v43 }
 0x262   :  { %v2406_v29 = vpop.eup %2405  ;;  %v2149_v55 = vpack.c.bf16 %v1626_v4, %v1626_v4  ;;  %v1529_v36 = vmul.f32 %v3316_v31, %v1458_v12  ;;  %2419 = vrsqrt.f32 %v1334_v48 }
 0x263   :  { %v2408_v51 = vpop.eup %2407  ;;  %1916 = vst.msk [vmem:[%s3786_s5 + $0x54] sm:$0xf] %vm1894_vm2, %v2118_v24  ;;  %v1627_v19 = vadd.f32 %v3322_v59, %v1556_v14  ;;  %v1459_v54 = vmul.f32 %v2406_v29, %v3872_v40  ;;  %v1335_v58 = vadd.f32 1e-05, %v1271_v1  ;;  %v3878_v24 = vld [vmem:[#allocation20_spill] sm:$0xff] }
 0x264   :  { %1947 = vst.msk [vmem:[%s3786_s5 + $0xd0] sm:$0xf] %vm1894_vm2, %v2149_v55  ;;  %v1600_v20 = vadd.f32 %v3322_v59, %v1529_v36  ;;  %v1490_v18 = vmul.f32 %v2408_v51, %v3873_v11  ;;  %v1137_v2 = vpop.xlane.xlu1 %1136  ;;  %v1134_v61 = vpop.xlane.xlu0 %1133  ;;  %v3879_v55 = vld [vmem:[#allocation9_spill] sm:$0xff] }
 0x265   :  { %v2150_v3 = vpack.c.bf16 %v1627_v19, %v1627_v19  ;;  %v1530_v5 = vmul.f32 %v3316_v31, %v1459_v54  ;;  %2421 = vrsqrt.f32 %v1335_v58  ;;  %v1269_v32 = vmul.f32 0.03125, %v1137_v2 }
 0x266   :  { %v2410_v53 = vpop.eup %2409  ;;  %v2123_v39 = vpack.c.bf16 %v1600_v20, %v1600_v20  ;;  %v1561_v21 = vmul.f32 %v3316_v31, %v1490_v18  ;;  %v1268_v52 = vmul.f32 0.03125, %v1134_v61  ;;  %v3875_v31 = vld [vmem:[#allocation6_spill] sm:$0xff]  ;;  %v3880_v18 = vld [vmem:[#allocation21_spill] sm:$0xff] }
 0x267   :  { %v2412_v42 = vpop.eup %2411  ;;  %1948 = vst.msk [vmem:[%s3786_s5 + $0xd4] sm:$0xf] %vm1894_vm2, %v2150_v3  ;;  %v1601_v41 = vadd.f32 %v3322_v59, %v1530_v5  ;;  %v1491_v34 = vmul.f32 %v2410_v53, %v3874_v26  ;;  %v1333_v56 = vadd.f32 1e-05, %v1269_v32 }
 0x268   :  { %1921 = vst.msk [vmem:[%s3786_s5 + $0x68] sm:$0xf] %vm1894_vm2, %v2123_v39  ;;  %v1632_v50 = vadd.f32 %v3322_v59, %v1561_v21  ;;  %v1456_v33 = vmul.f32 %v2412_v42, %v3875_v31  ;;  %v1332_v13 = vadd.f32 1e-05, %v1268_v52  ;;  %v1233_v62 = vpop.xlane.xlu1 %1232  ;;  %v1230_v44 = vpop.xlane.xlu0 %1229  ;;  %v3881_v42 = vld [vmem:[#allocation13_spill] sm:$0xff] }
 0x269   :  { %v2124_v45 = vpack.c.bf16 %v1601_v41, %v1601_v41  ;;  %v1562_v60 = vmul.f32 %v3677_v22, %v1491_v34  ;;  %2423 = vrsqrt.f32 %v1333_v56  ;;  %v1301_v15 = vmul.f32 0.03125, %v1233_v62 }
 0x26a   :  { %v2414_v49 = vpop.eup %2413  ;;  %v2155_v30 = vpack.c.bf16 %v1632_v50, %v1632_v50  ;;  %v1527_v25 = vmul.f32 %v3677_v22, %v1456_v33  ;;  %2425 = vrsqrt.f32 %v1332_v13  ;;  %v1300_v59 = vmul.f32 0.03125, %v1230_v44  ;;  %v3882_v33 = vld [vmem:[#allocation10_spill] sm:$0xff] }
 0x26b   :  { %v2416_v23 = vpop.eup %2415  ;;  %1922 = vst.msk [vmem:[%s3786_s5 + $0x6c] sm:$0xf] %vm1894_vm2, %v2124_v45  ;;  %v1633_v57 = vadd.f32 %v3688_v27, %v1562_v60  ;;  %v1457_v63 = vmul.f32 %v2414_v49, %v3876_v37  ;;  %v1365_v28 = vadd.f32 1e-05, %v1301_v15  ;;  %v3883_v44 = vld [vmem:[#allocation14_spill] sm:$0xff] }
 0x26c   :  { %1953 = vst.msk [vmem:[%s3786_s5 + $0xe8] sm:$0xf] %vm1894_vm2, %v2155_v30  ;;  %v1598_v10 = vadd.f32 %v3688_v27, %v1527_v25  ;;  %v1488_v0 = vmul.f32 %v2416_v23, %v3877_v38  ;;  %v1364_v46 = vadd.f32 1e-05, %v1300_v59  ;;  %v1239_v7 = vpop.xlane.xlu1 %1238  ;;  %v1236_v8 = vpop.xlane.xlu0 %1235 }
 0x26d   :  { %v2156_v9 = vpack.c.bf16 %v1633_v57, %v1633_v57  ;;  %v1528_v17 = vmul.f32 %v3677_v22, %v1457_v63  ;;  %2427 = vrsqrt.f32 %v1365_v28  ;;  %v1303_v16 = vmul.f32 0.03125, %v1239_v7  ;;  %v3884_v57 = vld [vmem:[#allocation12_spill] sm:$0xff]  ;;  %v3885_v28 = vld [vmem:[#allocation11_spill] sm:$0xff] }
 0x26e   :  { %v2418_v35 = vpop.eup %2417  ;;  %v2121_v4 = vpack.c.bf16 %v1598_v10, %v1598_v10  ;;  %v1559_v6 = vmul.f32 %v3677_v22, %v1488_v0  ;;  %2429 = vrsqrt.f32 %v1364_v46  ;;  %v1302_v12 = vmul.f32 0.03125, %v1236_v8 }
 0x26f   :  { %v2420_v48 = vpop.eup %2419  ;;  %1954 = vst.msk [vmem:[%s3786_s5 + $0xec] sm:$0xf] %vm1894_vm2, %v2156_v9  ;;  %v1599_v43 = vadd.f32 %v3688_v27, %v1528_v17  ;;  %v1489_v14 = vmul.f32 %v2418_v35, %v3878_v24  ;;  %v1367_v1 = vadd.f32 1e-05, %v1303_v16 }
 0x270   :  { %1919 = vst.msk [vmem:[%s3786_s5 + $0x60] sm:$0xf] %vm1894_vm2, %v2121_v4  ;;  %v1630_v29 = vadd.f32 %v3688_v27, %v1559_v6  ;;  %v1462_v36 = vmul.f32 %v2420_v48, %v3879_v55  ;;  %v1366_v51 = vadd.f32 1e-05, %v1302_v12 }
 0x271   :  { %v2122_v19 = vpack.c.bf16 %v1599_v43, %v1599_v43  ;;  %v1560_v40 = vmul.f32 %v3677_v22, %v1489_v14  ;;  %2431 = vrsqrt.f32 %v1367_v1 }
 0x272   :  { %v2422_v54 = vpop.eup %2421  ;;  %v2153_v58 = vpack.c.bf16 %v1630_v29, %v1630_v29  ;;  %v1533_v20 = vmul.f32 %v3677_v22, %v1462_v36  ;;  %2433 = vrsqrt.f32 %v1366_v51 }
 0x273   :  { %1920 = vst.msk [vmem:[%s3786_s5 + $0x64] sm:$0xf] %vm1894_vm2, %v2122_v19  ;;  %v1631_v11 = vadd.f32 %v3688_v27, %v1560_v40  ;;  %v1463_v2 = vmul.f32 %v2422_v54, %v3880_v18 }
 0x274   :  { %1951 = vst.msk [vmem:[%s3786_s5 + $0xe0] sm:$0xf] %vm1894_vm2, %v2153_v58  ;;  %v1604_v61 = vadd.f32 %v3688_v27, %v1533_v20 }
 0x275   :  { %v2154_v3 = vpack.c.bf16 %v1631_v11, %v1631_v11  ;;  %v1534_v5 = vmul.f32 %v3677_v22, %v1463_v2 }
 0x276   :  { %v2424_v32 = vpop.eup %2423  ;;  %v2127_v53 = vpack.c.bf16 %v1604_v61, %v1604_v61 }
 0x277   :  { %v2426_v39 = vpop.eup %2425  ;;  %1952 = vst.msk [vmem:[%s3786_s5 + $0xe4] sm:$0xf] %vm1894_vm2, %v2154_v3  ;;  %v1605_v21 = vadd.f32 %v3688_v27, %v1534_v5  ;;  %v1461_v52 = vmul.f32 %v2424_v32, %v3277_v47 }
 0x278   :  { %1925 = vst.msk [vmem:[%s3786_s5 + $0x78] sm:$0xf] %vm1894_vm2, %v2127_v53  ;;  %v1460_v41 = vmul.f32 %v2426_v39, %v3881_v42 }
 0x279   :  { %v2128_v26 = vpack.c.bf16 %v1605_v21, %v1605_v21  ;;  %v1532_v34 = vmul.f32 %v3677_v22, %v1461_v52 }
 0x27a   :  { %v2428_v56 = vpop.eup %2427  ;;  %v1531_v50 = vmul.f32 %v3677_v22, %v1460_v41 }
 0x27b   :  { %v2430_v31 = vpop.eup %2429  ;;  %1926 = vst.msk [vmem:[%s3786_s5 + $0x7c] sm:$0xf] %vm1894_vm2, %v2128_v26  ;;  %v1603_v47 = vadd.f32 %v3688_v27, %v1532_v34  ;;  %v1493_v13 = vmul.f32 %v2428_v56, %v3882_v33 }
 0x27c   :  { %v1602_v62 = vadd.f32 %v3688_v27, %v1531_v50  ;;  %v1492_v45 = vmul.f32 %v2430_v31, %v3883_v44 }
 0x27d   :  { %v2126_v60 = vpack.c.bf16 %v1603_v47, %v1603_v47  ;;  %v1564_v15 = vmul.f32 %v3677_v22, %v1493_v13 }
 0x27e   :  { %v2432_v49 = vpop.eup %2431  ;;  %v2125_v30 = vpack.c.bf16 %v1602_v62, %v1602_v62  ;;  %v1563_v25 = vmul.f32 %v3677_v22, %v1492_v45 }
 0x27f   :  { %v2434_v59 = vpop.eup %2433  ;;  %1924 = vst.msk [vmem:[%s3786_s5 + $0x74] sm:$0xf] %vm1894_vm2, %v2126_v60  ;;  %v1635_v23 = vadd.f32 %v3688_v27, %v1564_v15  ;;  %v1495_v37 = vmul.f32 %v2432_v49, %v3884_v57 }
 0x280   :  { %1923 = vst.msk [vmem:[%s3786_s5 + $0x70] sm:$0xf] %vm1894_vm2, %v2125_v30  ;;  %v1634_v63 = vadd.f32 %v3688_v27, %v1563_v25  ;;  %v1494_v10 = vmul.f32 %v2434_v59, %v3885_v28 }
 0x281   :  { %v2158_v38 = vpack.c.bf16 %v1635_v23, %v1635_v23  ;;  %v1566_v0 = vmul.f32 %v3677_v22, %v1495_v37 }
 0x282   :  { %v2157_v46 = vpack.c.bf16 %v1634_v63, %v1634_v63  ;;  %v1565_v7 = vmul.f32 %v3677_v22, %v1494_v10 }
 0x283   :  { %1956 = vst.msk [vmem:[%s3786_s5 + $0xf4] sm:$0xf] %vm1894_vm2, %v2158_v38  ;;  %v1637_v8 = vadd.f32 %v3688_v27, %v1566_v0 }
 0x284   :  { %1955 = vst.msk [vmem:[%s3786_s5 + $0xf0] sm:$0xf] %vm1894_vm2, %v2157_v46  ;;  %v1636_v9 = vadd.f32 %v3688_v27, %v1565_v7 }
 0x285   :  { %v2160_v17 = vpack.c.bf16 %v1637_v8, %v1637_v8 }
 0x286   :  { %v2159_v16 = vpack.c.bf16 %v1636_v9, %v1636_v9 }
 0x287   :  { %1958 = vst.msk [vmem:[%s3786_s5 + $0xfc] sm:$0xf] %vm1894_vm2, %v2160_v17 }
 0x288   :  { %1957 = vst.msk [vmem:[%s3786_s5 + $0xf8] sm:$0xf] %vm1894_vm2, %v2159_v16 }

// kernel: encoder_decoder_forward.8
= control target key start
LH: loop header
LB: loop body
LE: loop exit
PB: predicated region body
PF: predicated region fallthrough
CT: control target
= control target key end

     0   :  { %vm253_vm0 = vcmask 523264   ;;  %vm573_vm1 = vcmask 519168   ;;  %s1116_s1 = inlined_call_operand.vmem [shape: bf16[128,64], index: 1, kind: input, shape index: {}]   ;;  %s1117_s0 = inlined_call_operand.vmem [shape: bf16[128,128], index: 0, kind: input, shape index: {}]   ;;  %s1118_s2 = inlined_call_operand.vmem [shape: f32[1,64], index: 2, kind: input, shape index: {}]   ;;  %s1119_s3 = inlined_call_operand.vmem [shape: f32[1,64], index: 3, kind: input, shape index: {}]   ;;  %s1120_s4 = inlined_call_operand.vmem [shape: f32[1,64], index: 4, kind: input, shape index: {}]   ;;  %s1121_s5 = inlined_call_operand.vmem [shape: bf16[128,64], index: 5, kind: output, shape index: {}]  }
   0x1   :  { %v709_v0 = vld [vmem:[%s1116_s1 + $0x38] sm:$0xff]   ;;  %v710_v1 = vld [vmem:[%s1116_s1 + $0x30] sm:$0xff]   ;;  %v711_v2 = vld [vmem:[%s1116_s1 + $0x28] sm:$0xff]  }
   0x2   :  { %661 = vmatprep.subr.bf16.mxu0 %v709_v0  ;;  %693 = vmatprep.subr.bf16.mxu1 %v709_v0  ;;  %v712_v3 = vld [vmem:[%s1116_s1 + $0x20] sm:$0xff]   ;;  %v713_v6 = vld [vmem:[%s1116_s1 + $0x18] sm:$0xff]   ;;  %v714_v7 = vld [vmem:[%s1116_s1 + $0x10] sm:$0xff]  }
   0x3   :  { %662 = vmatpush3.bf16.msra.mxu0 %v709_v0  ;;  %701 = vmatpush3.bf16.msra.mxu1 %v709_v0  ;;  %v717_v4 = vld [vmem:[%s1117_s0] sm:$0xff]   ;;  %v715_v8 = vld [vmem:[%s1116_s1 + $0x8] sm:$0xff]   ;;  %v721_v12 = vld [vmem:[%s1117_s0 + $0x10] sm:$0xff]  }
   0x4   :  { %663 = vmatprep.subr.bf16.mxu0 %v710_v1  ;;  %694 = vmatprep.subr.bf16.mxu1 %v710_v1  ;;  %v718_v5 = vld [vmem:[%s1117_s0 + $0x20] sm:$0xff]   ;;  %v719_v10 = vld [vmem:[%s1117_s0 + $0x8] sm:$0xff]   ;;  %v723_v13 = vld [vmem:[%s1117_s0 + $0x30] sm:$0xff]  }
   0x5   :  { %677 = vmatprep.mubr.bf16.mxu0 %v717_v4  ;;  %685 = vmatprep.mubr.bf16.mxu1 %v718_v5  ;;  %v716_v9 = vld [vmem:[%s1116_s1] sm:$0xff]   ;;  %v720_v11 = vld [vmem:[%s1117_s0 + $0x28] sm:$0xff]   ;;  %v722_v14 = vld [vmem:[%s1117_s0 + $0x18] sm:$0xff]  }
   0x6   :  { %v724_v15 = vld [vmem:[%s1117_s0 + $0x38] sm:$0xff]   ;;  %v594_v16 = vld [vmem:[%s1118_s2] ss:$0 sm:$0xff] }
   0x7   :  { %664 = vmatpush3.bf16.msra.mxu0 %v710_v1  ;;  %702 = vmatpush3.bf16.msra.mxu1 %v710_v1 }
   0x8   :  { %665 = vmatprep.subr.bf16.mxu0 %v711_v2  ;;  %695 = vmatprep.subr.bf16.mxu1 %v711_v2 }
   0xb   :  { %666 = vmatpush3.bf16.msra.mxu0 %v711_v2  ;;  %703 = vmatpush3.bf16.msra.mxu1 %v711_v2 }
   0xc   :  { %667 = vmatprep.subr.bf16.mxu0 %v712_v3  ;;  %696 = vmatprep.subr.bf16.mxu1 %v712_v3 }
   0xf   :  { %668 = vmatpush3.bf16.msra.mxu0 %v712_v3  ;;  %704 = vmatpush3.bf16.msra.mxu1 %v712_v3 }
  0x10   :  { %669 = vmatprep.subr.bf16.mxu0 %v713_v6  ;;  %697 = vmatprep.subr.bf16.mxu1 %v713_v6 }
  0x13   :  { %670 = vmatpush3.bf16.msra.mxu0 %v713_v6  ;;  %705 = vmatpush3.bf16.msra.mxu1 %v713_v6 }
  0x14   :  { %671 = vmatprep.subr.bf16.mxu0 %v714_v7  ;;  %698 = vmatprep.subr.bf16.mxu1 %v714_v7 }
  0x17   :  { %672 = vmatpush3.bf16.msra.mxu0 %v714_v7  ;;  %706 = vmatpush3.bf16.msra.mxu1 %v714_v7 }
  0x18   :  { %673 = vmatprep.subr.bf16.mxu0 %v715_v8  ;;  %699 = vmatprep.subr.bf16.mxu1 %v715_v8 }
  0x1b   :  { %674 = vmatpush3.bf16.msra.mxu0 %v715_v8  ;;  %707 = vmatpush3.bf16.msra.mxu1 %v715_v8 }
  0x1c   :  { %675 = vmatprep.subr.bf16.mxu0 %v716_v9  ;;  %700 = vmatprep.subr.bf16.mxu1 %v716_v9 }
  0x1f   :  { %676 = vmatpush3.bf16.msra.mxu0 %v716_v9  ;;  %708 = vmatpush3.bf16.msra.mxu1 %v716_v9 }
  0x22   :  { %678 = vmatmul.mubr.bf16.vlgmr.msra.gmra.mxu0 %v719_v10  ;;  %686 = vmatmul.mubr.bf16.vlgmr.msra.gmra.mxu1 %v720_v11 }
  0x23   :  { %681 = vmatprep.mubr.bf16.mxu0 %v721_v12  ;;  %689 = vmatprep.mubr.bf16.mxu1 %v723_v13 }
  0x2a   :  { %682 = vmatmul.mubr.bf16.gmra.mxu0 %v722_v14  ;;  %690 = vmatmul.mubr.bf16.gmra.mxu1 %v724_v15 }
  0xe2   :  { %v679_v17 = vpop.f32.mrf.mxu0  ;;  %v687_v18 = vpop.f32.mrf.mxu1 }
  0xe3   :  { %v838_v19 = vadd.f32 %v679_v17, %v594_v16  ;;  %v840_v20 = vadd.f32 %v687_v18, %v594_v16 }
  0xe4   :  { %v190_v21 = vpop.f32.mrf.mxu0  ;;  %v222_v22 = vpop.f32.mrf.mxu1 }
  0xe5   :  { %v842_v23 = vadd.f32 %v594_v16, %v190_v21  ;;  %v284_v24 = vsel %vm253_vm0, %v840_v20, 0.0  ;;  %v260_v25 = vsel %vm253_vm0, %v838_v19, 0.0  ;;  %v848_v31 = vadd.f32 %v594_v16, %v222_v22 }
  0xe6   :  { %285 = vadd.xlane.f32.xlu0 %v284_v24  ;;  %v688_v26 = vpop.f32.mrf.mxu1  ;;  %261 = vadd.xlane.f32.xlu1 %v260_v25  ;;  %v680_v27 = vpop.f32.mrf.mxu0 }
  0xe7   :  { %v202_v28 = vadd.f32 %v680_v27, %v594_v16  ;;  %v850_v32 = vadd.f32 %v688_v26, %v594_v16  ;;  %v254_v34 = vsel %vm253_vm0, %v842_v23, 0.0  ;;  %v278_v41 = vsel %vm253_vm0, %v848_v31, 0.0 }
  0xe8   :  { %v193_v29 = vpop.f32.mrf.mxu0  ;;  %v225_v30 = vpop.f32.mrf.mxu1 }
  0xe9   :  { %v263_v33 = vsel %vm253_vm0, %v202_v28, 0.0  ;;  %v855_v38 = vadd.f32 %v594_v16, %v193_v29  ;;  %v857_v39 = vadd.f32 %v594_v16, %v225_v30  ;;  %v287_v40 = vsel %vm253_vm0, %v850_v32, 0.0 }
  0xea   :  { %264 = vadd.xlane.f32.xlu1 %v263_v33  ;;  %255 = vadd.xlane.f32.xlu0 %v254_v34  ;;  %v683_v35 = vpop.f32.mrf.mxu0  ;;  %v691_v36 = vpop.f32.mrf.mxu1 }
  0xeb   :  { %v863_v44 = vadd.f32 %v683_v35, %v594_v16  ;;  %v281_v46 = vsel %vm253_vm0, %v857_v39, 0.0  ;;  %v257_v47 = vsel %vm253_vm0, %v855_v38, 0.0  ;;  %v887_v59 = vadd.f32 %v691_v36, %v594_v16 }
  0xec   :  { %v206_v37 = vpop.f32.mrf.mxu0  ;;  %v238_v43 = vpop.f32.mrf.mxu1 }
  0xed   :  { %v272_v51 = vsel %vm253_vm0, %v863_v44, 0.0  ;;  %v875_v52 = vadd.f32 %v594_v16, %v206_v37  ;;  %v879_v55 = vadd.f32 %v594_v16, %v238_v43  ;;  %v296_v0 = vsel %vm253_vm0, %v887_v59, 0.0 }
  0xee   :  { %288 = vadd.xlane.f32.xlu1 %v287_v40  ;;  %279 = vadd.xlane.f32.xlu0 %v278_v41  ;;  %v684_v42 = vpop.f32.mrf.mxu0  ;;  %v692_v49 = vpop.f32.mrf.mxu1 }
  0xef   :  { %v865_v45 = vadd.f32 %v684_v42, %v594_v16  ;;  %v266_v58 = vsel %vm253_vm0, %v875_v52, 0.0  ;;  %v889_v60 = vadd.f32 %v692_v49, %v594_v16  ;;  %v290_v62 = vsel %vm253_vm0, %v879_v55, 0.0 }
  0xf0   :  { %v209_v48 = vpop.f32.mrf.mxu0  ;;  %v241_v54 = vpop.f32.mrf.mxu1 }
  0xf1   :  { %v275_v50 = vsel %vm253_vm0, %v865_v45, 0.0  ;;  %v877_v53 = vadd.f32 %v594_v16, %v209_v48  ;;  %v881_v56 = vadd.f32 %v594_v16, %v241_v54  ;;  %v299_v63 = vsel %vm253_vm0, %v889_v60, 0.0 }
  0xf2   :  { %282 = vadd.xlane.f32.xlu1 %v281_v46  ;;  %258 = vadd.xlane.f32.xlu0 %v257_v47 }
  0xf3   :  { %v269_v57 = vsel %vm253_vm0, %v877_v53, 0.0  ;;  %v293_v61 = vsel %vm253_vm0, %v881_v56, 0.0 }
  0xf6   :  { %276 = vadd.xlane.f32.xlu1 %v275_v50  ;;  %273 = vadd.xlane.f32.xlu0 %v272_v51 }
  0xfa   :  { %270 = vadd.xlane.f32.xlu1 %v269_v57  ;;  %267 = vadd.xlane.f32.xlu0 %v266_v58 }
  0xfe   :  { %294 = vadd.xlane.f32.xlu1 %v293_v61  ;;  %291 = vadd.xlane.f32.xlu0 %v290_v62 }
 0x102   :  { %300 = vadd.xlane.f32.xlu1 %v299_v63  ;;  %297 = vadd.xlane.f32.xlu0 %v296_v0 }
 0x16f   :  { %v286_v1 = vpop.xlane.xlu0 %285  ;;  %v262_v2 = vpop.xlane.xlu1 %261 }
 0x170   :  { %v313_v3 = vmul.f32 0.015625, %v286_v1  ;;  %v305_v4 = vmul.f32 0.015625, %v262_v2 }
 0x172   :  { %v900_v5 = vsub.f32 %v840_v20, %v313_v3  ;;  %v903_v6 = vsub.f32 %v838_v19, %v305_v4 }
 0x173   :  { %v265_v7 = vpop.xlane.xlu1 %264  ;;  %v256_v8 = vpop.xlane.xlu0 %255 }
 0x174   :  { %v306_v9 = vmul.f32 0.015625, %v265_v7  ;;  %v303_v10 = vmul.f32 0.015625, %v256_v8  ;;  %v337_v11 = vmul.f32 %v903_v6, %v903_v6  ;;  %v345_v15 = vmul.f32 %v900_v5, %v900_v5 }
 0x176   :  { %v907_v12 = vsub.f32 %v202_v28, %v306_v9  ;;  %v910_v13 = vsub.f32 %v842_v23, %v303_v10  ;;  %v357_v14 = vsel %vm253_vm0, %v337_v11, 0.0  ;;  %v381_v25 = vsel %vm253_vm0, %v345_v15, 0.0 }
 0x177   :  { %v289_v16 = vpop.xlane.xlu1 %288  ;;  %358 = vadd.xlane.f32.xlu0 %v357_v14  ;;  %v280_v17 = vpop.xlane.xlu0 %279 }
 0x178   :  { %v314_v18 = vmul.f32 0.015625, %v289_v16  ;;  %v311_v19 = vmul.f32 0.015625, %v280_v17  ;;  %v338_v20 = vmul.f32 %v907_v12, %v907_v12  ;;  %v335_v21 = vmul.f32 %v910_v13, %v910_v13 }
 0x17a   :  { %v920_v22 = vsub.f32 %v850_v32, %v314_v18  ;;  %v923_v23 = vsub.f32 %v848_v31, %v311_v19  ;;  %v360_v24 = vsel %vm253_vm0, %v338_v20, 0.0  ;;  %v351_v33 = vsel %vm253_vm0, %v335_v21, 0.0 }
 0x17b   :  { %v283_v26 = vpop.xlane.xlu1 %282  ;;  %361 = vadd.xlane.f32.xlu1 %v360_v24  ;;  %382 = vadd.xlane.f32.xlu0 %v381_v25  ;;  %v259_v27 = vpop.xlane.xlu0 %258 }
 0x17c   :  { %v312_v28 = vmul.f32 0.015625, %v283_v26  ;;  %v304_v29 = vmul.f32 0.015625, %v259_v27  ;;  %v346_v30 = vmul.f32 %v920_v22, %v920_v22  ;;  %v343_v35 = vmul.f32 %v923_v23, %v923_v23 }
 0x17e   :  { %v931_v32 = vsub.f32 %v857_v39, %v312_v28  ;;  %v934_v31 = vsub.f32 %v855_v38, %v304_v29  ;;  %v384_v34 = vsel %vm253_vm0, %v346_v30, 0.0  ;;  %v375_v46 = vsel %vm253_vm0, %v343_v35, 0.0 }
 0x17f   :  { %v277_v36 = vpop.xlane.xlu1 %276  ;;  %385 = vadd.xlane.f32.xlu1 %v384_v34  ;;  %352 = vadd.xlane.f32.xlu0 %v351_v33  ;;  %v274_v37 = vpop.xlane.xlu0 %273 }
 0x180   :  { %v310_v40 = vmul.f32 0.015625, %v277_v36  ;;  %v309_v41 = vmul.f32 0.015625, %v274_v37  ;;  %v336_v42 = vmul.f32 %v934_v31, %v934_v31  ;;  %v344_v39 = vmul.f32 %v931_v32, %v931_v32 }
 0x182   :  { %v944_v38 = vsub.f32 %v865_v45, %v310_v40  ;;  %v947_v43 = vsub.f32 %v863_v44, %v309_v41  ;;  %v354_v47 = vsel %vm253_vm0, %v336_v42, 0.0  ;;  %v378_v57 = vsel %vm253_vm0, %v344_v39, 0.0 }
 0x183   :  { %v271_v48 = vpop.xlane.xlu1 %270  ;;  %376 = vadd.xlane.f32.xlu0 %v375_v46  ;;  %355 = vadd.xlane.f32.xlu1 %v354_v47  ;;  %v268_v49 = vpop.xlane.xlu0 %267 }
 0x184   :  { %v308_v50 = vmul.f32 0.015625, %v271_v48  ;;  %v307_v51 = vmul.f32 0.015625, %v268_v49  ;;  %v341_v54 = vmul.f32 %v947_v43, %v947_v43  ;;  %v342_v61 = vmul.f32 %v944_v38, %v944_v38 }
 0x186   :  { %v955_v45 = vsub.f32 %v877_v53, %v308_v50  ;;  %v958_v44 = vsub.f32 %v875_v52, %v307_v51  ;;  %v369_v58 = vsel %vm253_vm0, %v341_v54, 0.0  ;;  %v372_v4 = vsel %vm253_vm0, %v342_v61, 0.0  ;;  %v997_v61 = vld [vmem:[%s1119_s3] ss:$0 sm:$0xff] }
 0x187   :  { %v295_v62 = vpop.xlane.xlu1 %294  ;;  %379 = vadd.xlane.f32.xlu1 %v378_v57  ;;  %370 = vadd.xlane.f32.xlu0 %v369_v58  ;;  %v292_v63 = vpop.xlane.xlu0 %291 }
 0x188   :  { %v316_v0 = vmul.f32 0.015625, %v295_v62  ;;  %v315_v1 = vmul.f32 0.015625, %v292_v63  ;;  %v339_v2 = vmul.f32 %v958_v44, %v958_v44  ;;  %v340_v53 = vmul.f32 %v955_v45, %v955_v45 }
 0x18a   :  { %v968_v52 = vsub.f32 %v881_v56, %v316_v0  ;;  %v971_v3 = vsub.f32 %v879_v55, %v315_v1  ;;  %v363_v7 = vsel %vm253_vm0, %v339_v2, 0.0  ;;  %v366_v15 = vsel %vm253_vm0, %v340_v53, 0.0  ;;  %v1003_v1 = vld [vmem:[%s1120_s4] ss:$0 sm:$0xff] }
 0x18b   :  { %v301_v8 = vpop.xlane.xlu1 %300  ;;  %373 = vadd.xlane.f32.xlu1 %v372_v4  ;;  %364 = vadd.xlane.f32.xlu0 %v363_v7  ;;  %v298_v9 = vpop.xlane.xlu0 %297 }
 0x18c   :  { %v318_v10 = vmul.f32 0.015625, %v301_v8  ;;  %v317_v11 = vmul.f32 0.015625, %v298_v9  ;;  %v347_v14 = vmul.f32 %v971_v3, %v971_v3  ;;  %v348_v17 = vmul.f32 %v968_v52, %v968_v52 }
 0x18e   :  { %v979_v56 = vsub.f32 %v889_v60, %v318_v10  ;;  %v982_v55 = vsub.f32 %v887_v59, %v317_v11  ;;  %v387_v16 = vsel %vm253_vm0, %v347_v14, 0.0  ;;  %v390_v19 = vsel %vm253_vm0, %v348_v17, 0.0 }
 0x18f   :  { %367 = vadd.xlane.f32.xlu1 %v366_v15  ;;  %388 = vadd.xlane.f32.xlu0 %v387_v16 }
 0x190   :  { %v349_v18 = vmul.f32 %v982_v55, %v982_v55  ;;  %v350_v60 = vmul.f32 %v979_v56, %v979_v56 }
 0x192   :  { %v393_v20 = vsel %vm253_vm0, %v349_v18, 0.0  ;;  %v396_v59 = vsel %vm253_vm0, %v350_v60, 0.0 }
 0x193   :  { %391 = vadd.xlane.f32.xlu1 %v390_v19  ;;  %394 = vadd.xlane.f32.xlu0 %v393_v20 }
 0x197   :  { %397 = vadd.xlane.f32.xlu1 %v396_v59 }
 0x200   :  { %v359_v21 = vpop.xlane.xlu0 %358 }
 0x201   :  { %v401_v24 = vmul.f32 0.015625, %v359_v21 }
 0x203   :  { %v417_v25 = vadd.f32 1e-05, %v401_v24 }
 0x204   :  { %v362_v26 = vpop.xlane.xlu1 %361  ;;  %v383_v27 = vpop.xlane.xlu0 %382 }
 0x205   :  { %725 = vrsqrt.f32 %v417_v25  ;;  %v402_v28 = vmul.f32 0.015625, %v362_v26  ;;  %v409_v29 = vmul.f32 0.015625, %v383_v27 }
 0x207   :  { %v418_v30 = vadd.f32 1e-05, %v402_v28  ;;  %v425_v33 = vadd.f32 1e-05, %v409_v29 }
 0x208   :  { %v386_v34 = vpop.xlane.xlu1 %385  ;;  %v353_v35 = vpop.xlane.xlu0 %352 }
 0x209   :  { %727 = vrsqrt.f32 %v418_v30  ;;  %v410_v36 = vmul.f32 0.015625, %v386_v34  ;;  %v399_v37 = vmul.f32 0.015625, %v353_v35 }
 0x20a   :  { %729 = vrsqrt.f32 %v425_v33 }
 0x20b   :  { %v426_v40 = vadd.f32 1e-05, %v410_v36  ;;  %v415_v41 = vadd.f32 1e-05, %v399_v37 }
 0x20c   :  { %v356_v42 = vpop.xlane.xlu1 %355  ;;  %v377_v39 = vpop.xlane.xlu0 %376 }
 0x20d   :  { %731 = vrsqrt.f32 %v426_v40  ;;  %v400_v46 = vmul.f32 0.015625, %v356_v42  ;;  %v407_v47 = vmul.f32 0.015625, %v377_v39 }
 0x20e   :  { %733 = vrsqrt.f32 %v415_v41 }
 0x20f   :  { %v416_v48 = vadd.f32 1e-05, %v400_v46  ;;  %v423_v49 = vadd.f32 1e-05, %v407_v47 }
 0x210   :  { %v380_v50 = vpop.xlane.xlu1 %379  ;;  %v371_v51 = vpop.xlane.xlu0 %370 }
 0x211   :  { %735 = vrsqrt.f32 %v416_v48  ;;  %v408_v54 = vmul.f32 0.015625, %v380_v50  ;;  %v405_v57 = vmul.f32 0.015625, %v371_v51 }
 0x212   :  { %v726_v58 = vpop.eup %725  ;;  %737 = vrsqrt.f32 %v423_v49 }
 0x213   :  { %v449_v62 = vmul.f32 %v726_v58, %v903_v6  ;;  %v424_v63 = vadd.f32 1e-05, %v408_v54  ;;  %v421_v0 = vadd.f32 1e-05, %v405_v57 }
 0x214   :  { %v374_v2 = vpop.xlane.xlu1 %373  ;;  %v365_v53 = vpop.xlane.xlu0 %364 }
 0x215   :  { %v472_v4 = vmul.f32 %v997_v61, %v449_v62  ;;  %739 = vrsqrt.f32 %v424_v63  ;;  %v406_v7 = vmul.f32 0.015625, %v374_v2  ;;  %v403_v8 = vmul.f32 0.015625, %v365_v53 }
 0x216   :  { %v728_v9 = vpop.eup %727  ;;  %741 = vrsqrt.f32 %v421_v0 }
 0x217   :  { %v730_v10 = vpop.eup %729  ;;  %v495_v11 = vadd.f32 %v1003_v1, %v472_v4  ;;  %v450_v6 = vmul.f32 %v728_v9, %v907_v12  ;;  %v422_v14 = vadd.f32 1e-05, %v406_v7  ;;  %v419_v15 = vadd.f32 1e-05, %v403_v8 }
 0x218   :  { %v457_v16 = vmul.f32 %v730_v10, %v900_v5  ;;  %v368_v17 = vpop.xlane.xlu1 %367  ;;  %v389_v18 = vpop.xlane.xlu0 %388 }
 0x219   :  { %v631_v19 = vpack.c.bf16 %v495_v11, %v495_v11  ;;  %v473_v20 = vmul.f32 %v997_v61, %v450_v6  ;;  %743 = vrsqrt.f32 %v422_v14  ;;  %v404_v60 = vmul.f32 0.015625, %v368_v17 }
 0x21a   :  { %v732_v59 = vpop.eup %731  ;;  %v480_v21 = vmul.f32 %v997_v61, %v457_v16  ;;  %745 = vrsqrt.f32 %v419_v15  ;;  %v411_v24 = vmul.f32 0.015625, %v389_v18 }
 0x21b   :  { %v734_v25 = vpop.eup %733  ;;  %576 = vst.msk [vmem:[%s1121_s5 + $0x8] sm:$0xf] %vm573_vm1, %v631_v19  ;;  %v496_v5 = vadd.f32 %v1003_v1, %v473_v20  ;;  %v458_v12 = vmul.f32 %v732_v59, %v920_v22  ;;  %v420_v26 = vadd.f32 1e-05, %v404_v60 }
 0x21c   :  { %v503_v27 = vadd.f32 %v1003_v1, %v480_v21  ;;  %v447_v28 = vmul.f32 %v734_v25, %v910_v13  ;;  %v427_v29 = vadd.f32 1e-05, %v411_v24  ;;  %v392_v30 = vpop.xlane.xlu1 %391  ;;  %v395_v33 = vpop.xlane.xlu0 %394 }
 0x21d   :  { %v632_v34 = vpack.c.bf16 %v496_v5, %v496_v5  ;;  %v481_v35 = vmul.f32 %v997_v61, %v458_v12  ;;  %747 = vrsqrt.f32 %v420_v26  ;;  %v412_v36 = vmul.f32 0.015625, %v392_v30 }
 0x21e   :  { %v736_v37 = vpop.eup %735  ;;  %v639_v40 = vpack.c.bf16 %v503_v27, %v503_v27  ;;  %v470_v41 = vmul.f32 %v997_v61, %v447_v28  ;;  %749 = vrsqrt.f32 %v427_v29  ;;  %v413_v42 = vmul.f32 0.015625, %v395_v33 }
 0x21f   :  { %v738_v22 = vpop.eup %737  ;;  %577 = vst.msk [vmem:[%s1121_s5 + $0xc] sm:$0xf] %vm573_vm1, %v632_v34  ;;  %v504_v13 = vadd.f32 %v1003_v1, %v481_v35  ;;  %v448_v39 = vmul.f32 %v736_v37, %v934_v31  ;;  %v428_v46 = vadd.f32 1e-05, %v412_v36 }
 0x220   :  { %584 = vst.msk [vmem:[%s1121_s5 + $0x28] sm:$0xf] %vm573_vm1, %v639_v40  ;;  %v493_v47 = vadd.f32 %v1003_v1, %v470_v41  ;;  %v455_v48 = vmul.f32 %v738_v22, %v923_v23  ;;  %v429_v49 = vadd.f32 1e-05, %v413_v42  ;;  %v398_v50 = vpop.xlane.xlu1 %397 }
 0x221   :  { %v640_v51 = vpack.c.bf16 %v504_v13, %v504_v13  ;;  %v471_v54 = vmul.f32 %v997_v61, %v448_v39  ;;  %751 = vrsqrt.f32 %v428_v46  ;;  %v414_v57 = vmul.f32 0.015625, %v398_v50 }
 0x222   :  { %v740_v58 = vpop.eup %739  ;;  %v629_v62 = vpack.c.bf16 %v493_v47, %v493_v47  ;;  %v478_v31 = vmul.f32 %v997_v61, %v455_v48  ;;  %753 = vrsqrt.f32 %v429_v49 }
 0x223   :  { %v742_v63 = vpop.eup %741  ;;  %585 = vst.msk [vmem:[%s1121_s5 + $0x2c] sm:$0xf] %vm573_vm1, %v640_v51  ;;  %v494_v23 = vadd.f32 %v1003_v1, %v471_v54  ;;  %v456_v0 = vmul.f32 %v740_v58, %v931_v32  ;;  %v430_v2 = vadd.f32 1e-05, %v414_v57 }
 0x224   :  { %574 = vst.msk [vmem:[%s1121_s5] sm:$0xf] %vm573_vm1, %v629_v62  ;;  %v501_v53 = vadd.f32 %v1003_v1, %v478_v31  ;;  %v453_v4 = vmul.f32 %v742_v63, %v947_v43 }
 0x225   :  { %v630_v7 = vpack.c.bf16 %v494_v23, %v494_v23  ;;  %v479_v8 = vmul.f32 %v997_v61, %v456_v0  ;;  %755 = vrsqrt.f32 %v430_v2 }
 0x226   :  { %v744_v9 = vpop.eup %743  ;;  %v637_v10 = vpack.c.bf16 %v501_v53, %v501_v53  ;;  %v476_v11 = vmul.f32 %v997_v61, %v453_v4 }
 0x227   :  { %v746_v6 = vpop.eup %745  ;;  %575 = vst.msk [vmem:[%s1121_s5 + $0x4] sm:$0xf] %vm573_vm1, %v630_v7  ;;  %v502_v32 = vadd.f32 %v1003_v1, %v479_v8  ;;  %v454_v14 = vmul.f32 %v744_v9, %v944_v38 }
 0x228   :  { %582 = vst.msk [vmem:[%s1121_s5 + $0x20] sm:$0xf] %vm573_vm1, %v637_v10  ;;  %v499_v43 = vadd.f32 %v1003_v1, %v476_v11  ;;  %v451_v15 = vmul.f32 %v746_v6, %v958_v44 }
 0x229   :  { %v638_v16 = vpack.c.bf16 %v502_v32, %v502_v32  ;;  %v477_v17 = vmul.f32 %v997_v61, %v454_v14 }
 0x22a   :  { %v748_v18 = vpop.eup %747  ;;  %v635_v19 = vpack.c.bf16 %v499_v43, %v499_v43  ;;  %v474_v20 = vmul.f32 %v997_v61, %v451_v15 }
 0x22b   :  { %v750_v60 = vpop.eup %749  ;;  %583 = vst.msk [vmem:[%s1121_s5 + $0x24] sm:$0xf] %vm573_vm1, %v638_v16  ;;  %v500_v38 = vadd.f32 %v1003_v1, %v477_v17  ;;  %v452_v59 = vmul.f32 %v748_v18, %v955_v45 }
 0x22c   :  { %580 = vst.msk [vmem:[%s1121_s5 + $0x18] sm:$0xf] %vm573_vm1, %v635_v19  ;;  %v497_v44 = vadd.f32 %v1003_v1, %v474_v20  ;;  %v459_v21 = vmul.f32 %v750_v60, %v971_v3 }
 0x22d   :  { %v636_v24 = vpack.c.bf16 %v500_v38, %v500_v38  ;;  %v475_v25 = vmul.f32 %v997_v61, %v452_v59 }
 0x22e   :  { %v752_v5 = vpop.eup %751  ;;  %v633_v12 = vpack.c.bf16 %v497_v44, %v497_v44  ;;  %v482_v26 = vmul.f32 %v997_v61, %v459_v21 }
 0x22f   :  { %v754_v27 = vpop.eup %753  ;;  %581 = vst.msk [vmem:[%s1121_s5 + $0x1c] sm:$0xf] %vm573_vm1, %v636_v24  ;;  %v498_v45 = vadd.f32 %v1003_v1, %v475_v25  ;;  %v460_v28 = vmul.f32 %v752_v5, %v968_v52 }
 0x230   :  { %578 = vst.msk [vmem:[%s1121_s5 + $0x10] sm:$0xf] %vm573_vm1, %v633_v12  ;;  %v505_v3 = vadd.f32 %v1003_v1, %v482_v26  ;;  %v461_v29 = vmul.f32 %v754_v27, %v982_v55 }
 0x231   :  { %v634_v30 = vpack.c.bf16 %v498_v45, %v498_v45  ;;  %v483_v33 = vmul.f32 %v997_v61, %v460_v28 }
 0x232   :  { %v756_v34 = vpop.eup %755  ;;  %v641_v35 = vpack.c.bf16 %v505_v3, %v505_v3  ;;  %v484_v36 = vmul.f32 %v997_v61, %v461_v29 }
 0x233   :  { %579 = vst.msk [vmem:[%s1121_s5 + $0x14] sm:$0xf] %vm573_vm1, %v634_v30  ;;  %v506_v52 = vadd.f32 %v1003_v1, %v483_v33  ;;  %v462_v37 = vmul.f32 %v756_v34, %v979_v56 }
 0x234   :  { %586 = vst.msk [vmem:[%s1121_s5 + $0x30] sm:$0xf] %vm573_vm1, %v641_v35  ;;  %v507_v55 = vadd.f32 %v1003_v1, %v484_v36 }
 0x235   :  { %v642_v40 = vpack.c.bf16 %v506_v52, %v506_v52  ;;  %v485_v41 = vmul.f32 %v997_v61, %v462_v37 }
 0x236   :  { %v643_v42 = vpack.c.bf16 %v507_v55, %v507_v55 }
 0x237   :  { %587 = vst.msk [vmem:[%s1121_s5 + $0x34] sm:$0xf] %vm573_vm1, %v642_v40  ;;  %v508_v22 = vadd.f32 %v1003_v1, %v485_v41 }
 0x238   :  { %588 = vst.msk [vmem:[%s1121_s5 + $0x38] sm:$0xf] %vm573_vm1, %v643_v42 }
 0x239   :  { %v644_v56 = vpack.c.bf16 %v508_v22, %v508_v22 }
 0x23b   :  { %589 = vst.msk [vmem:[%s1121_s5 + $0x3c] sm:$0xf] %vm573_vm1, %v644_v56 }

// kernel: encoder_decoder_forward.9
= control target key start
LH: loop header
LB: loop body
LE: loop exit
PB: predicated region body
PF: predicated region fallthrough
CT: control target
= control target key end

     0   :  { %v58_v36 = vlaneseq  ;;  %vm301_vm0 = vcmask 261120   ;;  %vm439_vm1 = vcmask 1043456   ;;  %vm440_vm2 = vcmask 261124   ;;  %s797_s1 = inlined_call_operand.vmem [shape: bf16[256,160], index: 1, kind: input, shape index: {}]   ;;  %s798_s0 = inlined_call_operand.vmem [shape: bf16[32,256], index: 0, kind: input, shape index: {}]   ;;  %s799_s2 = inlined_call_operand.vmem [shape: f32[1,160], index: 2, kind: input, shape index: {}]   ;;  %s800_s3 = inlined_call_operand.vmem [shape: f32[1,160], index: 3, kind: input, shape index: {}]   ;;  %s801_s4 = inlined_call_operand.vmem [shape: f32[1,160], index: 4, kind: input, shape index: {}]   ;;  %s802_s5 = inlined_call_operand.vmem [shape: bf16[32,160], index: 5, kind: output, shape index: {}]  }
   0x1   :  { %v526_v0 = vld [vmem:[%s797_s1 + $0x74] ss:$8 sps:$4 sm:$0xff]   ;;  %v528_v1 = vld [vmem:[%s797_s1 + $0x70] ss:$8 sps:$4 sm:$0xff]   ;;  %v529_v2 = vld [vmem:[%s797_s1 + $0x64] ss:$8 sps:$4 sm:$0xff]  }
   0x2   :  { %248 = vmatprep.subr.bf16.mxu0 %v526_v0  ;;  %494 = vmatprep.subr.bf16.mxu1 %v526_v0  ;;  %v531_v3 = vld [vmem:[%s797_s1 + $0x60] ss:$8 sps:$4 sm:$0xff]   ;;  %v532_v4 = vld [vmem:[%s797_s1 + $0x54] ss:$8 sps:$4 sm:$0xff]   ;;  %v534_v5 = vld [vmem:[%s797_s1 + $0x50] ss:$8 sps:$4 sm:$0xff]  }
   0x3   :  { %249 = vmatpush1.bf16.msra.mxu0 %v528_v1  ;;  %510 = vmatpush1.bf16.msra.mxu1 %v528_v1  ;;  %v535_v6 = vld [vmem:[%s797_s1 + $0x44] ss:$8 sps:$4 sm:$0xff]   ;;  %v537_v7 = vld [vmem:[%s797_s1 + $0x40] ss:$8 sps:$4 sm:$0xff]   ;;  %v538_v8 = vld [vmem:[%s797_s1 + $0x34] ss:$8 sps:$4 sm:$0xff]  }
   0x4   :  { %250 = vmatprep.subr.bf16.mxu0 %v529_v2  ;;  %495 = vmatprep.subr.bf16.mxu1 %v529_v2  ;;  %v540_v9 = vld [vmem:[%s797_s1 + $0x30] ss:$8 sps:$4 sm:$0xff]   ;;  %v541_v10 = vld [vmem:[%s797_s1 + $0x24] ss:$8 sps:$4 sm:$0xff]   ;;  %v543_v11 = vld [vmem:[%s797_s1 + $0x20] ss:$8 sps:$4 sm:$0xff]  }
   0x5   :  { %v544_v12 = vld [vmem:[%s797_s1 + $0x14] ss:$8 sps:$4 sm:$0xff]   ;;  %v576_v13 = vld [vmem:[%s798_s0 + $0x4] ss:$8 sps:$4 sm:$0xff]   ;;  %v546_v14 = vld [vmem:[%s797_s1 + $0x10] ss:$8 sps:$4 sm:$0xff]  }
   0x6   :  { %v579_v15 = vld [vmem:[%s798_s0 + $0x14] ss:$8 sps:$4 sm:$0xff]   ;;  %v547_v16 = vld [vmem:[%s797_s1 + $0x4] ss:$8 sps:$4 sm:$0xff]   ;;  %280 = vmatprep.mubr.bf16.mxu0 %v576_v13  ;;  %v549_v17 = vld [vmem:[%s797_s1] ss:$8 sps:$4 sm:$0xff]  }
   0x7   :  { %251 = vmatpush1.bf16.msra.mxu0 %v531_v3  ;;  %511 = vmatpush1.bf16.msra.mxu1 %v531_v3  ;;  %v550_v18 = vld [vmem:[%s797_s1 + $0xf4] ss:$8 sps:$4 sm:$0xff]   ;;  %v552_v19 = vld [vmem:[%s797_s1 + $0xf0] ss:$8 sps:$4 sm:$0xff]   ;;  %v553_v20 = vld [vmem:[%s797_s1 + $0xe4] ss:$8 sps:$4 sm:$0xff]  }
   0x8   :  { %252 = vmatprep.subr.bf16.mxu0 %v532_v4  ;;  %496 = vmatprep.subr.bf16.mxu1 %v532_v4  ;;  %v555_v21 = vld [vmem:[%s797_s1 + $0xe0] ss:$8 sps:$4 sm:$0xff]   ;;  %v556_v22 = vld [vmem:[%s797_s1 + $0xd4] ss:$8 sps:$4 sm:$0xff]   ;;  %v558_v23 = vld [vmem:[%s797_s1 + $0xd0] ss:$8 sps:$4 sm:$0xff]  }
   0x9   :  { %290 = vmatprep.mubr.bf16.mxu1 %v579_v15  ;;  %v559_v24 = vld [vmem:[%s797_s1 + $0xc4] ss:$8 sps:$4 sm:$0xff]   ;;  %v561_v25 = vld [vmem:[%s797_s1 + $0xc0] ss:$8 sps:$4 sm:$0xff]   ;;  %v562_v26 = vld [vmem:[%s797_s1 + $0xb4] ss:$8 sps:$4 sm:$0xff]  }
   0xa   :  { %v564_v27 = vld [vmem:[%s797_s1 + $0xb0] ss:$8 sps:$4 sm:$0xff]   ;;  %v565_v28 = vld [vmem:[%s797_s1 + $0xa4] ss:$8 sps:$4 sm:$0xff]   ;;  %v567_v29 = vld [vmem:[%s797_s1 + $0xa0] ss:$8 sps:$4 sm:$0xff]  }
   0xb   :  { %253 = vmatpush1.bf16.msra.mxu0 %v534_v5  ;;  %512 = vmatpush1.bf16.msra.mxu1 %v534_v5  ;;  %v568_v30 = vld [vmem:[%s797_s1 + $0x94] ss:$8 sps:$4 sm:$0xff]   ;;  %v570_v31 = vld [vmem:[%s797_s1 + $0x90] ss:$8 sps:$4 sm:$0xff]   ;;  %v571_v32 = vld [vmem:[%s797_s1 + $0x84] ss:$8 sps:$4 sm:$0xff]  }
   0xc   :  { %254 = vmatprep.subr.bf16.mxu0 %v535_v6  ;;  %497 = vmatprep.subr.bf16.mxu1 %v535_v6  ;;  %v573_v33 = vld [vmem:[%s797_s1 + $0x80] ss:$8 sps:$4 sm:$0xff]   ;;  %v577_v35 = vld [vmem:[%s798_s0 + $0x10] ss:$8 sps:$4 sm:$0xff]   ;;  %v59_v37 = vshrl.u32 %v58_v36, 7  ;;  %vm771_vm3 = vmor %vm440_vm2, %vm439_vm1 }
   0xd   :  { %v574_v34 = vld [vmem:[%s798_s0] ss:$8 sps:$4 sm:$0xff]  }
   0xe   :  { %v726_v38 = vsub.s32 1, %v59_v37  ;;  %v728_v39 = vsub.s32 0, %v59_v37  ;;  %v56_v40 = vld [vmem:[%s799_s2] sm:$0x3] }
   0xf   :  { %255 = vmatpush1.bf16.msra.mxu0 %v537_v7  ;;  %513 = vmatpush1.bf16.msra.mxu1 %v537_v7 }
  0x10   :  { %256 = vmatprep.subr.bf16.mxu0 %v538_v8  ;;  %498 = vmatprep.subr.bf16.mxu1 %v538_v8  ;;  %v65_v41 = vrot.slane %v56_v40, %v726_v38  ;;  %v61_v42 = vrot.slane %v56_v40, %v728_v39 }
  0x13   :  { %257 = vmatpush1.bf16.msra.mxu0 %v540_v9  ;;  %514 = vmatpush1.bf16.msra.mxu1 %v540_v9 }
  0x14   :  { %258 = vmatprep.subr.bf16.mxu0 %v541_v10  ;;  %499 = vmatprep.subr.bf16.mxu1 %v541_v10 }
  0x17   :  { %259 = vmatpush1.bf16.msra.mxu0 %v543_v11  ;;  %515 = vmatpush1.bf16.msra.mxu1 %v543_v11 }
  0x18   :  { %260 = vmatprep.subr.bf16.mxu0 %v544_v12  ;;  %500 = vmatprep.subr.bf16.mxu1 %v544_v12 }
  0x1b   :  { %261 = vmatpush1.bf16.msra.mxu0 %v546_v14  ;;  %516 = vmatpush1.bf16.msra.mxu1 %v546_v14 }
  0x1c   :  { %262 = vmatprep.subr.bf16.mxu0 %v547_v16  ;;  %501 = vmatprep.subr.bf16.mxu1 %v547_v16 }
  0x1f   :  { %263 = vmatpush1.bf16.msra.mxu0 %v549_v17  ;;  %517 = vmatpush1.bf16.msra.mxu1 %v549_v17 }
  0x20   :  { %264 = vmatprep.subr.bf16.mxu0 %v550_v18  ;;  %502 = vmatprep.subr.bf16.mxu1 %v550_v18 }
  0x23   :  { %265 = vmatpush2.bf16.msra.mxu0 %v552_v19  ;;  %518 = vmatpush2.bf16.msra.mxu1 %v552_v19 }
  0x24   :  { %266 = vmatprep.subr.bf16.mxu0 %v553_v20  ;;  %503 = vmatprep.subr.bf16.mxu1 %v553_v20 }
  0x27   :  { %267 = vmatpush2.bf16.msra.mxu0 %v555_v21  ;;  %519 = vmatpush2.bf16.msra.mxu1 %v555_v21 }
  0x28   :  { %268 = vmatprep.subr.bf16.mxu0 %v556_v22  ;;  %504 = vmatprep.subr.bf16.mxu1 %v556_v22 }
  0x2b   :  { %269 = vmatpush2.bf16.msra.mxu0 %v558_v23  ;;  %520 = vmatpush2.bf16.msra.mxu1 %v558_v23 }
  0x2c   :  { %270 = vmatprep.subr.bf16.mxu0 %v559_v24  ;;  %505 = vmatprep.subr.bf16.mxu1 %v559_v24 }
  0x2f   :  { %271 = vmatpush2.bf16.msra.mxu0 %v561_v25  ;;  %521 = vmatpush2.bf16.msra.mxu1 %v561_v25 }
  0x30   :  { %272 = vmatprep.subr.bf16.mxu0 %v562_v26  ;;  %506 = vmatprep.subr.bf16.mxu1 %v562_v26 }
  0x33   :  { %273 = vmatpush2.bf16.msra.mxu0 %v564_v27  ;;  %522 = vmatpush2.bf16.msra.mxu1 %v564_v27 }
  0x34   :  { %274 = vmatprep.subr.bf16.mxu0 %v565_v28  ;;  %507 = vmatprep.subr.bf16.mxu1 %v565_v28 }
  0x37   :  { %275 = vmatpush2.bf16.msra.mxu0 %v567_v29  ;;  %523 = vmatpush2.bf16.msra.mxu1 %v567_v29 }
  0x38   :  { %276 = vmatprep.subr.bf16.mxu0 %v568_v30  ;;  %508 = vmatprep.subr.bf16.mxu1 %v568_v30 }
  0x3b   :  { %277 = vmatpush2.bf16.msra.mxu0 %v570_v31  ;;  %524 = vmatpush2.bf16.msra.mxu1 %v570_v31 }
  0x3c   :  { %278 = vmatprep.subr.bf16.mxu0 %v571_v32  ;;  %509 = vmatprep.subr.bf16.mxu1 %v571_v32 }
  0x3f   :  { %279 = vmatpush2.bf16.msra.mxu0 %v573_v33  ;;  %525 = vmatpush2.bf16.msra.mxu1 %v573_v33 }
  0x42   :  { %281 = vmatmul.mubr.bf16.vlgmr.msra.gmra.mxu0 %v574_v34  ;;  %291 = vmatmul.mubr.bf16.vlgmr.msra.gmra.mxu1 %v577_v35 }
 0x102   :  { %v282_v43 = vpop.f32.mrf.mxu0  ;;  %v292_v44 = vpop.f32.mrf.mxu1 }
 0x103   :  { %v293_v45 = vadd.f32 %v292_v44, %v61_v42  ;;  %v283_v50 = vadd.f32 %v282_v43, %v61_v42 }
 0x104   :  { %v284_v46 = vpop.f32.mrf.mxu0  ;;  %v294_v47 = vpop.f32.mrf.mxu1 }
 0x105   :  { %v285_v48 = vadd.f32 %v284_v46, %v65_v41  ;;  %v295_v49 = vadd.f32 %v294_v47, %v65_v41 }
 0x106   :  { %v286_v51 = vpop.f32.mrf.mxu0  ;;  %v296_v52 = vpop.f32.mrf.mxu1 }
 0x107   :  { %v310_v53 = vsel %vm301_vm0, %v295_v49, 0.0  ;;  %v302_v54 = vsel %vm301_vm0, %v285_v48, 0.0  ;;  %v287_v61 = vadd.f32 %v286_v51, %v61_v42  ;;  %v297_v62 = vadd.f32 %v296_v52, %v61_v42 }
 0x108   :  { %v288_v55 = vpop.f32.mrf.mxu0  ;;  %v298_v56 = vpop.f32.mrf.mxu1  ;;  %v311_v57 = vadd.f32 %v310_v53, %v293_v45  ;;  %v303_v58 = vadd.f32 %v302_v54, %v283_v50 }
 0x109   :  { %v289_v59 = vadd.f32 %v288_v55, %v65_v41  ;;  %v299_v60 = vadd.f32 %v298_v56, %v65_v41 }
 0x10a   :  { %312 = vadd.xlane.f32.xlu1 %v311_v57  ;;  %304 = vadd.xlane.f32.xlu0 %v303_v58 }
 0x10b   :  { %v314_v63 = vsel %vm301_vm0, %v299_v60, 0.0  ;;  %v306_v0 = vsel %vm301_vm0, %v289_v59, 0.0 }
 0x10c   :  { %v315_v1 = vadd.f32 %v314_v63, %v297_v62  ;;  %v307_v2 = vadd.f32 %v306_v0, %v287_v61 }
 0x10e   :  { %316 = vadd.xlane.f32.xlu1 %v315_v1  ;;  %308 = vadd.xlane.f32.xlu0 %v307_v2 }
 0x193   :  { %v313_v3 = vpop.xlane.xlu1 %312  ;;  %v305_v4 = vpop.xlane.xlu0 %304 }
 0x194   :  { %v321_v5 = vmul.f32 0.00625, %v313_v3  ;;  %v319_v6 = vmul.f32 0.00625, %v305_v4 }
 0x196   :  { %v739_v7 = vsub.f32 %v295_v49, %v321_v5  ;;  %v323_v8 = vsub.f32 %v283_v50, %v319_v6  ;;  %v324_v9 = vsub.f32 %v285_v48, %v319_v6  ;;  %v741_v10 = vsub.f32 %v293_v45, %v321_v5  ;;  %v375_v49 = vld [vmem:[%s800_s3] sm:$0x3] }
 0x197   :  { %v317_v11 = vpop.xlane.xlu1 %316  ;;  %v309_v12 = vpop.xlane.xlu0 %308  ;;  %v395_v50 = vld [vmem:[%s801_s4] sm:$0x3]  ;;  %v380_v51 = vrot.slane %v375_v49, %v728_v39  ;;  %v384_v52 = vrot.slane %v375_v49, %v726_v38 }
 0x198   :  { %v322_v13 = vmul.f32 0.00625, %v317_v11  ;;  %v320_v14 = vmul.f32 0.00625, %v309_v12  ;;  %v331_v15 = vmul.f32 %v323_v8, %v323_v8  ;;  %v332_v16 = vmul.f32 %v324_v9, %v324_v9 }
 0x199   :  { %v336_v17 = vmul.f32 %v739_v7, %v739_v7  ;;  %v335_v24 = vmul.f32 %v741_v10, %v741_v10  ;;  %v400_v54 = vrot.slane %v395_v50, %v728_v39  ;;  %v404_v55 = vrot.slane %v395_v50, %v726_v38 }
 0x19a   :  { %v745_v18 = vsub.f32 %v299_v60, %v322_v13  ;;  %v325_v19 = vsub.f32 %v287_v61, %v320_v14  ;;  %v326_v20 = vsub.f32 %v289_v59, %v320_v14  ;;  %v747_v21 = vsub.f32 %v297_v62, %v322_v13 }
 0x19b   :  { %v339_v22 = vsel %vm301_vm0, %v332_v16, 0.0  ;;  %v347_v27 = vsel %vm301_vm0, %v336_v17, 0.0 }
 0x19c   :  { %v340_v23 = vadd.f32 %v339_v22, %v331_v15  ;;  %v333_v25 = vmul.f32 %v325_v19, %v325_v19  ;;  %v334_v26 = vmul.f32 %v326_v20, %v326_v20  ;;  %v338_v28 = vmul.f32 %v745_v18, %v745_v18 }
 0x19d   :  { %v337_v31 = vmul.f32 %v747_v21, %v747_v21  ;;  %v348_v32 = vadd.f32 %v347_v27, %v335_v24 }
 0x19e   :  { %341 = vadd.xlane.f32.xlu0 %v340_v23  ;;  %v343_v29 = vsel %vm301_vm0, %v334_v26, 0.0  ;;  %v351_v33 = vsel %vm301_vm0, %v338_v28, 0.0 }
 0x19f   :  { %v344_v30 = vadd.f32 %v343_v29, %v333_v25  ;;  %v352_v34 = vadd.f32 %v351_v33, %v337_v31 }
 0x1a1   :  { %345 = vadd.xlane.f32.xlu1 %v344_v30 }
 0x1a2   :  { %349 = vadd.xlane.f32.xlu0 %v348_v32 }
 0x1a5   :  { %353 = vadd.xlane.f32.xlu1 %v352_v34 }
 0x227   :  { %v342_v35 = vpop.xlane.xlu0 %341 }
 0x228   :  { %v355_v36 = vmul.f32 0.00625, %v342_v35 }
 0x22a   :  { %v359_v37 = vadd.f32 1e-05, %v355_v36  ;;  %v346_v40 = vpop.xlane.xlu1 %345 }
 0x22b   :  { %v356_v41 = vmul.f32 0.00625, %v346_v40  ;;  %v350_v42 = vpop.xlane.xlu0 %349 }
 0x22c   :  { %580 = vrsqrt.f32 %v359_v37  ;;  %v357_v43 = vmul.f32 0.00625, %v350_v42 }
 0x22d   :  { %v360_v44 = vadd.f32 1e-05, %v356_v41 }
 0x22e   :  { %v361_v45 = vadd.f32 1e-05, %v357_v43  ;;  %v354_v46 = vpop.xlane.xlu1 %353 }
 0x22f   :  { %582 = vrsqrt.f32 %v360_v44  ;;  %v358_v47 = vmul.f32 0.00625, %v354_v46 }
 0x230   :  { %584 = vrsqrt.f32 %v361_v45 }
 0x231   :  { %v362_v48 = vadd.f32 1e-05, %v358_v47 }
 0x233   :  { %586 = vrsqrt.f32 %v362_v48 }
 0x239   :  { %v581_v53 = vpop.eup %580 }
 0x23a   :  { %v367_v56 = vmul.f32 %v581_v53, %v323_v8  ;;  %v368_v57 = vmul.f32 %v581_v53, %v324_v9 }
 0x23c   :  { %v583_v58 = vpop.eup %582  ;;  %v387_v59 = vmul.f32 %v380_v51, %v367_v56  ;;  %v388_v60 = vmul.f32 %v384_v52, %v368_v57 }
 0x23d   :  { %v585_v61 = vpop.eup %584  ;;  %v369_v62 = vmul.f32 %v583_v58, %v325_v19  ;;  %v370_v63 = vmul.f32 %v583_v58, %v326_v20 }
 0x23e   :  { %v407_v0 = vadd.f32 %v400_v54, %v387_v59  ;;  %v408_v1 = vadd.f32 %v404_v55, %v388_v60  ;;  %v371_v2 = vmul.f32 %v585_v61, %v741_v10  ;;  %v372_v3 = vmul.f32 %v585_v61, %v739_v7 }
 0x23f   :  { %v389_v38 = vmul.f32 %v380_v51, %v369_v62  ;;  %v390_v4 = vmul.f32 %v384_v52, %v370_v63 }
 0x240   :  { %v587_v5 = vpop.eup %586  ;;  %v490_v6 = vpack.c.bf16 %v408_v1, %v407_v0  ;;  %v391_v8 = vmul.f32 %v380_v51, %v371_v2  ;;  %v392_v9 = vmul.f32 %v384_v52, %v372_v3 }
 0x241   :  { %v409_v11 = vadd.f32 %v400_v54, %v389_v38  ;;  %v410_v12 = vadd.f32 %v404_v55, %v390_v4  ;;  %v373_v13 = vmul.f32 %v587_v5, %v747_v21  ;;  %v374_v14 = vmul.f32 %v587_v5, %v745_v18 }
 0x242   :  { %442 = vst.msk [vmem:[%s802_s5] sm:$0xff] %vm771_vm3, %v490_v6  ;;  %v411_v7 = vadd.f32 %v400_v54, %v391_v8  ;;  %v412_v10 = vadd.f32 %v404_v55, %v392_v9 }
 0x243   :  { %v491_v15 = vpack.c.bf16 %v410_v12, %v409_v11  ;;  %v393_v16 = vmul.f32 %v380_v51, %v373_v13  ;;  %v394_v17 = vmul.f32 %v384_v52, %v374_v14 }
 0x244   :  { %v492_v19 = vpack.c.bf16 %v412_v10, %v411_v7 }
 0x245   :  { %443 = vst.msk [vmem:[%s802_s5 + $0x8] sm:$0xff] %vm771_vm3, %v491_v15  ;;  %v413_v20 = vadd.f32 %v400_v54, %v393_v16  ;;  %v414_v18 = vadd.f32 %v404_v55, %v394_v17 }
 0x246   :  { %444 = vst.msk [vmem:[%s802_s5 + $0x10] sm:$0xff] %vm771_vm3, %v492_v19 }
 0x247   :  { %v493_v21 = vpack.c.bf16 %v414_v18, %v413_v20 }
 0x249   :  { %445 = vst.msk [vmem:[%s802_s5 + $0x18] sm:$0xff] %vm771_vm3, %v493_v21 }

// kernel: encoder_decoder_forward.10
= control target key start
LH: loop header
LB: loop body
LE: loop exit
PB: predicated region body
PF: predicated region fallthrough
CT: control target
= control target key end

     0   :  { %s1222_s1 = inlined_call_operand.vmem [shape: bf16[640,256], index: 1, kind: input, shape index: {}]   ;;  %s1223_s0 = inlined_call_operand.vmem [shape: bf16[8,640], index: 0, kind: input, shape index: {}]   ;;  %s1224_s2 = inlined_call_operand.vmem [shape: f32[1,256], index: 2, kind: input, shape index: {}]   ;;  %s1225_s3 = inlined_call_operand.vmem [shape: f32[1,256], index: 3, kind: input, shape index: {}]   ;;  %s1226_s4 = inlined_call_operand.vmem [shape: f32[1,256], index: 4, kind: input, shape index: {}]   ;;  %s1227_s5 = inlined_call_operand.vmem [shape: bf16[8,256], index: 5, kind: output, shape index: {}]  }
   0x1   :  { %v803_v0 = vld [vmem:[%s1222_s1 + $0x74] ss:$8 sps:$4 sm:$0xff]   ;;  %v805_v1 = vld [vmem:[%s1222_s1 + $0x70] ss:$8 sps:$4 sm:$0xff]   ;;  %v809_v4 = vld [vmem:[%s1222_s1 + $0x64] ss:$8 sps:$4 sm:$0xff]  }
   0x2   :  { %534 = vmatprep.subr.bf16.mxu0 %v803_v0  ;;  %v806_v2 = vld [vmem:[%s1222_s1 + $0x174] ss:$8 sps:$4 sm:$0xff]   ;;  %v808_v3 = vld [vmem:[%s1222_s1 + $0x170] ss:$8 sps:$4 sm:$0xff]   ;;  %v811_v5 = vld [vmem:[%s1222_s1 + $0x60] ss:$8 sps:$4 sm:$0xff]  }
   0x3   :  { %535 = vmatpush1.bf16.msra.mxu0 %v805_v1  ;;  %575 = vmatprep.subr.bf16.mxu1 %v806_v2  ;;  %v812_v6 = vld [vmem:[%s1222_s1 + $0x164] ss:$8 sps:$4 sm:$0xff]   ;;  %v814_v7 = vld [vmem:[%s1222_s1 + $0x160] ss:$8 sps:$4 sm:$0xff]   ;;  %v815_v8 = vld [vmem:[%s1222_s1 + $0x54] ss:$8 sps:$4 sm:$0xff]  }
   0x4   :  { %576 = vmatpush1.bf16.msra.mxu1 %v808_v3  ;;  %536 = vmatprep.subr.bf16.mxu0 %v809_v4  ;;  %v817_v9 = vld [vmem:[%s1222_s1 + $0x50] ss:$8 sps:$4 sm:$0xff]   ;;  %v818_v10 = vld [vmem:[%s1222_s1 + $0x154] ss:$8 sps:$4 sm:$0xff]   ;;  %v821_v11 = vld [vmem:[%s1222_s1 + $0x44] ss:$8 sps:$4 sm:$0xff]  }
   0x5   :  { %577 = vmatprep.subr.bf16.mxu1 %v812_v6  ;;  %v820_v12 = vld [vmem:[%s1222_s1 + $0x150] ss:$8 sps:$4 sm:$0xff]   ;;  %v824_v13 = vld [vmem:[%s1222_s1 + $0x144] ss:$8 sps:$4 sm:$0xff]   ;;  %v823_v14 = vld [vmem:[%s1222_s1 + $0x40] ss:$8 sps:$4 sm:$0xff]  }
   0x6   :  { %v827_v15 = vld [vmem:[%s1222_s1 + $0x34] ss:$8 sps:$4 sm:$0xff]   ;;  %v826_v16 = vld [vmem:[%s1222_s1 + $0x140] ss:$8 sps:$4 sm:$0xff]   ;;  %v829_v18 = vld [vmem:[%s1222_s1 + $0x30] ss:$8 sps:$4 sm:$0xff]  }
   0x7   :  { %537 = vmatpush1.bf16.msra.mxu0 %v811_v5  ;;  %v830_v17 = vld [vmem:[%s1222_s1 + $0x134] ss:$8 sps:$4 sm:$0xff]   ;;  %v833_v19 = vld [vmem:[%s1222_s1 + $0x24] ss:$8 sps:$4 sm:$0xff]   ;;  %v832_v20 = vld [vmem:[%s1222_s1 + $0x130] ss:$8 sps:$4 sm:$0xff]  }
   0x8   :  { %538 = vmatprep.subr.bf16.mxu0 %v815_v8  ;;  %578 = vmatpush1.bf16.msra.mxu1 %v814_v7  ;;  %v836_v21 = vld [vmem:[%s1222_s1 + $0x124] ss:$8 sps:$4 sm:$0xff]   ;;  %v835_v22 = vld [vmem:[%s1222_s1 + $0x20] ss:$8 sps:$4 sm:$0xff]   ;;  %v839_v23 = vld [vmem:[%s1222_s1 + $0x14] ss:$8 sps:$4 sm:$0xff]  }
   0x9   :  { %579 = vmatprep.subr.bf16.mxu1 %v818_v10  ;;  %v838_v24 = vld [vmem:[%s1222_s1 + $0x120] ss:$8 sps:$4 sm:$0xff]   ;;  %v842_v25 = vld [vmem:[%s1222_s1 + $0x114] ss:$8 sps:$4 sm:$0xff]   ;;  %v841_v26 = vld [vmem:[%s1222_s1 + $0x10] ss:$8 sps:$4 sm:$0xff]  }
   0xa   :  { %v845_v27 = vld [vmem:[%s1222_s1 + $0x4] ss:$8 sps:$4 sm:$0xff]   ;;  %v844_v28 = vld [vmem:[%s1222_s1 + $0x110] ss:$8 sps:$4 sm:$0xff]   ;;  %v847_v30 = vld [vmem:[%s1222_s1] ss:$8 sps:$4 sm:$0xff]  }
   0xb   :  { %539 = vmatpush1.bf16.msra.mxu0 %v817_v9  ;;  %v848_v29 = vld [vmem:[%s1222_s1 + $0x104] ss:$8 sps:$4 sm:$0xff]   ;;  %v851_v31 = vld [vmem:[%s1222_s1 + $0xf4] ss:$8 sps:$4 sm:$0xff]   ;;  %v850_v32 = vld [vmem:[%s1222_s1 + $0x100] ss:$8 sps:$4 sm:$0xff]  }
   0xc   :  { %540 = vmatprep.subr.bf16.mxu0 %v821_v11  ;;  %580 = vmatpush1.bf16.msra.mxu1 %v820_v12  ;;  %v854_v33 = vld [vmem:[%s1222_s1 + $0x1f4] ss:$8 sps:$4 sm:$0xff]   ;;  %v853_v34 = vld [vmem:[%s1222_s1 + $0xf0] ss:$8 sps:$4 sm:$0xff]   ;;  %v857_v35 = vld [vmem:[%s1222_s1 + $0xe4] ss:$8 sps:$4 sm:$0xff]  }
   0xd   :  { %581 = vmatprep.subr.bf16.mxu1 %v824_v13  ;;  %v856_v36 = vld [vmem:[%s1222_s1 + $0x1f0] ss:$8 sps:$4 sm:$0xff]   ;;  %v860_v37 = vld [vmem:[%s1222_s1 + $0x1e4] ss:$8 sps:$4 sm:$0xff]   ;;  %v859_v38 = vld [vmem:[%s1222_s1 + $0xe0] ss:$8 sps:$4 sm:$0xff]  }
   0xe   :  { %v863_v39 = vld [vmem:[%s1222_s1 + $0xd4] ss:$8 sps:$4 sm:$0xff]   ;;  %v862_v40 = vld [vmem:[%s1222_s1 + $0x1e0] ss:$8 sps:$4 sm:$0xff]   ;;  %v865_v42 = vld [vmem:[%s1222_s1 + $0xd0] ss:$8 sps:$4 sm:$0xff]  }
   0xf   :  { %541 = vmatpush1.bf16.msra.mxu0 %v823_v14  ;;  %v866_v41 = vld [vmem:[%s1222_s1 + $0x1d4] ss:$8 sps:$4 sm:$0xff]   ;;  %v869_v43 = vld [vmem:[%s1222_s1 + $0xc4] ss:$8 sps:$4 sm:$0xff]   ;;  %v868_v44 = vld [vmem:[%s1222_s1 + $0x1d0] ss:$8 sps:$4 sm:$0xff]  }
  0x10   :  { %542 = vmatprep.subr.bf16.mxu0 %v827_v15  ;;  %582 = vmatpush1.bf16.msra.mxu1 %v826_v16  ;;  %v872_v45 = vld [vmem:[%s1222_s1 + $0x1c4] ss:$8 sps:$4 sm:$0xff]   ;;  %v871_v47 = vld [vmem:[%s1222_s1 + $0xc0] ss:$8 sps:$4 sm:$0xff]   ;;  %v875_v50 = vld [vmem:[%s1222_s1 + $0xb4] ss:$8 sps:$4 sm:$0xff]  }
  0x11   :  { %583 = vmatprep.subr.bf16.mxu1 %v830_v17  ;;  %v21_v46 = vld [vmem:[%s1223_s0] sm:$0xff]  ;;  %v22_v51 = vld [vmem:[%s1223_s0 + $0x8] sm:$0xff]  ;;  %v878_v52 = vld [vmem:[%s1222_s1 + $0x1b4] ss:$8 sps:$4 sm:$0xff]   ;;  %v930_v10 = vmov 0  }
  0x12   :  { %v716_v48 = vcombine.high %v21_v46, %v21_v46  ;;  %v874_v49 = vld [vmem:[%s1222_s1 + $0x1c0] ss:$8 sps:$4 sm:$0xff]   ;;  %v718_v53 = vcombine.high %v22_v51, %v22_v51  ;;  %v877_v54 = vld [vmem:[%s1222_s1 + $0xb0] ss:$8 sps:$4 sm:$0xff]   ;;  %v881_v55 = vld [vmem:[%s1222_s1 + $0xa4] ss:$8 sps:$4 sm:$0xff]   ;;  %v715_v5 = vcombine.low %v21_v46, %v21_v46  ;;  %v717_v7 = vcombine.low %v22_v51, %v22_v51 }
  0x13   :  { %543 = vmatpush1.bf16.msra.mxu0 %v829_v18  ;;  %v880_v56 = vld [vmem:[%s1222_s1 + $0x1b0] ss:$8 sps:$4 sm:$0xff]   ;;  %v884_v57 = vld [vmem:[%s1222_s1 + $0x1a4] ss:$8 sps:$4 sm:$0xff]   ;;  %v883_v58 = vld [vmem:[%s1222_s1 + $0xa0] ss:$8 sps:$4 sm:$0xff]  }
  0x14   :  { %544 = vmatprep.subr.bf16.mxu0 %v833_v19  ;;  %584 = vmatpush1.bf16.msra.mxu1 %v832_v20  ;;  %v887_v59 = vld [vmem:[%s1222_s1 + $0x94] ss:$8 sps:$4 sm:$0xff]   ;;  %v886_v60 = vld [vmem:[%s1222_s1 + $0x1a0] ss:$8 sps:$4 sm:$0xff]   ;;  %v889_v62 = vld [vmem:[%s1222_s1 + $0x90] ss:$8 sps:$4 sm:$0xff]  }
  0x15   :  { %585 = vmatprep.subr.bf16.mxu1 %v836_v21  ;;  %566 = vmatprep.mubr.bf16.mxu0 %v716_v48  ;;  %v890_v61 = vld [vmem:[%s1222_s1 + $0x194] ss:$8 sps:$4 sm:$0xff]   ;;  %v893_v63 = vld [vmem:[%s1222_s1 + $0x84] ss:$8 sps:$4 sm:$0xff]   ;;  %v892_v0 = vld [vmem:[%s1222_s1 + $0x190] ss:$8 sps:$4 sm:$0xff]  }
  0x16   :  { %607 = vmatprep.mubr.bf16.mxu1 %v718_v53  ;;  %v896_v1 = vld [vmem:[%s1222_s1 + $0x184] ss:$8 sps:$4 sm:$0xff]   ;;  %v895_v2 = vld [vmem:[%s1222_s1 + $0x80] ss:$8 sps:$4 sm:$0xff]   ;;  %v904_v3 = vld [vmem:[%s1222_s1 + $0x274] ss:$8 sps:$4 sm:$0xff]  }
  0x17   :  { %545 = vmatpush1.bf16.msra.mxu0 %v835_v22  ;;  %v901_v4 = vld [vmem:[%s1222_s1 + $0x180] ss:$8 sps:$4 sm:$0xff]   ;;  %v902_v6 = vld [vmem:[%s1222_s1 + $0x270] ss:$8 sps:$4 sm:$0xff]   ;;  %v909_v8 = vld [vmem:[%s1222_s1 + $0x264] ss:$8 sps:$4 sm:$0xff]  }
  0x18   :  { %546 = vmatprep.subr.bf16.mxu0 %v839_v23  ;;  %586 = vmatpush1.bf16.msra.mxu1 %v838_v24  ;;  %v907_v9 = vld [vmem:[%s1222_s1 + $0x260] ss:$8 sps:$4 sm:$0xff]   ;;  %v912_v11 = vld [vmem:[%s1222_s1 + $0x254] ss:$8 sps:$4 sm:$0xff]   ;;  %v910_v12 = vld [vmem:[%s1222_s1 + $0x250] ss:$8 sps:$4 sm:$0xff]  }
  0x19   :  { %587 = vmatprep.subr.bf16.mxu1 %v842_v25  ;;  %v915_v13 = vld [vmem:[%s1222_s1 + $0x244] ss:$8 sps:$4 sm:$0xff]   ;;  %v913_v14 = vld [vmem:[%s1222_s1 + $0x240] ss:$8 sps:$4 sm:$0xff]   ;;  %v918_v15 = vld [vmem:[%s1222_s1 + $0x234] ss:$8 sps:$4 sm:$0xff]  }
  0x1a   :  { %v916_v16 = vld [vmem:[%s1222_s1 + $0x230] ss:$8 sps:$4 sm:$0xff]   ;;  %v921_v17 = vld [vmem:[%s1222_s1 + $0x224] ss:$8 sps:$4 sm:$0xff]   ;;  %v919_v18 = vld [vmem:[%s1222_s1 + $0x220] ss:$8 sps:$4 sm:$0xff]  }
  0x1b   :  { %547 = vmatpush1.bf16.msra.mxu0 %v841_v26  ;;  %v924_v19 = vld [vmem:[%s1222_s1 + $0x214] ss:$8 sps:$4 sm:$0xff]   ;;  %v922_v20 = vld [vmem:[%s1222_s1 + $0x210] ss:$8 sps:$4 sm:$0xff]   ;;  %v927_v21 = vld [vmem:[%s1222_s1 + $0x204] ss:$8 sps:$4 sm:$0xff]  }
  0x1c   :  { %548 = vmatprep.subr.bf16.mxu0 %v845_v27  ;;  %588 = vmatpush1.bf16.msra.mxu1 %v844_v28  ;;  %v925_v22 = vld [vmem:[%s1222_s1 + $0x200] ss:$8 sps:$4 sm:$0xff]   ;;  %v900_v23 = vld [vmem:[%s1223_s0 + $0x10] ss:$0 sps:$4 sm:$0xff]  }
  0x1d   :  { %589 = vmatprep.subr.bf16.mxu1 %v848_v29 }
  0x1f   :  { %549 = vmatpush1.bf16.msra.mxu0 %v847_v30 }
  0x20   :  { %550 = vmatprep.subr.bf16.mxu0 %v851_v31  ;;  %590 = vmatpush1.bf16.msra.mxu1 %v850_v32  ;;  %v106_v32 = vlaneseq }
  0x21   :  { %591 = vmatprep.subr.bf16.mxu1 %v854_v33 }
  0x22   :  { %v107_v33 = vshrl.u32 %v106_v32, 7 }
  0x23   :  { %551 = vmatpush2.bf16.msra.mxu0 %v853_v34 }
  0x24   :  { %552 = vmatprep.subr.bf16.mxu0 %v857_v35  ;;  %592 = vmatpush2.bf16.msra.mxu1 %v856_v36  ;;  %v108_v34 = vsub.s32 0, %v107_v33  ;;  %v112_v35 = vsub.s32 1, %v107_v33  ;;  %v104_v36 = vld [vmem:[%s1224_s2] sm:$0x3] }
  0x25   :  { %593 = vmatprep.subr.bf16.mxu1 %v860_v37 }
  0x26   :  { %v109_v37 = vrot.slane %v104_v36, %v108_v34 }
  0x27   :  { %553 = vmatpush2.bf16.msra.mxu0 %v859_v38  ;;  %v113_v38 = vrot.slane %v104_v36, %v112_v35 }
  0x28   :  { %554 = vmatprep.subr.bf16.mxu0 %v863_v39  ;;  %594 = vmatpush2.bf16.msra.mxu1 %v862_v40 }
  0x29   :  { %595 = vmatprep.subr.bf16.mxu1 %v866_v41 }
  0x2b   :  { %555 = vmatpush2.bf16.msra.mxu0 %v865_v42 }
  0x2c   :  { %556 = vmatprep.subr.bf16.mxu0 %v869_v43  ;;  %596 = vmatpush2.bf16.msra.mxu1 %v868_v44 }
  0x2d   :  { %597 = vmatprep.subr.bf16.mxu1 %v872_v45 }
  0x2f   :  { %557 = vmatpush2.bf16.msra.mxu0 %v871_v47 }
  0x30   :  { %558 = vmatprep.subr.bf16.mxu0 %v875_v50  ;;  %598 = vmatpush2.bf16.msra.mxu1 %v874_v49 }
  0x31   :  { %599 = vmatprep.subr.bf16.mxu1 %v878_v52 }
  0x33   :  { %559 = vmatpush2.bf16.msra.mxu0 %v877_v54 }
  0x34   :  { %560 = vmatprep.subr.bf16.mxu0 %v881_v55  ;;  %600 = vmatpush2.bf16.msra.mxu1 %v880_v56 }
  0x35   :  { %601 = vmatprep.subr.bf16.mxu1 %v884_v57 }
  0x37   :  { %561 = vmatpush2.bf16.msra.mxu0 %v883_v58 }
  0x38   :  { %562 = vmatprep.subr.bf16.mxu0 %v887_v59  ;;  %602 = vmatpush2.bf16.msra.mxu1 %v886_v60  ;;  %v674_v60 = vld [vmem:[%s1225_s3] sm:$0x3] }
  0x39   :  { %603 = vmatprep.subr.bf16.mxu1 %v890_v61  ;;  %v688_v61 = vld [vmem:[%s1226_s4] sm:$0x3] }
  0x3b   :  { %563 = vmatpush2.bf16.msra.mxu0 %v889_v62  ;;  %v679_v62 = vrot.slane %v674_v60, %v108_v34 }
  0x3c   :  { %564 = vmatprep.subr.bf16.mxu0 %v893_v63  ;;  %604 = vmatpush2.bf16.msra.mxu1 %v892_v0  ;;  %v683_v63 = vrot.slane %v674_v60, %v112_v35 }
  0x3d   :  { %605 = vmatprep.subr.bf16.mxu1 %v896_v1  ;;  %v693_v1 = vrot.slane %v688_v61, %v108_v34 }
  0x3f   :  { %565 = vmatpush2.bf16.msra.mxu0 %v895_v2  ;;  %v697_v2 = vrot.slane %v688_v61, %v112_v35 }
  0x40   :  { %616 = vmatprep.subr.bf16.mxu0 %v904_v3  ;;  %606 = vmatpush2.bf16.msra.mxu1 %v901_v4 }
  0x42   :  { %567 = vmatmul.mubr.bf16.vlgmr.msra.gmra.mxu0 %v715_v5 }
  0x43   :  { %617 = vmatpush1.bf16.msra.mxu0 %v902_v6  ;;  %648 = vmatprep.mubr.bf16.mxu0 %v930_v10 }
  0x44   :  { %608 = vmatmul.mubr.bf16.vlgmr.msra.gmra.mxu1 %v717_v7  ;;  %618 = vmatprep.subr.bf16.mxu0 %v909_v8 }
  0x47   :  { %619 = vmatpush1.bf16.msra.mxu0 %v907_v9 }
  0x48   :  { %620 = vmatprep.subr.bf16.mxu0 %v912_v11 }
  0x4b   :  { %621 = vmatpush1.bf16.msra.mxu0 %v910_v12 }
  0x4c   :  { %622 = vmatprep.subr.bf16.mxu0 %v915_v13 }
  0x4f   :  { %623 = vmatpush1.bf16.msra.mxu0 %v913_v14 }
  0x50   :  { %624 = vmatprep.subr.bf16.mxu0 %v918_v15 }
  0x53   :  { %625 = vmatpush1.bf16.msra.mxu0 %v916_v16 }
  0x54   :  { %626 = vmatprep.subr.bf16.mxu0 %v921_v17 }
  0x57   :  { %627 = vmatpush1.bf16.msra.mxu0 %v919_v18 }
  0x58   :  { %628 = vmatprep.subr.bf16.mxu0 %v924_v19 }
  0x5b   :  { %629 = vmatpush1.bf16.msra.mxu0 %v922_v20 }
  0x5c   :  { %630 = vmatprep.subr.bf16.mxu0 %v927_v21 }
  0x5f   :  { %631 = vmatpush1.bf16.msra.mxu0 %v925_v22 }
  0x62   :  { %649 = vmatmul.mubr.bf16.vlgmr.msra.gmra.mxu0 %v900_v23 }
 0x102   :  { %v568_v24 = vpop.f32.mrf.mxu0 }
 0x103   :  { %v569_v39 = vadd.f32 %v568_v24, %v109_v37 }
 0x104   :  { %v570_v25 = vpop.f32.mrf.mxu0  ;;  %v609_v26 = vpop.f32.mrf.mxu1 }
 0x105   :  { %v571_v40 = vadd.f32 %v570_v25, %v113_v38  ;;  %v610_v42 = vadd.f32 %v609_v26, %v569_v39 }
 0x106   :  { %v572_v27 = vpop.f32.mrf.mxu0  ;;  %v611_v28 = vpop.f32.mrf.mxu1 }
 0x107   :  { %v612_v43 = vadd.f32 %v611_v28, %v571_v40 }
 0x108   :  { %v573_v29 = vpop.f32.mrf.mxu0  ;;  %v613_v30 = vpop.f32.mrf.mxu1 }
 0x10a   :  { %v614_v31 = vpop.f32.mrf.mxu1 }
 0x122   :  { %v650_v41 = vpop.f32.mrf.mxu0 }
 0x123   :  { %v651_v45 = vadd.f32 %v650_v41, %v610_v42 }
 0x124   :  { %v652_v44 = vpop.f32.mrf.mxu0 }
 0x125   :  { %v653_v46 = vadd.f32 %v652_v44, %v612_v43 }
 0x126   :  { %v654_v47 = vpop.f32.mrf.mxu0 }
 0x127   :  { %v657_v48 = vadd.f32 %v653_v46, %v651_v45 }
 0x128   :  { %v655_v49 = vpop.f32.mrf.mxu0 }
 0x129   :  { %658 = vadd.xlane.f32.xlu0 %v657_v48 }
 0x1b2   :  { %v659_v50 = vpop.xlane.xlu0 %658 }
 0x1b3   :  { %v661_v51 = vmul.f32 0.00390625, %v659_v50 }
 0x1b5   :  { %v662_v52 = vsub.f32 %v651_v45, %v661_v51  ;;  %v663_v53 = vsub.f32 %v653_v46, %v661_v51 }
 0x1b7   :  { %v664_v54 = vmul.f32 %v662_v52, %v662_v52  ;;  %v665_v55 = vmul.f32 %v663_v53, %v663_v53 }
 0x1b9   :  { %v666_v56 = vadd.f32 %v665_v55, %v664_v54 }
 0x1bb   :  { %667 = vadd.xlane.f32.xlu0 %v666_v56 }
 0x244   :  { %v668_v57 = vpop.xlane.xlu0 %667 }
 0x245   :  { %v669_v58 = vmul.f32 0.00390625, %v668_v57 }
 0x247   :  { %v670_v59 = vadd.f32 1e-05, %v669_v58 }
 0x249   :  { %928 = vrsqrt.f32 %v670_v59 }
 0x256   :  { %v929_v0 = vpop.eup %928 }
 0x257   :  { %v672_v3 = vmul.f32 %v929_v0, %v662_v52  ;;  %v673_v4 = vmul.f32 %v929_v0, %v663_v53 }
 0x259   :  { %v686_v5 = vmul.f32 %v679_v62, %v672_v3  ;;  %v687_v6 = vmul.f32 %v683_v63, %v673_v4 }
 0x25b   :  { %v700_v7 = vadd.f32 %v693_v1, %v686_v5  ;;  %v701_v8 = vadd.f32 %v697_v2, %v687_v6 }
 0x25d   :  { %v801_v9 = vpack.c.bf16 %v701_v8, %v700_v7 }
 0x25f   :  { %710 = vst [vmem:[%s1227_s5] sm:$0xff] %v801_v9 }

// kernel: encoder_decoder_forward.12
= control target key start
LH: loop header
LB: loop body
LE: loop exit
PB: predicated region body
PF: predicated region fallthrough
CT: control target
= control target key end

     0   :  { %s566_s0 = inlined_call_operand.vmem [shape: s32[64], index: 0, kind: input, shape index: {}]   ;;  %s567_s3 = inlined_call_operand.vmem [shape: bf16[2,16,1,128], index: 3, kind: input, shape index: {}, may-alias: {3,4}]   ;;  %s568_s4 = inlined_call_operand.vmem [shape: bf16[2,16,1,128], index: 4, kind: input, shape index: {}, may-alias: {3,4}]   ;;  %s569_s5 = inlined_call_operand.vmem [shape: bf16[2,64,1,128], index: 5, kind: output, shape index: {}]   ;;  %s570_s1 = inlined_call_operand.vmem [shape: s32[64], index: 1, kind: input, shape index: {}]   ;;  %s571_s2 = inlined_call_operand.vmem [shape: s32[64], index: 2, kind: input, shape index: {}]  }
   0x1   :  { %s10_s20 = sshll.u32 %s566_s0, 4  ;;  %s14_s23 = sshll.u32 %s570_s1, 4  ;;  %s11_s20 = int_to_ptr.vmem [resolvable:$true] %s10_s20  ;;  %s15_s23 = int_to_ptr.vmem [resolvable:$true] %s14_s23 }
   0x2   :  { %s392_s24 = scalar_lea.vmem %s11_s20, 16  ;;  %p397_p1 = scmp.lt.s32.totalorder %s11_s20, %s11_s20 }
   0x3   :  { %p393_p0 = scmp.ne.s32.totalorder %s11_s20, %s392_s24  ;;  %p398_p2 = scmp.lt.s32.totalorder %s392_s24, %s392_s24 }
   0x5   :  { %p399_p3 = por %p398_p2, %p397_p1 }
   0x7   :  { %p400_p4 = pnand %p399_p3, %p393_p0 }
   0x9   :  { %403 = shalt.err (!%p400_p4)  }
   0xa   :  { %s470_s25 = smov [#allocation3]   ;;  %s404_s26 = scalar_lea.vmem %s15_s23, 16 }
   0xb   :  { %13 = dma.vmem_to_smem %s11_s20, 16, %s470_s25, [#allocation2] }
   0xc   :  { %p405_p5 = scmp.ne.s32.totalorder %s15_s23, %s404_s26  ;;  %p409_p6 = scmp.lt.s32.totalorder %s15_s23, %s15_s23 }
   0xd   :  { %p410_p7 = scmp.lt.s32.totalorder %s404_s26, %s404_s26 }
   0xf   :  { %p411_p8 = por %p410_p7, %p409_p6 }
  0x11   :  { %p412_p9 = pnand %p411_p8, %p405_p5 }
  0x13   :  { %415 = shalt.err (!%p412_p9)  }
  0x14   :  { %s471_s0 = smov [#allocation4]   ;;  %s18_s28 = sshll.u32 %s571_s2, 4  ;;  %s19_s28 = int_to_ptr.vmem [resolvable:$true] %s18_s28 }
  0x15   :  { %17 = dma.vmem_to_smem %s15_s23, 16, %s471_s0, [#allocation2] }
  0x16   :  { %s416_s29 = scalar_lea.vmem %s19_s28, 16  ;;  %p421_p11 = scmp.lt.s32.totalorder %s19_s28, %s19_s28 }
  0x17   :  { %p417_p10 = scmp.ne.s32.totalorder %s19_s28, %s416_s29  ;;  %p422_p12 = scmp.lt.s32.totalorder %s416_s29, %s416_s29 }
  0x19   :  { %p423_p13 = por %p422_p12, %p421_p11 }
  0x1b   :  { %p424_p0 = pnand %p423_p13, %p417_p10 }
  0x1d   :  { %427 = shalt.err (!%p424_p0)  }
  0x1e   :  { %s472_s30 = smov [#allocation5]  }
  0x1f   :  { %21 = dma.vmem_to_smem %s19_s28, 16, %s472_s30, [#allocation2] }
  0x20   :  { %448 = dma.done.wait [#allocation2], 48 }
  0x21   :  { %449 = vsyncadd [#allocation2], 4294967248 }
  0x22   :  { %23 = sfence }
  0x23   :  { %s512_s6 = smov 0   ;;  %s514_s7 = smov 0  }
  0x24   :  { %s516_s8 = smov 0   ;;  %s518_s2 = smov 0  }
  0x25   :  { %s520_s9 = smov 0  }
  0x26 LB: > { %s38_s10 = sadd.s32 1, %s460_s8  ;;  %s41_s11 = sadd.s32 1, %s464_s2  ;;  %s468_s9 = sphi %s520_s9, %s29_s9   ;;  %s464_s2 = sphi %s518_s2, %s575_s2   ;;  %s460_s8 = sphi %s516_s8, %s574_s8   ;;  %s456_s7 = sphi %s514_s7, %s573_s7   ;;  %s452_s6 = sphi %s512_s6, %s572_s6  }
  0x27   : > { %p39_p1 = scmp.ge.s32.totalorder %s38_s10, 64  ;;  %p343_p2 = scmp.ge.s32.totalorder %s468_s9, 1 }
  0x28   : > { %p169_p3 = scmp.lt.s32.totalorder %s468_s9, 129 }
  0x29   : > { %s577_s10 = smov (%p39_p1, %s38_s10), 0  ;;  %s579_s11 = smov (!%p39_p1, %s41_s11), %s464_s2 }
  0x2a   : > { %p170_p4 = pnand %p343_p2, %p169_p3  ;;  %p43_p5 = scmp.ge.s32.totalorder %s579_s11, 2 }
  0x2b   : > { %s204_s12 = sld [smem:[#allocation3 + %s452_s6]] (!%p170_p4)  ;;  %p205_p6 = scmp.lt.s32.totalorder (!%p170_p4), %s456_s7, 1 }
  0x2c   : > { %s581_s11 = smov (%p43_p5, %s579_s11), 0  ;;  %173 = sbr.rel (%p170_p4) target bundleno = 69 (0x45), region = 28 }
  0x2d   : > { %s213_s13 = sld [smem:[#allocation4 + %s452_s6]] (!%p170_p4)  ;;  %p224_p7 = scmp.lt.s32.totalorder (!%p170_p4), %s452_s6, 63 }
  0x2e   : > { %s229_s15 = sld [smem:[#allocation5 + %s452_s6]] (!%p170_p4) }
  0x31   : > { %s583_s7 = smov (!%p205_p6, %s456_s7), 1  ;;  %p207_p8 = scmp.lt.s32.totalorder %s204_s12, 15  ;;  %vm241_vm0 = vcmask 1040384   ;;  %vm242_vm1 = vsmask.f32 256 }
  0x32   : > { %s225_s14 = scalar_select %p224_p7, %s452_s6, 63  ;;  %vm243_vm2 = vmand %vm241_vm0, %vm242_vm1 }
  0x33   : > { %s344_s16 = sshll.u32 %s583_s7, 4  ;;  %p216_p9 = scmp.lt.s32.totalorder %s213_s13, 15 }
  0x34   : > { %s585_s12 = smov (!%p207_p8, %s204_s12), 15  ;;  %s346_s18 = sshll.u32 %s583_s7, 6 }
  0x35   : > { %s587_s13 = smov (!%p216_p9, %s213_s13), 15  ;;  %s210_s17 = sadd.s32 %s344_s16, %s585_s12 }
  0x36   : > { %s211_s21 = scalar_lea.vmem %s567_s3, %s210_s17  ;;  %s219_s22 = sadd.s32 %s344_s16, %s587_s13 }
  0x37   : > { %s220_s25 = scalar_lea.vmem %s568_s4, %s219_s22  ;;  %s230_s26 = scvt.s32.f32 %s229_s15  ;;  %v232_v0 = vld [vmem:[%s211_s21] sm:$0x1] }
  0x38   : > { %v233_v1 = vunpack.c.l.bf16 %v232_v0  ;;  %v234_v2 = vld [vmem:[%s220_s25] sm:$0x1]  ;;  %s227_s1 = sadd.s32 %s346_s18, %s225_s14 }
  0x39   : > { %s231_s0 = smul.f32 1.5258789e-05, %s230_s26  ;;  %v235_v3 = vunpack.c.l.bf16 %v234_v2  ;;  %s228_s29 = scalar_lea.vmem %s569_s5, %s227_s1 }
  0x3a   : > { %v244_v8 = vld [vmem:[%s228_s29] sm:$0x1] }
  0x3b   : > { %v236_v4 = vsub.f32 %v235_v3, %v233_v1  ;;  %v237_v5 = vstv %s231_s0 }
  0x3d   : > { %v238_v6 = vmul.f32 %v237_v5, %v236_v4 }
  0x3f   : > { %v239_v7 = vadd.f32 %v238_v6, %v233_v1 }
  0x41   : > { %v240_v9 = vpack.c.bf16 %v239_v7, %v239_v7 }
  0x43   : > { %v245_v10 = vsel %vm243_vm2, %v240_v9, %v244_v8 }
  0x44   : > { %246 = vst [vmem:[%s228_s29] sm:$0x1] %v245_v10 }
  0x45 PF: > { %s29_s9 = sadd.s32 1, %s468_s9   ;;  %s572_s6 = smov %s460_s8 }
  0x46   : > { %p26_p10 = scmp.ge.s32.totalorder %s29_s9, 130   ;;  %s573_s7 = smov %s464_s2 }
  0x47   : > { %s574_s8 = smov %s577_s10  ;;  %s575_s2 = smov %s581_s11 }
  0x48   :  { %28 = sbr.rel (!%p26_p10) target bundleno = 38 (0x26), region = 61 }

// kernel: encoder_decoder_forward.11
= control target key start
LH: loop header
LB: loop body
LE: loop exit
PB: predicated region body
PF: predicated region fallthrough
CT: control target
= control target key end

     0   :  { %s3336_s0 = inlined_call_operand.vmem [shape: s32[3,16], index: 0, kind: input, shape index: {}]   ;;  %s3337_s3 = inlined_call_operand.vmem [shape: bf16[2,16,16,32], index: 3, kind: input, shape index: {}]   ;;  %s3338_s4 = inlined_call_operand.vmem [shape: bf16[2,8,8,64], index: 4, kind: input, shape index: {}, may-alias: {4,5}]   ;;  %s3339_s5 = inlined_call_operand.vmem [shape: bf16[2,8,8,64], index: 5, kind: input, shape index: {}, may-alias: {4,5}]   ;;  %s3340_s6 = inlined_call_operand.vmem [shape: bf16[2,4,4,160], index: 6, kind: input, shape index: {}, may-alias: {6,7}]   ;;  %s3341_s7 = inlined_call_operand.vmem [shape: bf16[2,4,4,160], index: 7, kind: input, shape index: {}, may-alias: {6,7}]   ;;  %s3342_s8 = inlined_call_operand.vmem [shape: bf16[2,2,2,256], index: 8, kind: input, shape index: {}, may-alias: {8,9}]   ;;  %s3343_s9 = inlined_call_operand.vmem [shape: bf16[2,2,2,256], index: 9, kind: input, shape index: {}, may-alias: {8,9}]   ;;  %s3344_s10 = inlined_call_operand.vmem [shape: bf16[32,64], index: 10, kind: input, shape index: {}]   ;;  %s3345_s11 = inlined_call_operand.vmem [shape: f32[1,64], index: 11, kind: input, shape index: {}]   ;;  %s3346_s12 = inlined_call_operand.vmem [shape: bf16[64,64], index: 12, kind: input, shape index: {}]   ;;  %s3347_s13 = inlined_call_operand.vmem [shape: f32[1,64], index: 13, kind: input, shape index: {}]   ;;  %s3348_s14 = inlined_call_operand.vmem [shape: bf16[160,64], index: 14, kind: input, shape index: {}]   ;;  %s3349_s15 = inlined_call_operand.vmem [shape: f32[1,64], index: 15, kind: input, shape index: {}]   ;;  %s3350_s16 = inlined_call_operand.vmem [shape: bf16[256,64], index: 16, kind: input, shape index: {}]   ;;  %s3351_s17 = inlined_call_operand.vmem [shape: f32[1,64], index: 17, kind: input, shape index: {}]   ;;  %s3352_s18 = inlined_call_operand.vmem [shape: bf16[16,8], index: 18, kind: input, shape index: {}]   ;;  %s3353_s19 = inlined_call_operand.vmem [shape: bf16[16,4], index: 19, kind: input, shape index: {}]   ;;  %s3354_s20 = inlined_call_operand.vmem [shape: bf16[16,2], index: 20, kind: input, shape index: {}]   ;;  %s3355_s21 = inlined_call_operand.vmem [shape: bf16[256,64], index: 21, kind: input, shape index: {}]   ;;  %s3356_s22 = inlined_call_operand.vmem [shape: f32[1,64], index: 22, kind: input, shape index: {}]   ;;  %s3357_s23 = inlined_call_operand.vmem [shape: f32[1,64], index: 23, kind: input, shape index: {}]   ;;  %s3358_s24 = inlined_call_operand.vmem [shape: bf16[64,8], index: 24, kind: input, shape index: {}]   ;;  %s3359_s25 = inlined_call_operand.vmem [shape: f32[1,8], index: 25, kind: input, shape index: {}]   ;;  %s3360_s26 = inlined_call_operand.vmem [shape: bf16[2,16,16,8], index: 26, kind: output, shape index: {}]   ;;  %s3361_s1 = inlined_call_operand.vmem [shape: s32[3,16], index: 1, kind: input, shape index: {}]   ;;  %s3362_s2 = inlined_call_operand.vmem [shape: s32[3,16], index: 2, kind: input, shape index: {}]  }
   0x1   :  { %3374 = sst [smem:[#allocation14_spill]] %s3336_s0 }
   0x2   :  { %3375 = sst [smem:[#allocation15_spill]] %s3337_s3 }
   0x3   :  { %3376 = sst [smem:[#allocation16_spill]] %s3338_s4 }
   0x4   :  { %3377 = sst [smem:[#allocation17_spill]] %s3339_s5 }
   0x5   :  { %3378 = sst [smem:[#allocation18_spill]] %s3340_s6  ;;  %s35_s6 = sshll.u32 %s3361_s1, 4  ;;  %s36_s6 = int_to_ptr.vmem [resolvable:$true] %s35_s6 }
   0x6   :  { %3379 = sst [smem:[#allocation19_spill]] %s3341_s7 }
   0x7   :  { %3380 = sst [smem:[#allocation20_spill]] %s3342_s8 }
   0x8   :  { %3381 = sst [smem:[#allocation21_spill]] %s3343_s9 }
   0x9   :  { %3382 = sst [smem:[#allocation22_spill]] %s3344_s10 }
   0xa   :  { %3383 = sst [smem:[#allocation23_spill]] %s3345_s11 }
   0xb   :  { %3384 = sst [smem:[#allocation24_spill]] %s3346_s12 }
   0xc   :  { %3385 = sst [smem:[#allocation25_spill]] %s3354_s20 }
   0xd   :  { %3386 = sst [smem:[#allocation26_spill]] %s3356_s22 }
   0xe   :  { %3387 = sst [smem:[#allocation27_spill]] %s3357_s23 }
   0xf   :  { %3388 = sst [smem:[#allocation28_spill]] %s3358_s24 }
  0x10   :  { %3389 = sst [smem:[#allocation29_spill]] %s3359_s25 }
  0x11   :  { %3390 = sst [smem:[#allocation30_spill]] %s3360_s26 }
  0x12   :  { %s3391_s9 = sld [smem:[#allocation14_spill]] }
  0x18   :  { %s31_s22 = sshll.u32 %s3391_s9, 4  ;;  %s32_s22 = int_to_ptr.vmem [resolvable:$true] %s31_s22 }
  0x19   :  { %s2775_s29 = scalar_lea.vmem %s32_s22, 64  ;;  %p2780_p1 = scmp.lt.s32.totalorder %s32_s22, %s32_s22 }
  0x1a   :  { %p2776_p0 = scmp.ne.s32.totalorder %s32_s22, %s2775_s29  ;;  %p2781_p2 = scmp.lt.s32.totalorder %s2775_s29, %s2775_s29 }
  0x1c   :  { %p2782_p3 = por %p2781_p2, %p2780_p1 }
  0x1e   :  { %p2783_p4 = pnand %p2782_p3, %p2776_p0 }
  0x20   :  { %2786 = shalt.err (!%p2783_p4)  }
  0x21   :  { %s2853_s0 = smov [#allocation4]   ;;  %s2787_s11 = scalar_lea.vmem %s36_s6, 64 }
  0x22   :  { %34 = dma.vmem_to_smem %s32_s22, 64, %s2853_s0, [#allocation3] }
  0x23   :  { %p2788_p5 = scmp.ne.s32.totalorder %s36_s6, %s2787_s11  ;;  %p2792_p6 = scmp.lt.s32.totalorder %s36_s6, %s36_s6 }
  0x24   :  { %p2793_p7 = scmp.lt.s32.totalorder %s2787_s11, %s2787_s11 }
  0x26   :  { %p2794_p8 = por %p2793_p7, %p2792_p6 }
  0x28   :  { %p2795_p9 = pnand %p2794_p8, %p2788_p5 }
  0x2a   :  { %2798 = shalt.err (!%p2795_p9)  }
  0x2b   :  { %s2854_s30 = smov [#allocation5]   ;;  %s39_s7 = sshll.u32 %s3362_s2, 4  ;;  %s40_s7 = int_to_ptr.vmem [resolvable:$true] %s39_s7 }
  0x2c   :  { %38 = dma.vmem_to_smem %s36_s6, 64, %s2854_s30, [#allocation3] }
  0x2d   :  { %s2799_s12 = scalar_lea.vmem %s40_s7, 64  ;;  %p2804_p11 = scmp.lt.s32.totalorder %s40_s7, %s40_s7 }
  0x2e   :  { %p2800_p10 = scmp.ne.s32.totalorder %s40_s7, %s2799_s12  ;;  %p2805_p12 = scmp.lt.s32.totalorder %s2799_s12, %s2799_s12 }
  0x30   :  { %p2806_p13 = por %p2805_p12, %p2804_p11 }
  0x32   :  { %p2807_p0 = pnand %p2806_p13, %p2800_p10 }
  0x34   :  { %2810 = shalt.err (!%p2807_p0)  }
  0x35   :  { %s2855_s22 = smov [#allocation6]  }
  0x36   :  { %42 = dma.vmem_to_smem %s40_s7, 64, %s2855_s22, [#allocation3] }
  0x37   :  { %2831 = dma.done.wait [#allocation3], 192 }
  0x38   :  { %2832 = vsyncadd [#allocation3], 4294967104 }
  0x39   :  { %44 = sfence }
  0x3a   :  { %s3005_s8 = smov 0   ;;  %s3007_s3 = smov 0  }
  0x3b   :  { %s3009_s27 = smov 0   ;;  %s3011_s2 = smov 0  }
  0x3c   :  { %s3013_s5 = smov 0  }
  0x3d LB: > { %3392 = sst [smem:[#allocation8_spill]] %s2843_s27  ;;  %s59_s9 = sadd.s32 1, %s2843_s27  ;;  %s2851_s5 = sphi %s3013_s5, %s50_s5   ;;  %s2847_s2 = sphi %s3011_s2, %s3422_s2   ;;  %s2843_s27 = sphi %s3009_s27, %s3421_s27   ;;  %s2839_s3 = sphi %s3007_s3, %s3420_s3   ;;  %s2835_s8 = sphi %s3005_s8, %s3419_s8  }
  0x3e   : > { %3393 = sst [smem:[#allocation9_spill]] %s2847_s2  ;;  %s62_s28 = sadd.s32 1, %s2847_s2 }
  0x3f   : > { %3394 = sst [smem:[#allocation10_spill]] %s2851_s5  ;;  %p60_p1 = scmp.ge.s32.totalorder %s59_s9, 16 }
  0x40   : > { %p2427_p2 = scmp.ge.s32.totalorder %s2851_s5, 1  ;;  %p902_p3 = scmp.lt.s32.totalorder %s2851_s5, 33 }
  0x41   : > { %s3424_s9 = smov (%p60_p1, %s59_s9), 0  ;;  %s3426_s28 = smov (!%p60_p1, %s62_s28), %s2847_s2 }
  0x42   : > { %3395 = sst [smem:[#allocation11_spill]] %s3424_s9  ;;  %p903_p4 = pnand %p2427_p2, %p902_p3 }
  0x43   : > { %p64_p5 = scmp.ge.s32.totalorder %s3426_s28, 2 }
  0x44   : > { %906 = sbr.rel (%p903_p4) target bundleno = 1404 (0x57c), region = 112 }
  0x45   : > { %s3428_s28 = smov (%p64_p5, %s3426_s28), 0 }
  0x46   : > { %3396 = sst [smem:[#allocation12_spill]] %s3428_s28 }
  0x49   : > { %s3397_s29 = sld [smem:[#allocation24_spill]]  ;;  %v2856_v1 = vmov 0.0   ;;  %vm2857_vm0 = vmmov 0   ;;  %p1058_p6 = scmp.lt.s32.totalorder %s2839_s3, 1  ;;  %vm1225_vm1 = vcmask 261120   ;;  %vm1321_vm2 = vcmask 523264  }
  0x4a   : > { %2629 = vmatprep.subr.bf16.mxu1 %v2856_v1  ;;  %2621 = vmatprep.subr.bf16.mxu0 %v2856_v1  ;;  %s1067_s30 = sld [smem:[#allocation4 + %s2835_s8]]  ;;  %p1060_p7 = scmp.lt.s32.totalorder %s2835_s8, 15  ;;  %v2457_v31 = vld [vmem:[%s3347_s13] ss:$0 sm:$0xff]  ;;  %vm1377_vm3 = vcmask 1043456   ;;  %vm1373_vm4 = vcmask 64512  }
  0x4b   : > { %2637 = vmatprep.mubr.msk.bf16.mxu1 %vm2857_vm0, %v2856_v1  ;;  %2625 = vmatprep.mubr.msk.bf16.mxu0 %vm2857_vm0, %v2856_v1  ;;  %s3430_s3 = smov (!%p1058_p6, %s2839_s3), 1  ;;  %s1077_s1 = sld [smem:[#allocation5 + %s2835_s8]]  ;;  %v2726_v40 = vld [vmem:[%s3352_s18] sm:$0xff]   ;;  %v2727_v42 = vld [vmem:[%s3348_s14 + $0x38] sm:$0xff]   ;;  %v2859_v44 = vmov 0   ;;  %v2728_v45 = vld [vmem:[%s3348_s14 + $0x30] sm:$0xff]  }
  0x4c   : > { %s3398_s12 = sld [smem:[#allocation22_spill]]  ;;  %s3061_s6 = sshll.u32 %s3430_s3, 3  ;;  %v2729_v46 = vld [vmem:[%s3348_s14 + $0x28] sm:$0xff]   ;;  %v2730_v47 = vld [vmem:[%s3348_s14 + $0x20] sm:$0xff]   ;;  %v2731_v48 = vld [vmem:[%s3348_s14 + $0x18] sm:$0xff]   ;;  %vm1901_vm5 = vcmask 1048064  }
  0x4d   : > { %s1270_s0 = sld [smem:[#allocation6 + %s2835_s8]]  ;;  %s2429_s4 = sshll.u32 %s3430_s3, 5  ;;  %v2732_v49 = vld [vmem:[%s3348_s14 + $0x10] sm:$0xff]   ;;  %v2733_v50 = vld [vmem:[%s3348_s14 + $0x8] sm:$0xff]   ;;  %v2734_v51 = vld [vmem:[%s3348_s14] sm:$0xff]   ;;  %vm1587_vm6 = vcmask 1041408  }
  0x4e   : > { %s1061_s10 = scalar_select %p1060_p7, %s2835_s8, 15  ;;  %v2735_v52 = vld [vmem:[%s3348_s14 + $0x48] sm:$0xff]   ;;  %v2736_v53 = vld [vmem:[%s3348_s14 + $0x40] sm:$0xff]   ;;  %vm1583_vm7 = vcmask 31744   ;;  %vm1846_vm8 = vcmask 1040384   ;;  %vm1842_vm9 = vcmask 15360  }
  0x4f   : > { %v2719_v0 = vld [vmem:[%s3397_s29 + $0x18] sm:$0xff]   ;;  %v2720_v2 = vld [vmem:[%s3397_s29 + $0x10] sm:$0xff]   ;;  %v2721_v4 = vld [vmem:[%s3397_s29 + $0x8] sm:$0xff]   ;;  %s3399_s5 = sld [smem:[#allocation16_spill]]  ;;  %vm2203_vm10 = vcmask 60416  }
  0x50   : > { %2630 = vmatpush3.bf16.msra.mxu1 %v2719_v0  ;;  %p1070_p8 = scmp.lt.s32.totalorder %s1067_s30, 7  ;;  %v2722_v6 = vld [vmem:[%s3397_s29] sm:$0xff]   ;;  %s2428_s11 = sshll.u32 %s1061_s10, 1 }
  0x51   : > { %2631 = vmatprep.subr.bf16.mxu1 %v2856_v1  ;;  %p1080_p9 = scmp.lt.s32.totalorder %s1077_s1, 7  ;;  %s3081_s7 = sadd.s32 %s2429_s4, %s2428_s11 }
  0x52   : > { %v2723_v3 = vld [vmem:[%s3398_s12 + $0x8] sm:$0xff]   ;;  %v2724_v5 = vld [vmem:[%s3398_s12] sm:$0xff]   ;;  %s3432_s30 = smov (!%p1070_p8, %s1067_s30), 7  ;;  %3400 = sst [smem:[#allocation13_spill]] %s3081_s7 }
  0x53   : > { %2622 = vmatpush3.bf16.msra.mxu0 %v2723_v3  ;;  %s1271_s9 = scvt.s32.f32 %s1270_s0  ;;  %s1073_s28 = sadd.s32 %s3061_s6, %s3432_s30  ;;  %v2860_v3 = vmov 1983009808  }
  0x54   : > { %2632 = vmatpush3.bf16.msra.mxu1 %v2720_v2  ;;  %2623 = vmatprep.subr.bf16.mxu0 %v2856_v1  ;;  %s2432_s12 = sshll.u32 %s1073_s28, 2  ;;  %s3434_s1 = smov (!%p1080_p9, %s1077_s1), 7 }
  0x55   : > { %2633 = vmatprep.subr.bf16.mxu1 %v2856_v1  ;;  %s1075_s26 = scalar_lea.vmem %s3399_s5, %s2432_s12  ;;  %s1272_s0 = smul.f32 1.5258789e-05, %s1271_s9 }
  0x56   : > { %v1273_v7 = vld [vmem:[%s1075_s26] sm:$0xf]  ;;  %s3370_s22 = sshll.u32 %s3081_s7, 2  ;;  %s1083_s29 = sadd.s32 %s3061_s6, %s3434_s1 }
  0x57   : > { %2624 = vmatpush3.bf16.msra.mxu0 %v2724_v5  ;;  %s3401_s28 = sld [smem:[#allocation15_spill]]  ;;  %s2434_s23 = sshll.u32 %s1083_s29, 2  ;;  %v1274_v9 = vunpack.c.l.bf16 %v1273_v7  ;;  %v1278_v12 = vstv %s1272_s0  ;;  %v1650_v5 = vlaneseq }
  0x58   : > { %2634 = vmatpush3.bf16.msra.mxu1 %v2721_v4  ;;  %2641 = vmatprep.subr.bf16.mxu0 %v2856_v1  ;;  %s3402_s5 = sld [smem:[#allocation17_spill]]  ;;  %s3373_s9 = sand.u32 127, %s2835_s8  ;;  %v1648_v4 = vunpack.c.l.s4 %v2860_v3  ;;  %v2763_v3 = vld [vmem:[%s3355_s21 + $0x58] sm:$0xff]  }
  0x59   : > { %2635 = vmatprep.subr.bf16.mxu1 %v2856_v1  ;;  %s3412_s24 = sld [smem:[#allocation26_spill]] }
  0x5c   : > { %2636 = vmatpush3.bf16.msra.mxu1 %v2722_v6 }
  0x5d   : > { %2647 = vmatprep.subr.bf16.mxu1 %v2856_v1  ;;  %s1066_s25 = scalar_lea.vmem %s3401_s28, %s3370_s22 }
  0x5e   : > { %v2725_v8 = vld [vmem:[%s1066_s25] sm:$0xff]   ;;  %s1085_s12 = scalar_lea.vmem %s3402_s5, %s2434_s23  ;;  %s1087_s23 = sshra.s32 %s2835_s8, 7 }
  0x5f   : > { %v1275_v10 = vld [vmem:[%s1085_s12] sm:$0xf]  ;;  %2626 = vmatmul.mubr.msk.bf16.vlgmr.msra.gmra.mxu0 %vm1225_vm1, %v2725_v8  ;;  %s3101_s25 = sshll.u32 %s1087_s23, 7  ;;  %s3403_s23 = sld [smem:[#allocation18_spill]]  ;;  %v1649_v8 = vunpack.c.0.s8 %v1648_v4  ;;  %v2764_v4 = vld [vmem:[%s3355_s21 + $0x18] sm:$0xff]  }
  0x60   : > { %v1276_v11 = vunpack.c.l.bf16 %v1275_v10  ;;  %2643 = vmatprep.mubr.msk.bf16.mxu0 %vm2857_vm0, %v2856_v1  ;;  %s2545_s26 = sadd.s32 128, %s3101_s25 }
  0x61   : > { %s1093_s29 = sadd.s32 %s2545_s26, %s3373_s9  ;;  %s3404_s26 = sld [smem:[#allocation19_spill]] }
  0x62   : > { %v1277_v13 = vsub.f32 %v1276_v11, %v1274_v9  ;;  %s1094_s1 = sld [smem:[#allocation4 + %s1093_s29]] }
  0x63   : > { %s1119_s4 = sld [smem:[#allocation5 + %s1093_s29]] }
  0x64   : > { %v1279_v14 = vmul.f32 %v1278_v12, %v1277_v13  ;;  %s1429_s28 = sld [smem:[#allocation6 + %s1093_s29]]  ;;  %s2858_s29 = smov 64   ;;  %v2466_v12 = vld [vmem:[%s3349_s15] ss:$0 sm:$0xff] }
  0x66   : > { %v1280_v15 = vadd.f32 %v1279_v14, %v1274_v9  ;;  %v1651_v9 = vshrl.u32 %v1650_v5, 7  ;;  %v2765_v5 = vld [vmem:[%s3355_s21 + $0x50] sm:$0xff]  }
  0x68   : > { %v1281_v16 = vpack.c.bf16 %v1280_v15, %v1280_v15  ;;  %p1097_p10 = scmp.lt.s32.totalorder %s1094_s1, 3  ;;  %v1652_v11 = vsub.s32 %v1649_v8, %v1651_v9  ;;  %v2768_v8 = vld [vmem:[%s3355_s21 + $0x8] sm:$0xff]   ;;  %v2769_v9 = vld [vmem:[%s3355_s21 + $0x40] sm:$0xff]  }
  0x69   : > { %p1122_p11 = scmp.lt.s32.totalorder %s1119_s4, 3 }
  0x6a   : > { %2638 = vmatmul.mubr.msk.bf16.vlgmr.msra.gmra.mxu1 %vm1321_vm2, %v1281_v16  ;;  %s3436_s1 = smov (!%p1097_p10, %s1094_s1), 3  ;;  %s1430_s20 = scvt.s32.f32 %s1429_s28 }
  0x6b   : > { %2649 = vmatprep.mubr.msk.bf16.mxu1 %vm2857_vm0, %v2856_v1  ;;  %s3438_s4 = smov (!%p1122_p11, %s1119_s4), 3  ;;  %s2436_s11 = sshll.u32 %s3436_s1, 1 }
  0x6c   : > { %s2440_s0 = sshll.u32 %s3438_s4, 1  ;;  %s1101_s30 = sadd.s32 %s2436_s11, %s3061_s6 }
  0x6d   : > { %s1126_s10 = sadd.s32 %s2440_s0, %s3061_s6  ;;  %s2438_s27 = sshll.u32 %s1101_s30, 1 }
  0x6e   : > { %s2442_s2 = sshll.u32 %s1126_s10, 1  ;;  %s1103_s22 = scalar_lea.vmem %s3403_s23, %s2438_s27 }
  0x6f   : > { %s1128_s9 = scalar_lea.vmem %s3404_s26, %s2442_s2  ;;  %v1432_v17 = vld [vmem:[%s1103_s22] sm:$0xf]  ;;  %s1431_s1 = smul.f32 1.5258789e-05, %s1430_s20 }
  0x70   : > { %v1434_v18 = vld [vmem:[%s1128_s9] sm:$0xf]  ;;  %v1433_v19 = vunpack.c.l.bf16 %v1432_v17  ;;  %s3405_s6 = sld [smem:[#allocation23_spill]]  ;;  %s2549_s0 = sadd.s32 256, %s3101_s25 }
  0x71   : > { %v1435_v20 = vunpack.c.l.bf16 %v1434_v18  ;;  %v1437_v25 = vstv %s1431_s1  ;;  %s3406_s30 = sand.u32 127, %s2835_s8  ;;  %s2445_s25 = sshll.u32 %s3430_s3, 2 }
  0x72   : > { %s1143_s10 = sadd.s32 %s2549_s0, %s3406_s30  ;;  %s3407_s4 = sld [smem:[#allocation20_spill]] }
  0x73   : > { %v1436_v23 = vsub.f32 %v1435_v20, %v1433_v19  ;;  %s1144_s28 = sld [smem:[#allocation4 + %s1143_s10]] }
  0x74   : > { %s1168_s27 = sld [smem:[#allocation5 + %s1143_s10]] }
  0x75   : > { %v1438_v28 = vmul.f32 %v1437_v25, %v1436_v23  ;;  %s1635_s5 = sld [smem:[#allocation6 + %s1143_s10]] }
  0x76   : > { %v2452_v21 = vld [vmem:[%s3405_s6] ss:$0 sm:$0xff]  ;;  %s3408_s20 = sld [smem:[#allocation21_spill]] }
  0x77   : > { %v1439_v32 = vadd.f32 %v1438_v28, %v1433_v19  ;;  %v2738_v19 = vld [vmem:[%s3350_s16 + $0x78] sm:$0xff]   ;;  %v2742_v28 = vld [vmem:[%s3350_s16 + $0x68] sm:$0xff]   ;;  %s3409_s26 = sld [smem:[#allocation25_spill]] }
  0x78   : > { %s3415_s30 = sld [smem:[#allocation29_spill]] }
  0x79   : > { %v1441_v36 = vcombine.high %v1439_v32, %v1439_v32  ;;  %v1443_v54 = vpack.c.bf16 %v1439_v32, %v1439_v32  ;;  %p1147_p12 = scmp.lt.s32.totalorder %s1144_s28, 1  ;;  %v2746_v32 = vld [vmem:[%s3350_s16 + $0x58] sm:$0xff]  }
  0x7a   : > { %p1171_p13 = scmp.lt.s32.totalorder %s1168_s27, 1 }
  0x7b   : > { %v1444_v43 = vpack.c.bf16 %v1441_v36, %v1441_v36  ;;  %s3440_s28 = smov (!%p1147_p12, %s1144_s28), 1  ;;  %s1636_s22 = scvt.s32.f32 %s1635_s5  ;;  %v2750_v36 = vld [vmem:[%s3350_s16 + $0x48] sm:$0xff]  }
  0x7c   : > { %s3442_s27 = smov (!%p1171_p13, %s1168_s27), 1  ;;  %s2444_s8 = sshll.u32 %s3440_s28, 1 }
  0x7d   : > { %s2447_s2 = sshll.u32 %s3442_s27, 1  ;;  %s1151_s12 = sadd.s32 %s2445_s25, %s2444_s8 }
  0x7e   : > { %s1175_s23 = sadd.s32 %s2447_s2, %s2445_s25  ;;  %s1152_s11 = scalar_lea.vmem %s3407_s4, %s1151_s12 }
  0x7f   : > { %s1176_s7 = scalar_lea.vmem %s3408_s20, %s1175_s23  ;;  %v1638_v61 = vld [vmem:[%s1152_s11] sm:$0x3]  ;;  %s1637_s9 = smul.f32 1.5258789e-05, %s1636_s22 }
  0x80   : > { %v1640_v62 = vld [vmem:[%s1176_s7] sm:$0x3]  ;;  %v1639_v63 = vunpack.c.l.bf16 %v1638_v61  ;;  %s3410_s2 = sld [smem:[#allocation28_spill]] }
  0x81   : > { %v1641_v0 = vunpack.c.l.bf16 %v1640_v62  ;;  %v1643_v6 = vstv %s1637_s9  ;;  %s3413_s20 = sld [smem:[#allocation13_spill]] }
  0x82   : > { %s3414_s9 = sld [smem:[#allocation27_spill]] }
  0x83   : > { %v1642_v2 = vsub.f32 %v1641_v0, %v1639_v63  ;;  %s3417_s8 = sld [smem:[#allocation30_spill]] }
  0x85   : > { %v1644_v7 = vmul.f32 %v1643_v6, %v1642_v2  ;;  %v2754_v2 = vld [vmem:[%s3409_s26] sm:$0xff]   ;;  %v2766_v6 = vld [vmem:[%s3355_s21 + $0x10] sm:$0xff]  }
  0x86   : > { %s3411_s12 = smov %s3410_s2 }
  0x87   : > { %v1645_v10 = vadd.f32 %v1644_v7, %v1639_v63  ;;  %v2767_v7 = vld [vmem:[%s3355_s21 + $0x48] sm:$0xff]   ;;  %s3416_s10 = sshll.u32 %s3413_s20, 2 }
  0x89   : > { %v1653_v13 = vrot.slane %v1645_v10, %v1652_v11  ;;  %v2770_v10 = vld [vmem:[%s3355_s21] sm:$0xff]   ;;  %s1193_s25 = scalar_lea.vmem %s3417_s8, %s3416_s10 }
  0x8b   : > { %v1654_v17 = vcombine.high %v1653_v13, %v1653_v13 }
  0x8d   : > { %v1658_v25 = vpack.c.bf16 %v1654_v17, %v1654_v17 }
 0x11f   : > { %v1263_v22 = vpop.f32.mrf.mxu0 }
 0x120   : > { %v1264_v24 = vadd.f32 %v2452_v21, %v1263_v22  ;;  %v2737_v22 = vld [vmem:[%s3353_s19] sm:$0xff]  }
 0x121   : > { %v2627_v26 = vpop.f32.mrf.mxu0 }
 0x122   : > { %1908 = vrot.lane.b32.xlu0 %v1264_v24, %s2858_s29  ;;  %v2739_v24 = vld [vmem:[%s3350_s16 + $0x38] sm:$0xff]   ;;  %v2740_v26 = vld [vmem:[%s3350_s16 + $0x70] sm:$0xff]  }
 0x123   : > { %v1266_v27 = vpop.f32.mrf.mxu0 }
 0x124   : > { %v1267_v29 = vadd.f32 %v2452_v21, %v1266_v27  ;;  %v2741_v27 = vld [vmem:[%s3350_s16 + $0x30] sm:$0xff]  }
 0x125   : > { %v2628_v30 = vpop.f32.mrf.mxu0 }
 0x126   : > { %1910 = vrot.lane.b32.xlu0 %v1267_v29, %s2858_s29  ;;  %v2743_v29 = vld [vmem:[%s3350_s16 + $0x28] sm:$0xff]   ;;  %v2744_v30 = vld [vmem:[%s3350_s16 + $0x60] sm:$0xff]  }
 0x12a   : > { %v1359_v33 = vpop.f32.mrf.mxu1 }
 0x12b   : > { %v1360_v34 = vadd.f32 %v2457_v31, %v1359_v33  ;;  %v2745_v31 = vld [vmem:[%s3350_s16 + $0x20] sm:$0xff]   ;;  %v2747_v33 = vld [vmem:[%s3350_s16 + $0x18] sm:$0xff]  }
 0x12c   : > { %v2639_v35 = vpop.f32.mrf.mxu1 }
 0x12d   : > { %v1367_v37 = vpack.c.bf16 %v1360_v34, %v1360_v34  ;;  %v2748_v34 = vld [vmem:[%s3350_s16 + $0x50] sm:$0xff]  }
 0x12e   : > { %v1362_v38 = vpop.f32.mrf.mxu1  ;;  %v2749_v35 = vld [vmem:[%s3350_s16 + $0x10] sm:$0xff]  }
 0x12f   : > { %v1379_v39 = vsel %vm1377_vm3, %v1367_v37, 0  ;;  %v2751_v37 = vld [vmem:[%s3350_s16 + $0x8] sm:$0xff]   ;;  %v2752_v38 = vld [vmem:[%s3350_s16 + $0x40] sm:$0xff]  }
 0x130   : > { %v2640_v41 = vpop.f32.mrf.mxu1  ;;  %2642 = vmatpush3.bf16.msra.mxu0 %v1379_v39  ;;  %v2753_v39 = vld [vmem:[%s3350_s16] sm:$0xff]  }
 0x131   : > { %1535 = vmatprep.subr.bf16.mxu0 %v2859_v44 }
 0x133   : > { %2644 = vmatmul.mubr.msk.bf16.vlgmr.msra.gmra.mxu0 %vm1373_vm4, %v2726_v40 }
 0x134   : > { %1536 = vmatpush1.bf16.msra.mxu0 %v2727_v42  ;;  %2477 = vmatprep.mubr.msk.bf16.mxu0 %vm1225_vm1, %v1444_v43  ;;  %v1657_v42 = vpack.c.bf16 %v1653_v13, %v1653_v13 }
 0x135   : > { %1537 = vmatprep.subr.bf16.mxu0 %v2859_v44 }
 0x138   : > { %1538 = vmatpush1.bf16.msra.mxu0 %v2728_v45  ;;  %v2756_v45 = vld [vmem:[%s3355_s21 + $0x38] sm:$0xff]  }
 0x139   : > { %1539 = vmatprep.subr.bf16.mxu0 %v2859_v44 }
 0x13c   : > { %1540 = vmatpush1.bf16.msra.mxu0 %v2729_v46  ;;  %v2757_v46 = vld [vmem:[%s3355_s21 + $0x70] sm:$0xff]  }
 0x13d   : > { %1541 = vmatprep.subr.bf16.mxu0 %v2859_v44 }
 0x140   : > { %1542 = vmatpush1.bf16.msra.mxu0 %v2730_v47  ;;  %v2758_v47 = vld [vmem:[%s3355_s21 + $0x30] sm:$0xff]  }
 0x141   : > { %1543 = vmatprep.subr.bf16.mxu0 %v2859_v44 }
 0x144   : > { %1544 = vmatpush1.bf16.msra.mxu0 %v2731_v48  ;;  %v2759_v48 = vld [vmem:[%s3355_s21 + $0x68] sm:$0xff]  }
 0x145   : > { %1545 = vmatprep.subr.bf16.mxu0 %v2859_v44 }
 0x148   : > { %1546 = vmatpush1.bf16.msra.mxu0 %v2732_v49  ;;  %v2760_v49 = vld [vmem:[%s3355_s21 + $0x28] sm:$0xff]  }
 0x149   : > { %1547 = vmatprep.subr.bf16.mxu0 %v2859_v44 }
 0x14c   : > { %1548 = vmatpush1.bf16.msra.mxu0 %v2733_v50  ;;  %v2761_v50 = vld [vmem:[%s3355_s21 + $0x60] sm:$0xff]  }
 0x14d   : > { %1549 = vmatprep.subr.bf16.mxu0 %v2859_v44 }
 0x150   : > { %1550 = vmatpush1.bf16.msra.mxu0 %v2734_v51 }
 0x151   : > { %1563 = vmatprep.subr.bf16.mxu0 %v2859_v44 }
 0x154   : > { %1564 = vmatpush2.bf16.msra.mxu0 %v2735_v52 }
 0x155   : > { %1565 = vmatprep.subr.bf16.mxu0 %v2859_v44  ;;  %v2755_v44 = vld [vmem:[%s3355_s21 + $0x78] sm:$0xff]  }
 0x158   : > { %1566 = vmatpush2.bf16.msra.mxu0 %v2736_v53  ;;  %v2762_v53 = vld [vmem:[%s3355_s21 + $0x20] sm:$0xff]  }
 0x159   : > { %2653 = vmatprep.subr.bf16.mxu0 %v2856_v1 }
 0x15b   : > { %1568 = vmatmul.mubr.bf16.vlgmr.msra.gmra.mxu0 %v1443_v54 }
 0x15c   : > { %2655 = vmatprep.mubr.msk.bf16.mxu0 %vm2857_vm0, %v2856_v1 }
 0x194   : > { %v1909_v55 = vpop.permute.xlu0 %1908 }
 0x198   : > { %v1911_v58 = vpop.permute.xlu0 %1910 }
 0x1f3   : > { %v1415_v56 = vpop.f32.mrf.mxu0 }
 0x1f4   : > { %1904 = vst.msk [vmem:[#allocation2 + $0x8] sm:$0xff] %vm1321_vm2, %v1415_v56 }
 0x1f5   : > { %v2645_v57 = vpop.f32.mrf.mxu0  ;;  %1914 = vst.msk [vmem:[#allocation2 + $0x8] sm:$0xff] %vm1901_vm5, %v1909_v55 }
 0x1f6   : > { %v2481_v57 = vld [vmem:[%s3351_s17] ss:$0 sm:$0xff] }
 0x1f7   : > { %v1418_v59 = vpop.f32.mrf.mxu0 }
 0x1f8   : > { %1905 = vst.msk [vmem:[#allocation2 + $0x18] sm:$0xff] %vm1321_vm2, %v1418_v59 }
 0x1f9   : > { %v2646_v60 = vpop.f32.mrf.mxu0  ;;  %1915 = vst.msk [vmem:[#allocation2 + $0x18] sm:$0xff] %vm1901_vm5, %v1911_v58 }
 0x1fc   : > { %v1917_v40 = vld [vmem:[#allocation2 + $0x8] sm:$0xff] }
 0x200   : > { %v1919_v41 = vld [vmem:[#allocation2 + $0x18] sm:$0xff] }
 0x201   : > { %v1921_v43 = vpack.c.bf16 %v1919_v41, %v1917_v40 }
 0x21b   : > { %v1569_v14 = vpop.f32.mrf.mxu0 }
 0x21c   : > { %v1570_v15 = vadd.f32 %v2466_v12, %v1569_v14 }
 0x21d   : > { %v1571_v16 = vpop.f32.mrf.mxu0 }
 0x21e   : > { %v1577_v18 = vpack.c.bf16 %v1570_v15, %v1570_v15 }
 0x21f   : > { %v1572_v20 = vpop.f32.mrf.mxu0 }
 0x220   : > { %v1589_v21 = vsel %vm1587_vm6, %v1577_v18, 0  ;;  %v2771_v20 = vld [vmem:[%s3410_s2 + $0x18] sm:$0xff]  }
 0x221   : > { %v1573_v23 = vpop.f32.mrf.mxu0  ;;  %2648 = vmatpush3.bf16.msra.mxu1 %v1589_v21  ;;  %v2772_v21 = vld [vmem:[%s3411_s12 + $0x10] sm:$0xff]  }
 0x222   : > { %2570 = vmatprep.subr.bf16.mxu1 %v2738_v19  ;;  %v2774_v23 = vld [vmem:[%s3411_s12] sm:$0xff]  }
 0x224   : > { %2650 = vmatmul.mubr.msk.bf16.vlgmr.msra.gmra.mxu1 %vm1583_vm7, %v2737_v22  ;;  %v2773_v22 = vld [vmem:[%s3411_s12 + $0x8] sm:$0xff]  }
 0x225   : > { %2571 = vmatpush3.bf16.msra.mxu1 %v2739_v24  ;;  %1826 = vmatprep.mubr.bf16.mxu1 %v1658_v25 }
 0x226   : > { %2572 = vmatprep.subr.bf16.mxu1 %v2740_v26  ;;  %v2516_v26 = vld [vmem:[%s3412_s24] ss:$0 sm:$0xff] }
 0x229   : > { %2573 = vmatpush3.bf16.msra.mxu1 %v2741_v27 }
 0x22a   : > { %2574 = vmatprep.subr.bf16.mxu1 %v2742_v28 }
 0x22d   : > { %2575 = vmatpush3.bf16.msra.mxu1 %v2743_v29 }
 0x22e   : > { %2576 = vmatprep.subr.bf16.mxu1 %v2744_v30  ;;  %v2517_v30 = vld [vmem:[%s3414_s9] ss:$0 sm:$0xff] }
 0x231   : > { %2577 = vmatpush3.bf16.msra.mxu1 %v2745_v31 }
 0x232   : > { %2578 = vmatprep.subr.bf16.mxu1 %v2746_v32 }
 0x235   : > { %2579 = vmatpush3.bf16.msra.mxu1 %v2747_v33 }
 0x236   : > { %2580 = vmatprep.subr.bf16.mxu1 %v2748_v34 }
 0x239   : > { %2581 = vmatpush3.bf16.msra.mxu1 %v2749_v35 }
 0x23a   : > { %2582 = vmatprep.subr.bf16.mxu1 %v2750_v36 }
 0x23d   : > { %2583 = vmatpush3.bf16.msra.mxu1 %v2751_v37 }
 0x23e   : > { %2584 = vmatprep.subr.bf16.mxu1 %v2752_v38  ;;  %v2518_v38 = vld [vmem:[%s3415_s30] ss:$0 sm:$0xff] }
 0x241   : > { %2585 = vmatpush3.bf16.msra.mxu1 %v2753_v39 }
 0x242   : > { %2594 = vmatprep.subr.bf16.mxu1 %v2755_v44 }
 0x244   : > { %1827 = vmatmul.mubr.bf16.vlgmr.msra.gmra.mxu1 %v1657_v42 }
 0x245   : > { %2082 = vmatprep.mubr.bf16.mxu1 %v1921_v43  ;;  %2595 = vmatpush3.bf16.msra.mxu1 %v2756_v45 }
 0x246   : > { %2596 = vmatprep.subr.bf16.mxu1 %v2757_v46 }
 0x249   : > { %2597 = vmatpush3.bf16.msra.mxu1 %v2758_v47 }
 0x24a   : > { %2598 = vmatprep.subr.bf16.mxu1 %v2759_v48 }
 0x24d   : > { %2599 = vmatpush3.bf16.msra.mxu1 %v2760_v49 }
 0x24e   : > { %2600 = vmatprep.subr.bf16.mxu1 %v2761_v50 }
 0x251   : > { %2601 = vmatpush3.bf16.msra.mxu1 %v2762_v53 }
 0x252   : > { %2602 = vmatprep.subr.bf16.mxu1 %v2763_v3 }
 0x255   : > { %2603 = vmatpush3.bf16.msra.mxu1 %v2764_v4 }
 0x256   : > { %2604 = vmatprep.subr.bf16.mxu1 %v2765_v5 }
 0x259   : > { %2605 = vmatpush3.bf16.msra.mxu1 %v2766_v6 }
 0x25a   : > { %2606 = vmatprep.subr.bf16.mxu1 %v2767_v7 }
 0x25d   : > { %2607 = vmatpush3.bf16.msra.mxu1 %v2768_v8 }
 0x25e   : > { %2608 = vmatprep.subr.bf16.mxu1 %v2769_v9 }
 0x261   : > { %2609 = vmatpush3.bf16.msra.mxu1 %v2770_v10 }
 0x2e4   : > { %v1625_v51 = vpop.f32.mrf.mxu1 }
 0x2e5   : > { %1895 = vrot.lane.b32.xlu1 %v1625_v51, %s2858_s29 }
 0x2e6   : > { %v2651_v52 = vpop.f32.mrf.mxu1 }
 0x2e8   : > { %v1628_v54 = vpop.f32.mrf.mxu1 }
 0x2e9   : > { %1897 = vrot.lane.b32.xlu1 %v1628_v54, %s2858_s29 }
 0x2ea   : > { %v2652_v55 = vpop.f32.mrf.mxu1 }
 0x304   : > { %v2586_v56 = vpop.f32.mrf.mxu1 }
 0x306   : > { %v2587_v58 = vpop.f32.mrf.mxu1 }
 0x307   : > { %v2588_v59 = vadd.f32 %v2587_v58, %v2586_v56 }
 0x308   : > { %v2589_v60 = vpop.f32.mrf.mxu1 }
 0x309   : > { %v1829_v61 = vadd.f32 %v2588_v59, %v2481_v57 }
 0x30a   : > { %v2590_v62 = vpop.f32.mrf.mxu1 }
 0x30b   : > { %v1836_v63 = vpack.c.bf16 %v1829_v61, %v1829_v61 }
 0x30d   : > { %v1848_v0 = vsel %vm1846_vm8, %v1836_v63, 0 }
 0x30e   : > { %2654 = vmatpush3.bf16.msra.mxu0 %v1848_v0 }
 0x30f   : > { %2659 = vmatprep.subr.bf16.mxu0 %v2856_v1 }
 0x311   : > { %2656 = vmatmul.mubr.msk.bf16.vlgmr.msra.gmra.mxu0 %vm1842_vm9, %v2754_v2 }
 0x312   : > { %2667 = vmatprep.mubr.msk.bf16.mxu0 %vm2857_vm0, %v2856_v1  ;;  %2660 = vmatpush3.bf16.msra.mxu0 %v2771_v20 }
 0x313   : > { %2661 = vmatprep.subr.bf16.mxu0 %v2856_v1 }
 0x316   : > { %2662 = vmatpush3.bf16.msra.mxu0 %v2772_v21 }
 0x317   : > { %2663 = vmatprep.subr.bf16.mxu0 %v2856_v1 }
 0x31a   : > { %2664 = vmatpush3.bf16.msra.mxu0 %v2773_v22 }
 0x31b   : > { %2665 = vmatprep.subr.bf16.mxu0 %v2856_v1 }
 0x31e   : > { %2666 = vmatpush3.bf16.msra.mxu0 %v2774_v23 }
 0x357   : > { %v1896_v11 = vpop.permute.xlu1 %1895 }
 0x35b   : > { %v1898_v15 = vpop.permute.xlu1 %1897 }
 0x3d1   : > { %v1884_v12 = vpop.f32.mrf.mxu0 }
 0x3d2   : > { %1891 = vst.msk [vmem:[#allocation2] sm:$0xff] %vm1321_vm2, %v1884_v12 }
 0x3d3   : > { %1902 = vst.msk [vmem:[#allocation2] sm:$0xff] %vm1901_vm5, %v1896_v11  ;;  %v2657_v13 = vpop.f32.mrf.mxu0 }
 0x3d5   : > { %v1887_v14 = vpop.f32.mrf.mxu0 }
 0x3d6   : > { %1892 = vst.msk [vmem:[#allocation2 + $0x10] sm:$0xff] %vm1321_vm2, %v1887_v14 }
 0x3d7   : > { %1903 = vst.msk [vmem:[#allocation2 + $0x10] sm:$0xff] %vm1901_vm5, %v1898_v15  ;;  %v2658_v16 = vpop.f32.mrf.mxu0 }
 0x3da   : > { %v1916_v17 = vld [vmem:[#allocation2] sm:$0xff] }
 0x3de   : > { %v1918_v18 = vld [vmem:[#allocation2 + $0x10] sm:$0xff] }
 0x3df   : > { %v1920_v19 = vpack.c.bf16 %v1918_v18, %v1916_v17 }
 0x3e1   : > { %2083 = vmatmul.mubr.bf16.vlgmr.msra.gmra.mxu1 %v1920_v19 }
 0x4a1   : > { %v2610_v24 = vpop.f32.mrf.mxu1 }
 0x4a3   : > { %v2611_v25 = vpop.f32.mrf.mxu1 }
 0x4a4   : > { %v2612_v27 = vadd.f32 %v2611_v25, %v2610_v24 }
 0x4a5   : > { %v2613_v28 = vpop.f32.mrf.mxu1 }
 0x4a6   : > { %v2098_v29 = vmul.f32 %v2612_v27, %v2516_v26 }
 0x4a7   : > { %v2614_v1 = vpop.f32.mrf.mxu1 }
 0x4a8   : > { %v2615_v31 = vadd.f32 %v2614_v1, %v2613_v28  ;;  %v2107_v32 = vadd.f32 %v2517_v30, %v2098_v29 }
 0x4aa   : > { %v2099_v33 = vmul.f32 %v2615_v31, %v2516_v26  ;;  %v2109_v35 = vmax.f32 %v2107_v32, 0.0 }
 0x4ac   : > { %v2108_v34 = vadd.f32 %v2517_v30, %v2099_v33 }
 0x4ae   : > { %v2110_v36 = vmax.f32 %v2108_v34, 0.0 }
 0x4b0   : > { %v2111_v37 = vpack.c.bf16 %v2110_v36, %v2109_v35 }
 0x4b2   : > { %2668 = vmatmul.mubr.msk.bf16.vlgmr.msra.gmra.mxu0 %vm1321_vm2, %v2111_v37 }
 0x572   : > { %v2188_v39 = vpop.f32.mrf.mxu0 }
 0x573   : > { %v2189_v40 = vadd.f32 %v2518_v38, %v2188_v39 }
 0x574   : > { %v2669_v41 = vpop.f32.mrf.mxu0 }
 0x575   : > { %v2556_v42 = vpack.c.bf16 %v2189_v40, %v2189_v40 }
 0x576   : > { %v2191_v43 = vpop.f32.mrf.mxu0 }
 0x577   : > { %2204 = vst.msk [vmem:[%s1193_s25] sm:$0xf] %vm2203_vm10, %v2556_v42  ;;  %v2192_v44 = vadd.f32 %v2518_v38, %v2191_v43 }
 0x578   : > { %v2670_v45 = vpop.f32.mrf.mxu0 }
 0x579   : > { %v2557_v46 = vpack.c.bf16 %v2192_v44, %v2192_v44 }
 0x57b   : > { %2205 = vst.msk [vmem:[%s1193_s25 + $0x4] sm:$0xf] %vm2203_vm10, %v2557_v46 }
 0x57c PF: > { %s3418_s2 = sld [smem:[#allocation10_spill]] }
 0x57d   : > { %s3419_s8 = sld [smem:[#allocation8_spill]] }
 0x57e   : > { %s3420_s3 = sld [smem:[#allocation9_spill]] }
 0x57f   : > { %s3421_s27 = sld [smem:[#allocation11_spill]] }
 0x582   : > { %s50_s5 = sadd.s32 1, %s3418_s2   ;;  %s3422_s2 = sld [smem:[#allocation12_spill]] }
 0x583   : > { %p47_p0 = scmp.ge.s32.totalorder %s50_s5, 34  }
 0x585   :  { %49 = sbr.rel (!%p47_p0) target bundleno = 61 (0x3d), region = 160 }

// kernel: encoder_decoder_forward.13
= control target key start
LH: loop header
LB: loop body
LE: loop exit
PB: predicated region body
PF: predicated region fallthrough
CT: control target
= control target key end

     0   :  { %s583_s0 = inlined_call_operand.vmem [shape: s32[64], index: 0, kind: input, shape index: {}]   ;;  %s584_s3 = inlined_call_operand.vmem [shape: bf16[2,16,4,128], index: 3, kind: input, shape index: {}, may-alias: {3,4}]   ;;  %s585_s4 = inlined_call_operand.vmem [shape: bf16[2,16,4,128], index: 4, kind: input, shape index: {}, may-alias: {3,4}]   ;;  %s586_s5 = inlined_call_operand.vmem [shape: f32[2,64,4,128], index: 5, kind: output, shape index: {}]   ;;  %s587_s1 = inlined_call_operand.vmem [shape: s32[64], index: 1, kind: input, shape index: {}]   ;;  %s588_s2 = inlined_call_operand.vmem [shape: s32[64], index: 2, kind: input, shape index: {}]  }
   0x1   :  { %s10_s20 = sshll.u32 %s583_s0, 4  ;;  %s14_s23 = sshll.u32 %s587_s1, 4  ;;  %s11_s20 = int_to_ptr.vmem [resolvable:$true] %s10_s20  ;;  %s15_s23 = int_to_ptr.vmem [resolvable:$true] %s14_s23 }
   0x2   :  { %s409_s24 = scalar_lea.vmem %s11_s20, 16  ;;  %p414_p1 = scmp.lt.s32.totalorder %s11_s20, %s11_s20 }
   0x3   :  { %p410_p0 = scmp.ne.s32.totalorder %s11_s20, %s409_s24  ;;  %p415_p2 = scmp.lt.s32.totalorder %s409_s24, %s409_s24 }
   0x5   :  { %p416_p3 = por %p415_p2, %p414_p1 }
   0x7   :  { %p417_p4 = pnand %p416_p3, %p410_p0 }
   0x9   :  { %420 = shalt.err (!%p417_p4)  }
   0xa   :  { %s487_s25 = smov [#allocation3]   ;;  %s421_s26 = scalar_lea.vmem %s15_s23, 16 }
   0xb   :  { %13 = dma.vmem_to_smem %s11_s20, 16, %s487_s25, [#allocation2] }
   0xc   :  { %p422_p5 = scmp.ne.s32.totalorder %s15_s23, %s421_s26  ;;  %p426_p6 = scmp.lt.s32.totalorder %s15_s23, %s15_s23 }
   0xd   :  { %p427_p7 = scmp.lt.s32.totalorder %s421_s26, %s421_s26 }
   0xf   :  { %p428_p8 = por %p427_p7, %p426_p6 }
  0x11   :  { %p429_p9 = pnand %p428_p8, %p422_p5 }
  0x13   :  { %432 = shalt.err (!%p429_p9)  }
  0x14   :  { %s488_s0 = smov [#allocation4]   ;;  %s18_s28 = sshll.u32 %s588_s2, 4  ;;  %s19_s28 = int_to_ptr.vmem [resolvable:$true] %s18_s28 }
  0x15   :  { %17 = dma.vmem_to_smem %s15_s23, 16, %s488_s0, [#allocation2] }
  0x16   :  { %s433_s29 = scalar_lea.vmem %s19_s28, 16  ;;  %p438_p11 = scmp.lt.s32.totalorder %s19_s28, %s19_s28 }
  0x17   :  { %p434_p10 = scmp.ne.s32.totalorder %s19_s28, %s433_s29  ;;  %p439_p12 = scmp.lt.s32.totalorder %s433_s29, %s433_s29 }
  0x19   :  { %p440_p13 = por %p439_p12, %p438_p11 }
  0x1b   :  { %p441_p0 = pnand %p440_p13, %p434_p10 }
  0x1d   :  { %444 = shalt.err (!%p441_p0)  }
  0x1e   :  { %s489_s30 = smov [#allocation5]  }
  0x1f   :  { %21 = dma.vmem_to_smem %s19_s28, 16, %s489_s30, [#allocation2] }
  0x20   :  { %465 = dma.done.wait [#allocation2], 48 }
  0x21   :  { %466 = vsyncadd [#allocation2], 4294967248 }
  0x22   :  { %23 = sfence }
  0x23   :  { %s529_s6 = smov 0   ;;  %s531_s7 = smov 0  }
  0x24   :  { %s533_s8 = smov 0   ;;  %s535_s2 = smov 0  }
  0x25   :  { %s537_s9 = smov 0  }
  0x26 LB: > { %s38_s10 = sadd.s32 1, %s477_s8  ;;  %s41_s11 = sadd.s32 1, %s481_s2  ;;  %s485_s9 = sphi %s537_s9, %s29_s9   ;;  %s481_s2 = sphi %s535_s2, %s592_s2   ;;  %s477_s8 = sphi %s533_s8, %s591_s8   ;;  %s473_s7 = sphi %s531_s7, %s590_s7   ;;  %s469_s6 = sphi %s529_s6, %s589_s6  }
  0x27   : > { %p39_p1 = scmp.ge.s32.totalorder %s38_s10, 64  ;;  %p357_p2 = scmp.ge.s32.totalorder %s485_s9, 1 }
  0x28   : > { %p171_p3 = scmp.lt.s32.totalorder %s485_s9, 129 }
  0x29   : > { %s594_s10 = smov (%p39_p1, %s38_s10), 0  ;;  %s596_s11 = smov (!%p39_p1, %s41_s11), %s481_s2 }
  0x2a   : > { %p172_p4 = pnand %p357_p2, %p171_p3  ;;  %p43_p5 = scmp.ge.s32.totalorder %s596_s11, 2 }
  0x2b   : > { %s209_s12 = sld [smem:[#allocation3 + %s469_s6]] (!%p172_p4)  ;;  %p210_p6 = scmp.lt.s32.totalorder (!%p172_p4), %s473_s7, 1 }
  0x2c   : > { %s598_s11 = smov (%p43_p5, %s596_s11), 0  ;;  %175 = sbr.rel (%p172_p4) target bundleno = 67 (0x43), region = 28 }
  0x2d   : > { %s219_s13 = sld [smem:[#allocation4 + %s469_s6]] (!%p172_p4)  ;;  %p231_p7 = scmp.lt.s32.totalorder (!%p172_p4), %s469_s6, 63 }
  0x2e   : > { %s237_s15 = sld [smem:[#allocation5 + %s469_s6]] (!%p172_p4) }
  0x31   : > { %s600_s7 = smov (!%p210_p6, %s473_s7), 1  ;;  %p212_p8 = scmp.lt.s32.totalorder %s209_s12, 15 }
  0x32   : > { %s232_s14 = scalar_select %p231_p7, %s469_s6, 63 }
  0x33   : > { %s358_s16 = sshll.u32 %s600_s7, 4  ;;  %p222_p9 = scmp.lt.s32.totalorder %s219_s13, 15 }
  0x34   : > { %s602_s12 = smov (!%p212_p8, %s209_s12), 15  ;;  %s362_s18 = sshll.u32 %s600_s7, 6 }
  0x35   : > { %s604_s13 = smov (!%p222_p9, %s219_s13), 15  ;;  %s215_s17 = sadd.s32 %s358_s16, %s602_s12 }
  0x36   : > { %s359_s19 = sshll.u32 %s215_s17, 1  ;;  %s225_s20 = sadd.s32 %s358_s16, %s604_s13 }
  0x37   : > { %s217_s23 = scalar_lea.vmem %s584_s3, %s359_s19  ;;  %s361_s24 = sshll.u32 %s225_s20, 1 }
  0x38   : > { %s227_s0 = scalar_lea.vmem %s585_s4, %s361_s24  ;;  %s238_s1 = scvt.s32.f32 %s237_s15  ;;  %v240_v0 = vld [vmem:[%s217_s23] sm:$0x3] }
  0x39   : > { %s234_s27 = sadd.s32 %s362_s18, %s232_s14  ;;  %v241_v1 = vunpack.c.l.bf16 %v240_v0  ;;  %v242_v2 = vld [vmem:[%s227_s0] sm:$0x3] }
  0x3a   : > { %s239_s28 = smul.f32 1.5258789e-05, %s238_s1  ;;  %v243_v3 = vunpack.c.l.bf16 %v242_v2  ;;  %s363_s29 = sshll.u32 %s234_s27, 2 }
  0x3b   : > { %s236_s7 = scalar_lea.vmem %s586_s5, %s363_s29 }
  0x3c   : > { %v244_v4 = vsub.f32 %v243_v3, %v241_v1  ;;  %v245_v5 = vstv %s239_s28 }
  0x3e   : > { %v246_v6 = vmul.f32 %v245_v5, %v244_v4 }
  0x40   : > { %v247_v7 = vadd.f32 %v246_v6, %v241_v1 }
  0x42   : > { %248 = vst [vmem:[%s236_s7] sm:$0xf] %v247_v7 }
  0x43 PF: > { %s29_s9 = sadd.s32 1, %s485_s9   ;;  %s589_s6 = smov %s477_s8 }
  0x44   : > { %p26_p10 = scmp.ge.s32.totalorder %s29_s9, 130   ;;  %s590_s7 = smov %s481_s2 }
  0x45   : > { %s591_s8 = smov %s594_s10  ;;  %s592_s2 = smov %s598_s11 }
  0x46   :  { %28 = sbr.rel (!%p26_p10) target bundleno = 38 (0x26), region = 61 }

</bundles_post_ra>
